<compile_context>
chip_gen: v6e
topology: v6e:2x2x1
jax: 0.10.0
libtpu: 0.0.40
codegen_flags: <defaults>
</compile_context>

<pallas_src>
import jax
import jax.numpy as jnp
from jax.experimental import pallas as pl
from jax.experimental.pallas import tpu as pltpu

NEG_SLOPE = 0.01          # nn.LeakyReLU() default
MLP = [64, 128, 512, 1024]
BN_EPS = 1e-5
K_PAD = 8                 # pad tiny input-channel dim (k=3) up to 8 lanes
TILE_N = 128              # points per grid step (multiple of 128; fits v5e/v6e/v7x VMEM)


def pointnet_kernel(x_ref,
                    w1_ref, s1_ref, t1_ref,
                    w2_ref, s2_ref, t2_ref,
                    w3_ref, s3_ref, t3_ref,
                    w4_ref, s4_ref, t4_ref,
                    o_ref):
    # x_ref: (1, TILE_N, K_PAD) bf16; o_ref: (1, 1, 1024) f32, resident across the n axis.
    n = pl.program_id(1)

    @pl.when(n == 0)
    def _():
        o_ref[...] = jnp.full_like(o_ref, -jnp.inf)

    def layer(h, w_ref, s_ref, t_ref):
        # pointwise Conv1d == (TILE_N, Cin) @ (Cin, Cout) on the MXU (bf16 in, f32 acc),
        # then folded conv-bias + eval-mode BN affine, then LeakyReLU (all f32).
        y = jnp.dot(h, w_ref[...], preferred_element_type=jnp.float32)
        y = y * s_ref[...] + t_ref[...]
        return jnp.where(y > 0, y, NEG_SLOPE * y)

    h = x_ref[0]                                                 # (TILE_N, K_PAD) bf16
    h = layer(h, w1_ref, s1_ref, t1_ref).astype(jnp.bfloat16)    # (TILE_N, 64)
    h = layer(h, w2_ref, s2_ref, t2_ref).astype(jnp.bfloat16)    # (TILE_N, 128)
    h = layer(h, w3_ref, s3_ref, t3_ref).astype(jnp.bfloat16)    # (TILE_N, 512)
    h = layer(h, w4_ref, s4_ref, t4_ref)                         # (TILE_N, 1024) f32

    # torch.max over the points axis, accumulated tile by tile (XLU reduce + VPU max).
    tile_max = jnp.max(h, axis=0, keepdims=True)                 # (1, 1024)
    o_ref[0] = jnp.maximum(o_ref[0], tile_max)


def init_params(key, k=3, mlp=MLP):
    """Deterministic synthetic params. Conv bias + eval-mode BN folded to (scale, shift)."""
    params = []
    cin = k
    for cout in mlp:
        key, kw, kb = jax.random.split(key, 3)
        bound = 1.0 / (cin ** 0.5)
        w = jax.random.uniform(kw, (cin, cout), jnp.float32, -bound, bound)   # Conv1d weight (Cin, Cout)
        conv_b = jax.random.uniform(kb, (cout,), jnp.float32, -bound, bound)  # Conv1d bias
        gamma = jnp.ones((cout,), jnp.float32)          # BN weight
        beta = jnp.zeros((cout,), jnp.float32)          # BN bias
        running_mean = jnp.zeros((cout,), jnp.float32)
        running_var = jnp.ones((cout,), jnp.float32)
        scale = gamma / jnp.sqrt(running_var + BN_EPS)
        shift = (conv_b - running_mean) * scale + beta
        params.append((w, scale.reshape(1, cout), shift.reshape(1, cout)))
        cin = cout
    return params


def new_pointnet_forward(x_ncw, params, tile_n=TILE_N):
    """x_ncw: (B, k, N) float32, exactly like the PyTorch module's input."""
    B, k, N = x_ncw.shape
    assert k <= K_PAD

    # NCW -> NWC so points live on sublanes and channels on lanes.
    x = jnp.transpose(x_ncw, (0, 2, 1)).astype(jnp.float32)       # (B, N, k)

    # Pad points axis to a tile multiple by replicating the last point (max-pool invariant),
    # pad channels with zeros (zero inputs contribute nothing to the matmul).
    n_pad = (-N) % tile_n
    if n_pad:
        x = jnp.concatenate(
            [x, jnp.broadcast_to(x[:, -1:, :], (B, n_pad, k))], axis=1)
    x = jnp.pad(x, ((0, 0), (0, 0), (0, K_PAD - k))).astype(jnp.bfloat16)
    n_total = N + n_pad
    n_tiles = n_total // tile_n

    args = [x]
    in_specs = [pl.BlockSpec((1, tile_n, K_PAD), lambda b, n: (b, n, 0))]

    flops = 0
    bytes_accessed = x.size * 2                                   # bf16 input
    cin = K_PAD
    for (w, s, t) in params:
        cout = w.shape[1]
        # zero-pad first-layer weight rows up to K_PAD; cast weights to bf16 for the MXU.
        w_pad = jnp.zeros((cin, cout), jnp.float32).at[:w.shape[0]].set(w)
        w_bf = w_pad.astype(jnp.bfloat16)
        args += [w_bf, s, t]
        in_specs += [
            pl.BlockSpec((cin, cout), lambda b, n: (0, 0)),
            pl.BlockSpec((1, cout), lambda b, n: (0, 0)),
            pl.BlockSpec((1, cout), lambda b, n: (0, 0)),
        ]
        flops += 2 * B * n_total * cin * cout
        bytes_accessed += w_bf.size * 2 + s.size * 4 + t.size * 4
        cin = cout
    bytes_accessed += B * MLP[-1] * 4                             # f32 output

    out = pl.pallas_call(
        pointnet_kernel,
        out_shape=jax.ShapeDtypeStruct((B, 1, MLP[-1]), jnp.float32),
        grid=(B, n_tiles),
        in_specs=in_specs,
        out_specs=pl.BlockSpec((1, 1, MLP[-1]), lambda b, n: (b, 0, 0)),
        compiler_params=pltpu.CompilerParams(
            dimension_semantics=("parallel", "arbitrary")),
        cost_estimate=pl.CostEstimate(
            flops=int(flops), transcendentals=0, bytes_accessed=int(bytes_accessed)),
    )(*args)

    # x.view(-1, 1024 * x.shape[2]) with shape[2] == 1  ->  (B, 1024)
    return out.reshape(B, MLP[-1])


def reference_forward(x_ncw, params):
    """Pure-JAX f32 reference mirroring the PyTorch forward (eval-mode BN)."""
    h = jnp.transpose(x_ncw, (0, 2, 1)).astype(jnp.float32)       # (B, N, k)
    for (w, s, t) in params:
        h = jnp.einsum('bnc,cd->bnd', h, w) * s + t
        h = jnp.where(h > 0, h, NEG_SLOPE * h)
    return jnp.max(h, axis=1)                                     # (B, 1024)


if __name__ == "__main__":
    key = jax.random.PRNGKey(0)
    kp, kx = jax.random.split(key)

    B, k, N = 2, 3, 200          # N not a tile multiple -> exercises the edge-replication pad
    params = init_params(kp, k=k)
    x = jax.random.normal(kx, (B, k, N), dtype=jnp.float32)

    out = new_pointnet_forward(x, params)
    out = jax.block_until_ready(out)

    ref = reference_forward(x, params)
    assert out.shape == (B, 1024), out.shape
    # bf16 matmuls (f32 accumulation) -> loosened tolerance vs. the pure-f32 reference.
    assert jnp.allclose(out, ref, atol=2e-2, rtol=2e-2), float(jnp.max(jnp.abs(out - ref)))

    print("KERNEL_OK")
</pallas_src>

<mosaic_0001>
module attributes {stable_mosaic.version = 11 : i64} {
  func.func @pointnet_kernel(%arg0: i32, %arg1: i32, %arg2: memref<1x128x8xbf16, #tpu.memory_space<vmem>>, %arg3: memref<8x64xbf16, #tpu.memory_space<vmem>>, %arg4: memref<1x64xf32, #tpu.memory_space<vmem>>, %arg5: memref<1x64xf32, #tpu.memory_space<vmem>>, %arg6: memref<64x128xbf16, #tpu.memory_space<vmem>>, %arg7: memref<1x128xf32, #tpu.memory_space<vmem>>, %arg8: memref<1x128xf32, #tpu.memory_space<vmem>>, %arg9: memref<128x512xbf16, #tpu.memory_space<vmem>>, %arg10: memref<1x512xf32, #tpu.memory_space<vmem>>, %arg11: memref<1x512xf32, #tpu.memory_space<vmem>>, %arg12: memref<512x1024xbf16, #tpu.memory_space<vmem>>, %arg13: memref<1x1024xf32, #tpu.memory_space<vmem>>, %arg14: memref<1x1024xf32, #tpu.memory_space<vmem>>, %arg15: memref<1x1x1024xf32, #tpu.memory_space<vmem>>) attributes {dimension_semantics = [#tpu.dimension_semantics<parallel>, #tpu.dimension_semantics<arbitrary>], iteration_bounds = array<i64: 2, 2>, scalar_prefetch = 0 : i64, scratch_operands = 0 : i64, tpu.core_type = #tpu.core_type<tc>, window_params = [{transform_indices = @transform_0, window_bounds = array<i64: 1, 128, 8>}, {pipeline_mode = #tpu.pipeline_mode<synchronous>, transform_indices = @transform_1, window_bounds = array<i64: 8, 64>}, {pipeline_mode = #tpu.pipeline_mode<synchronous>, transform_indices = @transform_2, window_bounds = array<i64: 1, 64>}, {pipeline_mode = #tpu.pipeline_mode<synchronous>, transform_indices = @transform_3, window_bounds = array<i64: 1, 64>}, {pipeline_mode = #tpu.pipeline_mode<synchronous>, transform_indices = @transform_4, window_bounds = array<i64: 64, 128>}, {pipeline_mode = #tpu.pipeline_mode<synchronous>, transform_indices = @transform_5, window_bounds = array<i64: 1, 128>}, {pipeline_mode = #tpu.pipeline_mode<synchronous>, transform_indices = @transform_6, window_bounds = array<i64: 1, 128>}, {pipeline_mode = #tpu.pipeline_mode<synchronous>, transform_indices = @transform_7, window_bounds = array<i64: 128, 512>}, {pipeline_mode = #tpu.pipeline_mode<synchronous>, transform_indices = @transform_8, window_bounds = array<i64: 1, 512>}, {pipeline_mode = #tpu.pipeline_mode<synchronous>, transform_indices = @transform_9, window_bounds = array<i64: 1, 512>}, {pipeline_mode = #tpu.pipeline_mode<synchronous>, transform_indices = @transform_10, window_bounds = array<i64: 512, 1024>}, {pipeline_mode = #tpu.pipeline_mode<synchronous>, transform_indices = @transform_11, window_bounds = array<i64: 1, 1024>}, {pipeline_mode = #tpu.pipeline_mode<synchronous>, transform_indices = @transform_12, window_bounds = array<i64: 1, 1024>}, {transform_indices = @transform_13, window_bounds = array<i64: 1, 1, 1024>}]} {
    %c0_i32 = arith.constant 0 : i32
    %0 = arith.cmpi eq, %arg1, %c0_i32 : i32
    %1 = arith.extui %0 : i1 to i32
    %c0_i32_0 = arith.constant 0 : i32
    %2 = arith.cmpi ne, %1, %c0_i32_0 : i32
    scf.if %2 {
      %cst_45 = arith.constant 0xFF800000 : f32
      %68 = vector.broadcast %cst_45 : f32 to vector<1x1x1024xf32>
      %c0_46 = arith.constant 0 : index
      %c0_47 = arith.constant 0 : index
      %c0_48 = arith.constant 0 : index
      %69 = vector.load %arg15[%c0_46, %c0_47, %c0_48] : memref<1x1x1024xf32, #tpu.memory_space<vmem>>, vector<1x1x1024xf32>
      tpu.vector_store %arg15[%c0_46, %c0_47, %c0_48], %68 {strides = array<i32>} : memref<1x1x1024xf32, #tpu.memory_space<vmem>>, vector<1x1x1024xf32>,
    } else {
    }
    %c0 = arith.constant 0 : index
    %c0_1 = arith.constant 0 : index
    %c0_2 = arith.constant 0 : index
    %3 = vector.load %arg2[%c0, %c0_1, %c0_2] : memref<1x128x8xbf16, #tpu.memory_space<vmem>>, vector<1x128x8xbf16>
    %4 = vector.shape_cast %3 : vector<1x128x8xbf16> to vector<128x8xbf16>
    %c0_3 = arith.constant 0 : index
    %c0_4 = arith.constant 0 : index
    %5 = vector.load %arg3[%c0_3, %c0_4] : memref<8x64xbf16, #tpu.memory_space<vmem>>, vector<8x64xbf16>
    %cst = arith.constant dense<0.000000e+00> : vector<128x64xf32>
    %6 = tpu.matmul %4, %5, %cst {dimension_numbers = #tpu.dot_dimension_numbers<[1], [0], [0], [1], [0, 0, 1, 1], [], []>} : vector<128x8xbf16>, vector<8x64xbf16>, vector<128x64xf32> -> vector<128x64xf32>
    %c0_5 = arith.constant 0 : index
    %c0_6 = arith.constant 0 : index
    %7 = vector.load %arg4[%c0_5, %c0_6] : memref<1x64xf32, #tpu.memory_space<vmem>>, vector<1x64xf32>
    %8 = vector.broadcast %7 : vector<1x64xf32> to vector<128x64xf32>
    %9 = arith.mulf %6, %8 : vector<128x64xf32>
    %c0_7 = arith.constant 0 : index
    %c0_8 = arith.constant 0 : index
    %10 = vector.load %arg5[%c0_7, %c0_8] : memref<1x64xf32, #tpu.memory_space<vmem>>, vector<1x64xf32>
    %11 = vector.broadcast %10 : vector<1x64xf32> to vector<128x64xf32>
    %12 = arith.addf %9, %11 : vector<128x64xf32>
    %cst_9 = arith.constant 0.000000e+00 : f32
    %13 = vector.broadcast %cst_9 : f32 to vector<128x64xf32>
    %14 = arith.cmpf ogt, %12, %13 : vector<128x64xf32>
    %cst_10 = arith.constant 0.00999999977 : f32
    %15 = vector.broadcast %cst_10 : f32 to vector<128x64xf32>
    %16 = arith.mulf %15, %12 : vector<128x64xf32>
    %17 = arith.select %14, %12, %16 : vector<128x64xi1>, vector<128x64xf32>
    %18 = arith.truncf %17 : vector<128x64xf32> to vector<128x64xbf16>
    %c0_11 = arith.constant 0 : index
    %c0_12 = arith.constant 0 : index
    %19 = vector.load %arg6[%c0_11, %c0_12] : memref<64x128xbf16, #tpu.memory_space<vmem>>, vector<64x128xbf16>
    %cst_13 = arith.constant dense<0.000000e+00> : vector<128x128xf32>
    %20 = tpu.matmul %18, %19, %cst_13 {dimension_numbers = #tpu.dot_dimension_numbers<[1], [0], [0], [1], [0, 0, 1, 1], [], []>} : vector<128x64xbf16>, vector<64x128xbf16>, vector<128x128xf32> -> vector<128x128xf32>
    %c0_14 = arith.constant 0 : index
    %c0_15 = arith.constant 0 : index
    %21 = vector.load %arg7[%c0_14, %c0_15] : memref<1x128xf32, #tpu.memory_space<vmem>>, vector<1x128xf32>
    %22 = vector.broadcast %21 : vector<1x128xf32> to vector<128x128xf32>
    %23 = arith.mulf %20, %22 : vector<128x128xf32>
    %c0_16 = arith.constant 0 : index
    %c0_17 = arith.constant 0 : index
    %24 = vector.load %arg8[%c0_16, %c0_17] : memref<1x128xf32, #tpu.memory_space<vmem>>, vector<1x128xf32>
    %25 = vector.broadcast %24 : vector<1x128xf32> to vector<128x128xf32>
    %26 = arith.addf %23, %25 : vector<128x128xf32>
    %cst_18 = arith.constant 0.000000e+00 : f32
    %27 = vector.broadcast %cst_18 : f32 to vector<128x128xf32>
    %28 = arith.cmpf ogt, %26, %27 : vector<128x128xf32>
    %cst_19 = arith.constant 0.00999999977 : f32
    %29 = vector.broadcast %cst_19 : f32 to vector<128x128xf32>
    %30 = arith.mulf %29, %26 : vector<128x128xf32>
    %31 = arith.select %28, %26, %30 : vector<128x128xi1>, vector<128x128xf32>
    %32 = arith.truncf %31 : vector<128x128xf32> to vector<128x128xbf16>
    %c0_20 = arith.constant 0 : index
    %c0_21 = arith.constant 0 : index
    %33 = vector.load %arg9[%c0_20, %c0_21] : memref<128x512xbf16, #tpu.memory_space<vmem>>, vector<128x512xbf16>
    %cst_22 = arith.constant dense<0.000000e+00> : vector<128x512xf32>
    %34 = tpu.matmul %32, %33, %cst_22 {dimension_numbers = #tpu.dot_dimension_numbers<[1], [0], [0], [1], [0, 0, 1, 1], [], []>} : vector<128x128xbf16>, vector<128x512xbf16>, vector<128x512xf32> -> vector<128x512xf32>
    %c0_23 = arith.constant 0 : index
    %c0_24 = arith.constant 0 : index
    %35 = vector.load %arg10[%c0_23, %c0_24] : memref<1x512xf32, #tpu.memory_space<vmem>>, vector<1x512xf32>
    %36 = vector.broadcast %35 : vector<1x512xf32> to vector<128x512xf32>
    %37 = arith.mulf %34, %36 : vector<128x512xf32>
    %c0_25 = arith.constant 0 : index
    %c0_26 = arith.constant 0 : index
    %38 = vector.load %arg11[%c0_25, %c0_26] : memref<1x512xf32, #tpu.memory_space<vmem>>, vector<1x512xf32>
    %39 = vector.broadcast %38 : vector<1x512xf32> to vector<128x512xf32>
    %40 = arith.addf %37, %39 : vector<128x512xf32>
    %cst_27 = arith.constant 0.000000e+00 : f32
    %41 = vector.broadcast %cst_27 : f32 to vector<128x512xf32>
    %42 = arith.cmpf ogt, %40, %41 : vector<128x512xf32>
    %cst_28 = arith.constant 0.00999999977 : f32
    %43 = vector.broadcast %cst_28 : f32 to vector<128x512xf32>
    %44 = arith.mulf %43, %40 : vector<128x512xf32>
    %45 = arith.select %42, %40, %44 : vector<128x512xi1>, vector<128x512xf32>
    %46 = arith.truncf %45 : vector<128x512xf32> to vector<128x512xbf16>
    %c0_29 = arith.constant 0 : index
    %c0_30 = arith.constant 0 : index
    %47 = vector.load %arg12[%c0_29, %c0_30] : memref<512x1024xbf16, #tpu.memory_space<vmem>>, vector<512x1024xbf16>
    %cst_31 = arith.constant dense<0.000000e+00> : vector<128x1024xf32>
    %48 = tpu.matmul %46, %47, %cst_31 {dimension_numbers = #tpu.dot_dimension_numbers<[1], [0], [0], [1], [0, 0, 1, 1], [], []>} : vector<128x512xbf16>, vector<512x1024xbf16>, vector<128x1024xf32> -> vector<128x1024xf32>
    %c0_32 = arith.constant 0 : index
    %c0_33 = arith.constant 0 : index
    %49 = vector.load %arg13[%c0_32, %c0_33] : memref<1x1024xf32, #tpu.memory_space<vmem>>, vector<1x1024xf32>
    %50 = vector.broadcast %49 : vector<1x1024xf32> to vector<128x1024xf32>
    %51 = arith.mulf %48, %50 : vector<128x1024xf32>
    %c0_34 = arith.constant 0 : index
    %c0_35 = arith.constant 0 : index
    %52 = vector.load %arg14[%c0_34, %c0_35] : memref<1x1024xf32, #tpu.memory_space<vmem>>, vector<1x1024xf32>
    %53 = vector.broadcast %52 : vector<1x1024xf32> to vector<128x1024xf32>
    %54 = arith.addf %51, %53 : vector<128x1024xf32>
    %cst_36 = arith.constant 0.000000e+00 : f32
    %55 = vector.broadcast %cst_36 : f32 to vector<128x1024xf32>
    %56 = arith.cmpf ogt, %54, %55 : vector<128x1024xf32>
    %cst_37 = arith.constant 0.00999999977 : f32
    %57 = vector.broadcast %cst_37 : f32 to vector<128x1024xf32>
    %58 = arith.mulf %57, %54 : vector<128x1024xf32>
    %59 = arith.select %56, %54, %58 : vector<128x1024xi1>, vector<128x1024xf32>
    %cst_38 = arith.constant dense<0xFF800000> : vector<1024xf32>
    %60 = vector.multi_reduction <maximumf>, %59, %cst_38 [0] : vector<128x1024xf32> to vector<1024xf32>
    %61 = vector.shape_cast %60 : vector<1024xf32> to vector<1x1024xf32>
    %c0_39 = arith.constant 0 : index
    %c0_40 = arith.constant 0 : index
    %c0_41 = arith.constant 0 : index
    %62 = vector.load %arg15[%c0_39, %c0_40, %c0_41] : memref<1x1x1024xf32, #tpu.memory_space<vmem>>, vector<1x1x1024xf32>
    %63 = vector.shape_cast %62 : vector<1x1x1024xf32> to vector<1x1024xf32>
    %64 = arith.maximumf %63, %61 : vector<1x1024xf32>
    %c0_42 = arith.constant 0 : index
    %c0_43 = arith.constant 0 : index
    %c0_44 = arith.constant 0 : index
    %65 = vector.load %arg15[%c0_42, %c0_43, %c0_44] : memref<1x1x1024xf32, #tpu.memory_space<vmem>>, vector<1x1x1024xf32>
    %66 = vector.shape_cast %65 : vector<1x1x1024xf32> to vector<1x1024xf32>
    %67 = vector.shape_cast %64 : vector<1x1024xf32> to vector<1x1x1024xf32>
    tpu.vector_store %arg15[%c0_42, %c0_43, %c0_44], %67 {strides = array<i32>} : memref<1x1x1024xf32, #tpu.memory_space<vmem>>, vector<1x1x1024xf32>,
    return
  }
  func.func @transform_0(%arg0: i32, %arg1: i32) -> (i32, i32, i32) {
    %c0_i32 = arith.constant 0 : i32
    %c0_i32_0 = arith.constant 0 : i32
    return %arg0, %arg1, %c0_i32 : i32, i32, i32
  }
  func.func @transform_1(%arg0: i32, %arg1: i32) -> (i32, i32) {
    %c0_i32 = arith.constant 0 : i32
    %c0_i32_0 = arith.constant 0 : i32
    %c0_i32_1 = arith.constant 0 : i32
    return %c0_i32, %c0_i32_0 : i32, i32
  }
  func.func @transform_2(%arg0: i32, %arg1: i32) -> (i32, i32) {
    %c0_i32 = arith.constant 0 : i32
    %c0_i32_0 = arith.constant 0 : i32
    %c0_i32_1 = arith.constant 0 : i32
    return %c0_i32, %c0_i32_0 : i32, i32
  }
  func.func @transform_3(%arg0: i32, %arg1: i32) -> (i32, i32) {
    %c0_i32 = arith.constant 0 : i32
    %c0_i32_0 = arith.constant 0 : i32
    %c0_i32_1 = arith.constant 0 : i32
    return %c0_i32, %c0_i32_0 : i32, i32
  }
  func.func @transform_4(%arg0: i32, %arg1: i32) -> (i32, i32) {
    %c0_i32 = arith.constant 0 : i32
    %c0_i32_0 = arith.constant 0 : i32
    %c0_i32_1 = arith.constant 0 : i32
    return %c0_i32, %c0_i32_0 : i32, i32
  }
  func.func @transform_5(%arg0: i32, %arg1: i32) -> (i32, i32) {
    %c0_i32 = arith.constant 0 : i32
    %c0_i32_0 = arith.constant 0 : i32
    %c0_i32_1 = arith.constant 0 : i32
    return %c0_i32, %c0_i32_0 : i32, i32
  }
  func.func @transform_6(%arg0: i32, %arg1: i32) -> (i32, i32) {
    %c0_i32 = arith.constant 0 : i32
    %c0_i32_0 = arith.constant 0 : i32
    %c0_i32_1 = arith.constant 0 : i32
    return %c0_i32, %c0_i32_0 : i32, i32
  }
  func.func @transform_7(%arg0: i32, %arg1: i32) -> (i32, i32) {
    %c0_i32 = arith.constant 0 : i32
    %c0_i32_0 = arith.constant 0 : i32
    %c0_i32_1 = arith.constant 0 : i32
    return %c0_i32, %c0_i32_0 : i32, i32
  }
  func.func @transform_8(%arg0: i32, %arg1: i32) -> (i32, i32) {
    %c0_i32 = arith.constant 0 : i32
    %c0_i32_0 = arith.constant 0 : i32
    %c0_i32_1 = arith.constant 0 : i32
    return %c0_i32, %c0_i32_0 : i32, i32
  }
  func.func @transform_9(%arg0: i32, %arg1: i32) -> (i32, i32) {
    %c0_i32 = arith.constant 0 : i32
    %c0_i32_0 = arith.constant 0 : i32
    %c0_i32_1 = arith.constant 0 : i32
    return %c0_i32, %c0_i32_0 : i32, i32
  }
  func.func @transform_10(%arg0: i32, %arg1: i32) -> (i32, i32) {
    %c0_i32 = arith.constant 0 : i32
    %c0_i32_0 = arith.constant 0 : i32
    %c0_i32_1 = arith.constant 0 : i32
    return %c0_i32, %c0_i32_0 : i32, i32
  }
  func.func @transform_11(%arg0: i32, %arg1: i32) -> (i32, i32) {
    %c0_i32 = arith.constant 0 : i32
    %c0_i32_0 = arith.constant 0 : i32
    %c0_i32_1 = arith.constant 0 : i32
    return %c0_i32, %c0_i32_0 : i32, i32
  }
  func.func @transform_12(%arg0: i32, %arg1: i32) -> (i32, i32) {
    %c0_i32 = arith.constant 0 : i32
    %c0_i32_0 = arith.constant 0 : i32
    %c0_i32_1 = arith.constant 0 : i32
    return %c0_i32, %c0_i32_0 : i32, i32
  }
  func.func @transform_13(%arg0: i32, %arg1: i32) -> (i32, i32, i32) {
    %c0_i32 = arith.constant 0 : i32
    %c0_i32_0 = arith.constant 0 : i32
    %c0_i32_1 = arith.constant 0 : i32
    return %arg0, %c0_i32, %c0_i32_0 : i32, i32, i32
  }
}

</mosaic_0001>

<bundles_post_ra>
// kernel: tpu_custom_call.1
= control target key start
LH: loop header
LB: loop body
LE: loop exit
PB: predicated region body
PF: predicated region fallthrough
CT: control target
= control target key end

     0   :  { %s8271_s0 = inlined_call_operand.vmem [shape: bf16[2,256,8], index: 0, kind: input, shape index: {}]   ;;  %s8272_s1 = inlined_call_operand.vmem [shape: bf16[8,64], index: 1, kind: input, shape index: {}]   ;;  %s8273_s2 = inlined_call_operand.hbm [shape: f32[1,64], index: 2, kind: input, shape index: {}]   ;;  %s8274_s3 = inlined_call_operand.hbm [shape: f32[1,64], index: 3, kind: input, shape index: {}]   ;;  %s8275_s4 = inlined_call_operand.hbm [shape: bf16[64,128], index: 4, kind: input, shape index: {}]   ;;  %s8276_s5 = inlined_call_operand.hbm [shape: f32[1,128], index: 5, kind: input, shape index: {}]   ;;  %s8277_s6 = inlined_call_operand.hbm [shape: f32[1,128], index: 6, kind: input, shape index: {}]   ;;  %s8278_s7 = inlined_call_operand.vmem [shape: bf16[128,512], index: 7, kind: input, shape index: {}]   ;;  %s8279_s8 = inlined_call_operand.vmem [shape: f32[1,512], index: 8, kind: input, shape index: {}]   ;;  %s8280_s9 = inlined_call_operand.vmem [shape: f32[1,512], index: 9, kind: input, shape index: {}]   ;;  %s8281_s10 = inlined_call_operand.hbm [shape: bf16[512,1024], index: 10, kind: input, shape index: {}]   ;;  %s8282_s11 = inlined_call_operand.vmem [shape: f32[1,1024], index: 11, kind: input, shape index: {}]   ;;  %s8283_s12 = inlined_call_operand.vmem [shape: f32[1,1024], index: 12, kind: input, shape index: {}]   ;;  %s8284_s13 = inlined_call_operand.hbm [shape: f32[2,1,1024], index: 13, kind: output, shape index: {}]  }
   0x1   :  { %8413 = sst [smem:[#allocation84_spill]] %s8273_s2 }
   0x2   :  { %8414 = sst [smem:[#allocation85_spill]] %s8274_s3 }
   0x3   :  { %18 = vsyncpa [#allocation3], 0 }
   0x4   :  { %19 = vsyncpa [#allocation6], 0 }
   0x5   :  { %20 = vsyncpa [#allocation9], 0 }
   0x6   :  { %21 = vsyncpa [#allocation12], 0 }
   0x7   :  { %22 = vsyncpa [#allocation4], 0 }
   0x8   :  { %24 = vsyncpa [#allocation4 + $0x1], 0  ;;  %s6415_s25 = smov 0   ;;  %s6417_s26 = smov 0  }
   0x9   :  { %s6419_s27 = smov 0   ;;  %s6421_s28 = smov 0  }
   0xa   :  { %s6423_s29 = smov 0   ;;  %s6425_s30 = smov 0  }
   0xb   :  { %s6427_s14 = smov 0   ;;  %s6429_s15 = smov 0  }
   0xc LB: > { %8415 = sst [smem:[#allocation19_spill]] %s6301_s25  ;;  %s5452_s16 = sadd.s32 4294967295, %s6329_s15   ;;  %s6329_s15 = sphi %s6429_s15, %s30_s15   ;;  %s6325_s14 = sphi %s6427_s14, %s8624_s14   ;;  %s6321_s30 = sphi %s6425_s30, %s8623_s30   ;;  %s6317_s29 = sphi %s6423_s29, %s8622_s29   ;;  %s6313_s28 = sphi %s6421_s28, %s8621_s28   ;;  %s6309_s27 = sphi %s6419_s27, %s8620_s27   ;;  %s6305_s26 = sphi %s6417_s26, %s8626_s26   ;;  %s6301_s25 = sphi %s6415_s25, %s8625_s25  }
   0xd   : > { %8416 = sst [smem:[#allocation20_spill]] %s6309_s27  ;;  %s5453_s17 = sadd.s32 4294967294, %s6329_s15  }
   0xe   : > { %8417 = sst [smem:[#allocation21_spill]] %s6321_s30  ;;  %s39_s18 = sadd.s32 1, %s6321_s30 }
   0xf   : > { %8418 = sst [smem:[#allocation22_spill]] %s6325_s14  ;;  %s42_s19 = sadd.s32 1, %s6325_s14 }
  0x10   : > { %8419 = sst [smem:[#allocation23_spill]] %s6329_s15  ;;  %p40_p0 = scmp.ge.s32.totalorder %s39_s18, 2 }
  0x11   : > { %s329_s20 = sadd.s32 1, %s6309_s27  ;;  %p339_p1 = scmp.ne.s32.totalorder %s6309_s27, %s6305_s26 }
  0x12   : > { %p340_p2 = scmp.eq.s32.totalorder %s5452_s16, 3  ;;  %s8628_s18 = smov (%p40_p0, %s39_s18), 0 }
  0x13   : > { %8420 = sst [smem:[#allocation24_spill]] %s8628_s18  ;;  %s8630_s19 = smov (!%p40_p0, %s42_s19), %s6325_s14 }
  0x14   : > { %p6465_p3 = por %p340_p2, %p339_p1  ;;  %p345_p4 = scmp.ne.s32.totalorder %s6305_s26, %s6301_s25 }
  0x15   : > { %p44_p5 = scmp.ge.s32.totalorder %s8630_s19, 2  ;;  %p346_p6 = scmp.eq.s32.totalorder %s5453_s17, 3 }
  0x16   : > { %s8421_s21 = scalar_select %p6465_p3, 1, 0 }
  0x17   : > { %p5454_p7 = scmp.ge.s32.totalorder %s6329_s15, 1  ;;  %p353_p8 = scmp.lt.s32.totalorder %s6329_s15, 5 }
  0x18   : > { %s8632_s19 = smov (%p44_p5, %s8630_s19), 0  ;;  %p6475_p9 = por %p346_p6, %p345_p4 }
  0x19   : > { %8422 = sst [smem:[#allocation25_spill]] %s8632_s19  ;;  %p6479_p10 = pnand %p5454_p7, %p353_p8 }
  0x1a   : > { %s8423_s22 = scalar_select %p6475_p9, 1, 0 }
  0x1b   : > { %s8425_s23 = scalar_select %p6479_p10, 1, 0 }
  0x1c   : > { %8424 = sst [smem:[#allocation26_spill]] %s8423_s22  ;;  %s326_s24 = ssub.s32 %s6325_s14, %s8632_s19 }
  0x1d   : > { %p327_p11 = scmp.eq.s32.totalorder %s326_s24, 0  ;;  %p5890_p12 = pneg %p6479_p10 }
  0x1e   : > { %p6487_p13 = scmp.eq.s32.totalorder %s5452_s16, 0  ;;  %s6331_s22 = smov [#allocation5]  }
  0x1f   : > { %s6492_s18 = scalar_select %p327_p11, %s6309_s27, %s329_s20  }
  0x20   : > { %s8426_s17 = scalar_select %p6487_p13, 1, 0 }
  0x21   : > { %8427 = sst [smem:[#allocation27_spill]] %s6492_s18  ;;  %p6496_p0 = pnand %p6487_p13, %p5890_p12 }
  0x22   : > { %s380_s25 = sshll.u32 %s6331_s22, 4  ;;  %s6332_s19 = smov [#allocation8]   ;;  %s381_s25 = int_to_ptr.vmem [resolvable:$true] %s380_s25 }
  0x23   : > { %s404_s24 = sshll.u32 %s6332_s19, 4  ;;  %p6502_p1 = pneg %p6496_p0  ;;  %s405_s24 = int_to_ptr.vmem [resolvable:$true] %s404_s24 }
  0x24   : > { %s6076_s14 = scalar_lea.vmem %s381_s25, 16  ;;  %s6083_s20 = scalar_lea.vmem %s381_s25, 32 }
  0x25   : > { %p6077_p2 = scmp.ne.s32.totalorder %s381_s25, %s6076_s14  ;;  %p6084_p6 = scmp.lt.s32.totalorder %s381_s25, %s381_s25 }
  0x26   : > { %p6085_p7 = scmp.lt.s32.totalorder %s6083_s20, %s6076_s14 }
  0x27   : > { %p6079_p4 = pnand %p6077_p2, %p6502_p1 }
  0x28   : > { %p6086_p8 = por %p6085_p7, %p6084_p6 }
  0x29   : > { %p6080_p5 = pneg %p6079_p4 }
  0x2b   : > { %p6087_p11 = pnand %p6086_p8, %p6080_p5 }
  0x2d   : > { %6090 = shalt.err (!%p6087_p11)
}
  0x2e   : > { %s8430_s3 = sld [smem:[#allocation85_spill]]  ;;  %s6102_s18 = scalar_lea.vmem %s405_s24, 16 }
  0x2f   : > { %p6103_p12 = scmp.ne.s32.totalorder %s405_s24, %s6102_s18  ;;  %s6109_s27 = scalar_lea.vmem %s405_s24, 32 }
  0x30   : > { %p6110_p4 = scmp.lt.s32.totalorder %s405_s24, %s405_s24  ;;  %p6111_p3 = scmp.lt.s32.totalorder %s6109_s27, %s6102_s18 }
  0x31   : > { %p6105_p9 = pnand %p6103_p12, %p6502_p1 }
  0x32   : > { %p6112_p13 = por %p6111_p3, %p6110_p4 }
  0x33   : > { %p6106_p2 = pneg %p6105_p9 }
  0x34   : > { %5896 = dma.hbm_to_vmem [thread:$0]  (!%p6496_p0), %s8430_s3, 16, %s381_s25, [#allocation6]  }
  0x35   : > { %p6113_p6 = pnand %p6112_p13, %p6106_p2 }
  0x37   : > { %6116 = shalt.err (!%p6113_p6)
}
  0x38   : > { %5902 = dma.hbm_to_vmem [thread:$0]  (!%p6496_p0), %s8276_s5, 16, %s405_s24, [#allocation9]  }
  0x39   : > { %s6333_s25 = smov [#allocation2]   ;;  %s6334_s22 = smov [#allocation7]  }
  0x3a   : > { %s369_s19 = sshll.u32 %s6333_s25, 4  ;;  %s390_s3 = sshll.u32 %s6334_s22, 4  ;;  %s370_s19 = int_to_ptr.vmem [resolvable:$true] %s369_s19  ;;  %s391_s3 = int_to_ptr.vmem [resolvable:$true] %s390_s3 }
  0x3b   : > { %s6128_s15 = scalar_lea.vmem %s370_s19, 16  ;;  %s6135_s27 = scalar_lea.vmem %s370_s19, 32 }
  0x3c   : > { %p6129_p9 = scmp.ne.s32.totalorder %s370_s19, %s6128_s15  ;;  %p6136_p3 = scmp.lt.s32.totalorder %s370_s19, %s370_s19 }
  0x3d   : > { %p6137_p13 = scmp.lt.s32.totalorder %s6135_s27, %s6128_s15 }
  0x3e   : > { %p6131_p5 = pnand %p6129_p9, %p6502_p1 }
  0x3f   : > { %p6138_p8 = por %p6137_p13, %p6136_p3 }
  0x40   : > { %p6132_p7 = pneg %p6131_p5 }
  0x42   : > { %p6139_p11 = pnand %p6138_p8, %p6132_p7 }
  0x44   : > { %6142 = shalt.err (!%p6139_p11)
}
  0x45   : > { %s8431_s2 = sld [smem:[#allocation84_spill]]  ;;  %s6154_s14 = scalar_lea.vmem %s391_s3, 512 }
  0x46   : > { %p6155_p12 = scmp.ne.s32.totalorder %s391_s3, %s6154_s14  ;;  %p6162_p6 = scmp.lt.s32.totalorder %s391_s3, %s391_s3 }
  0x47   : > { %p6163_p9 = scmp.lt.s32.totalorder %s6154_s14, %s6154_s14 }
  0x48   : > { %p6157_p2 = pnand %p6155_p12, %p6502_p1 }
  0x49   : > { %p6164_p5 = por %p6163_p9, %p6162_p6 }
  0x4a   : > { %p6158_p4 = pneg %p6157_p2 }
  0x4b   : > { %5893 = dma.hbm_to_vmem [thread:$0]  (!%p6496_p0), %s8431_s2, 16, %s370_s19, [#allocation3]  }
  0x4c   : > { %p6165_p10 = pnand %p6164_p5, %p6158_p4 }
  0x4e   : > { %6168 = shalt.err (!%p6165_p10)
}
  0x4f   : > { %s6335_s15 = smov 64   ;;  %s6336_s20 = smov 4  }
  0x50   : > { %5899 = dma.hbm_to_vmem [thread:$0]  (!%p6496_p0), %s8275_s4, 512, %s391_s3, [#allocation6], %s6335_s15, %s6335_s15, %s6336_s20  }
  0x51   : > { %s6337_s19 = smov [#allocation10]   ;;  %s6338_s18 = smov [#allocation11]  }
  0x52   : > { %s415_s27 = sshll.u32 %s6337_s19, 4  ;;  %s434_s24 = sshll.u32 %s6338_s18, 4  ;;  %s416_s27 = int_to_ptr.vmem [resolvable:$true] %s415_s27  ;;  %s435_s24 = int_to_ptr.vmem [resolvable:$true] %s434_s24 }
  0x53   : > { %s6180_s2 = scalar_lea.vmem %s416_s27, 16  ;;  %s6187_s14 = scalar_lea.vmem %s416_s27, 32 }
  0x54   : > { %p6181_p7 = scmp.ne.s32.totalorder %s416_s27, %s6180_s2  ;;  %p6188_p10 = scmp.lt.s32.totalorder %s416_s27, %s416_s27 }
  0x55   : > { %p6189_p8 = scmp.lt.s32.totalorder %s6187_s14, %s6180_s2 }
  0x56   : > { %p6183_p3 = pnand %p6181_p7, %p6502_p1 }
  0x57   : > { %p6190_p11 = por %p6189_p8, %p6188_p10 }
  0x58   : > { %p6184_p13 = pneg %p6183_p3 }
  0x5a   : > { %p6191_p12 = pnand %p6190_p11, %p6184_p13 }
  0x5c   : > { %6194 = shalt.err (!%p6191_p12)
}
  0x5d   : > { %5905 = dma.hbm_to_vmem [thread:$0]  (!%p6496_p0), %s8277_s6, 16, %s416_s27, [#allocation9]  }
  0x5e   : > { %s6206_s15 = scalar_lea.vmem %s435_s24, 32768  ;;  %p6214_p9 = scmp.lt.s32.totalorder %s435_s24, %s435_s24 }
  0x5f   : > { %p6207_p2 = scmp.ne.s32.totalorder %s435_s24, %s6206_s15  ;;  %p6215_p5 = scmp.lt.s32.totalorder %s6206_s15, %s6206_s15 }
  0x61   : > { %p6209_p4 = pnand %p6207_p2, %p6502_p1  ;;  %p6216_p7 = por %p6215_p5, %p6214_p9 }
  0x63   : > { %p6210_p6 = pneg %p6209_p4 }
  0x65   : > { %p6217_p3 = pnand %p6216_p7, %p6210_p6 }
  0x67   : > { %6220 = shalt.err (!%p6217_p3)
}
  0x68   : > { %s6339_s2 = smov 512   ;;  %s6340_s20 = smov 32  }
  0x69   : > { %5908 = dma.hbm_to_vmem [thread:$0]  (!%p6496_p0), %s8281_s10, 32768, %s435_s24, [#allocation12], %s6339_s2, %s6339_s2, %s6340_s20  }
  0x6a   : > { %p8432_p13 = scmp.ne.s32.totalorder %s8425_s23, 0 }
  0x6c   : > { %469 = sbr.rel (%p8432_p13) target bundleno = 1301 (0x515), region = 72 }
  0x71   : > { %p8433_p10 = scmp.ne.s32.totalorder %s8426_s17, 0 }
  0x73   : > { %6280 = dma.done.wait (%p8433_p10), [#allocation3], 16  }
  0x74   : > { %6282 = vsyncadd (%p8433_p10), [#allocation3], 4294967280 }
  0x75   : > { %6284 = dma.done.wait (%p8433_p10), [#allocation6], 528  }
  0x76   : > { %6286 = vsyncadd (%p8433_p10), [#allocation6], 4294966768 }
  0x77   : > { %6288 = dma.done.wait (%p8433_p10), [#allocation9], 32  }
  0x78   : > { %6290 = vsyncadd (%p8433_p10), [#allocation9], 4294967264 }
  0x79   : > { %6292 = dma.done.wait (%p8433_p10), [#allocation12], 32768  }
  0x7a   : > { %6294 = vsyncadd (%p8433_p10), [#allocation12], 4294934528  ;;  %s534_s30 = sand.u32 1, %s6305_s26   ;;  %s5470_s23 = sshll.u32 %s6313_s28, 4 }
  0x7b   : > { %s5469_s16 = sshll.u32 %s534_s30, 3  ;;  %p538_p0 = scmp.lt.s32.totalorder %s6317_s29, 1 }
  0x7c   : > { %p540_p1 = scmp.lt.s32.totalorder %s5470_s23, 31  ;;  %s6575_s15 = scalar_lea.vmem [#allocation13], %s5469_s16 }
  0x7d   : > { %s539_s27 = scalar_select %p538_p0, %s6317_s29, 1 }
  0x7e   : > { %s8634_s23 = smov (!%p540_p1, %s5470_s23), 31  ;;  %p5473_p8 = scmp.ne.s32.totalorder %s6313_s28, 0 }
  0x7f   : > { %s5471_s18 = sshll.u32 %s539_s27, 5 }
  0x80   : > { %s543_s24 = sadd.s32 %s5471_s18, %s8634_s23  ;;  %551 = sbr.rel (%p5473_p8) target bundleno = 135 (0x87), region = 100 }
  0x81   : > { %s5472_s14 = sshll.u32 %s543_s24, 2 }
  0x82   : > { %s545_s17 = scalar_lea.vmem %s8271_s0, %s5472_s14 }
  0x85   : > { %v6341_v0 = vmov -inf  }
  0x86   : > { %552 = vst [vmem:[%s6575_s15] sm:$0xff] %v6341_v0 }
  0x87 PF: > { %v569_v1 = vld [vmem:[%s8272_s1] sm:$0xf]  ;;  %vm635_vm0 = vcmask 1043456   ;;  %vm610_vm1 = vcmask 64512   ;;  %v6004_v4 = vld [vmem:[%s545_s17 + $0x8] sm:$0xff]   ;;  %v6005_v5 = vld [vmem:[%s545_s17 + $0x10] sm:$0xff]  }
  0x88   : > { %v6003_v2 = vld [vmem:[%s545_s17] sm:$0xff]   ;;  %5863 = vmatprep.subr.msk.bf16.mxu0 %vm635_vm0, %v569_v1  ;;  %v637_v3 = vsel %vm635_vm0, %v569_v1, 0  ;;  %v6006_v6 = vld [vmem:[%s545_s17 + $0x18] sm:$0xff]   ;;  %v6008_v8 = vld [vmem:[%s545_s17 + $0x28] sm:$0xff]   ;;  %vm870_vm6 = vcmask 523264   ;;  %s5799_s18 = sshll.u32 %s6317_s29, 7 }
  0x89   : > { %5822 = vmatpush3.bf16.msra.mxu0 %v637_v3  ;;  %5823 = vmatprep.mubr.msk.bf16.mxu0 %vm610_vm1, %v6003_v2  ;;  %v6007_v7 = vld [vmem:[%s545_s17 + $0x20] sm:$0xff]   ;;  %v6009_v9 = vld [vmem:[%s545_s17 + $0x30] sm:$0xff]   ;;  %v6010_v10 = vld [vmem:[%s545_s17 + $0x38] sm:$0xff]   ;;  %s5316_s24 = sshll.u32 %s6575_s15, 4  ;;  %s5314_s3 = scalar_lea.hbm %s8284_s13, %s5799_s18  ;;  %s5317_s24 = int_to_ptr.vmem [resolvable:$true] %s5316_s24 }
  0x8a   : > { %v6011_v11 = vld [vmem:[#allocation7 + $0x18] sm:$0xff]   ;;  %v6012_v12 = vld [vmem:[#allocation7 + $0x10] sm:$0xff]   ;;  %v6013_v13 = vld [vmem:[#allocation7 + $0x8] sm:$0xff]   ;;  %s5302_s17 = scalar_lea.sflag [#allocation4], %s534_s30  ;;  %s6221_s2 = scalar_lea.vmem %s5317_s24, 128 }
  0x8b   : > { %5839 = vmatprep.subr.bf16.mxu1 %v6011_v11  ;;  %v6014_v14 = vld [vmem:[#allocation7] sm:$0xff]   ;;  %v6015_v15 = vld [vmem:[%s8278_s7 + $0xe0] ss:$16 sps:$4 sm:$0xff]   ;;  %v6020_v17 = vld [vmem:[%s8278_s7 + $0xec] ss:$16 sps:$4 sm:$0xff]   ;;  %p6222_p11 = scmp.ne.s32.totalorder %s5317_s24, %s6221_s2  ;;  %p8614_p12 = scmp.ne.s32.totalorder %s8421_s21, 0 }
  0x8c   : > { %5824 = vmatmul.mubr.msk.bf16.vlgmr.msra.gmra.mxu0 %vm610_vm1, %v6004_v4  ;;  %5840 = vmatpush3.bf16.msra.mxu1 %v6011_v11  ;;  %v6017_v16 = vld [vmem:[%s8278_s7 + $0xe4] ss:$16 sps:$4 sm:$0xff]   ;;  %v6021_v19 = vld [vmem:[%s8278_s7 + $0xc0] ss:$16 sps:$4 sm:$0xff]   ;;  %v6018_v59 = vld [vmem:[%s8278_s7 + $0xe8] ss:$16 sps:$4 sm:$0xff]  }
  0x8d   : > { %5827 = vmatprep.mubr.msk.bf16.mxu0 %vm610_vm1, %v6005_v5  ;;  %5841 = vmatprep.subr.bf16.mxu1 %v6012_v12  ;;  %v6023_v18 = vld [vmem:[%s8278_s7 + $0xc4] ss:$16 sps:$4 sm:$0xff]   ;;  %v6027_v21 = vld [vmem:[%s8278_s7 + $0xa0] ss:$16 sps:$4 sm:$0xff]   ;;  %v6026_v0 = vld [vmem:[%s8278_s7 + $0xcc] ss:$16 sps:$4 sm:$0xff]   ;;  %p6223_p2 = pnand %p6222_p11, %p8614_p12 }
  0x8e   : > { %1286 = vmatprep.subr.bf16.mxu0 %v6017_v16  ;;  %v6029_v20 = vld [vmem:[%s8278_s7 + $0xa4] ss:$16 sps:$4 sm:$0xff]   ;;  %v6033_v23 = vld [vmem:[%s8278_s7 + $0x80] ss:$16 sps:$4 sm:$0xff]   ;;  %v6032_v16 = vld [vmem:[%s8278_s7 + $0xac] ss:$16 sps:$4 sm:$0xff]  }
  0x8f   : > { %1287 = vmatpush1.bf16.msra.mxu0 %v6015_v15  ;;  %v6035_v22 = vld [vmem:[%s8278_s7 + $0x84] ss:$16 sps:$4 sm:$0xff]   ;;  %v6039_v25 = vld [vmem:[%s8278_s7 + $0x60] ss:$16 sps:$4 sm:$0xff]   ;;  %p6224_p4 = pneg %p6223_p2  ;;  %s6344_s20 = smov [#allocation13]  }
  0x90   : > { %5842 = vmatpush3.bf16.msra.mxu1 %v6012_v12  ;;  %1288 = vmatprep.subr.bf16.mxu0 %v6023_v18  ;;  %v6041_v24 = vld [vmem:[%s8278_s7 + $0x64] ss:$16 sps:$4 sm:$0xff]   ;;  %v6623_v26 = vld [vmem:[#allocation2] ss:$0 sm:$0xff]  ;;  %v6626_v30 = vld [vmem:[#allocation5] ss:$0 sm:$0xff] }
  0x91   : > { %5843 = vmatprep.subr.bf16.mxu1 %v6013_v13  ;;  %v6024_v12 = vld [vmem:[%s8278_s7 + $0xc8] ss:$16 sps:$4 sm:$0xff]   ;;  %s6225_s28 = sshll.u32 %s6344_s20, 4  ;;  %s6226_s28 = int_to_ptr.vmem [resolvable:$false] %s6225_s28 }
  0x92   : > { %s6227_s29 = scalar_lea.vmem %s6226_s28, 256  ;;  %p6228_p6 = scmp.lt.s32.totalorder %s5317_s24, %s6226_s28 }
  0x93   : > { %1289 = vmatpush1.bf16.msra.mxu0 %v6021_v19  ;;  %p6229_p9 = scmp.lt.s32.totalorder %s6227_s29, %s6221_s2 }
  0x94   : > { %5828 = vmatmul.mubr.msk.bf16.gmra.mxu0 %vm610_vm1, %v6006_v6  ;;  %5844 = vmatpush3.bf16.msra.mxu1 %v6013_v13 }
  0x95   : > { %5831 = vmatprep.mubr.msk.bf16.mxu0 %vm610_vm1, %v6007_v7  ;;  %5845 = vmatprep.subr.bf16.mxu1 %v6014_v14  ;;  %p6230_p5 = por %p6229_p9, %p6228_p6 }
  0x96   : > { %1290 = vmatprep.subr.bf16.mxu0 %v6029_v20 }
  0x97   : > { %1291 = vmatpush1.bf16.msra.mxu0 %v6027_v21  ;;  %p6231_p7 = pnand %p6230_p5, %p6224_p4 }
  0x98   : > { %5846 = vmatpush3.bf16.msra.mxu1 %v6014_v14  ;;  %1292 = vmatprep.subr.bf16.mxu0 %v6035_v22 }
  0x99   : > { %1399 = vmatprep.subr.bf16.mxu1 %v6020_v17 }
  0x9b   : > { %1293 = vmatpush1.bf16.msra.mxu0 %v6033_v23 }
  0x9c   : > { %5832 = vmatmul.mubr.msk.bf16.gmra.mxu0 %vm610_vm1, %v6008_v8  ;;  %1294 = vmatprep.subr.bf16.mxu0 %v6041_v24 }
  0x9d   : > { %5835 = vmatprep.mubr.msk.bf16.mxu0 %vm610_vm1, %v6009_v9 }
  0x9f   : > { %1295 = vmatpush1.bf16.msra.mxu0 %v6039_v25 }
  0xa4   : > { %5836 = vmatmul.mubr.msk.bf16.gmra.mxu0 %vm610_vm1, %v6010_v10 }
 0x14c   : > { %v5825_v27 = vpop.f32.mrf.mxu0 }
 0x14d   : > { %v745_v28 = vmul.f32 %v5825_v27, %v6623_v26  ;;  %v6030_v27 = vld [vmem:[%s8278_s7 + $0xa8] ss:$16 sps:$4 sm:$0xff]  }
 0x14e   : > { %v673_v29 = vpop.f32.mrf.mxu0 }
 0x14f   : > { %v743_v31 = vmul.f32 %v6623_v26, %v673_v29  ;;  %v768_v34 = vadd.f32 %v6626_v30, %v745_v28 }
 0x150   : > { %v5826_v32 = vpop.f32.mrf.mxu0 }
 0x151   : > { %v746_v33 = vmul.f32 %v5826_v32, %v6623_v26  ;;  %v766_v36 = vadd.f32 %v6626_v30, %v743_v31  ;;  %v800_v43 = vmul.f32 0.01, %v768_v34  ;;  %vm784_vm3 = vcmp.gt.f32.partialorder %v768_v34, 0.0  ;;  %v6038_v31 = vld [vmem:[%s8278_s7 + $0x8c] ss:$16 sps:$4 sm:$0xff]  }
 0x152   : > { %v676_v35 = vpop.f32.mrf.mxu0 }
 0x153   : > { %v769_v37 = vadd.f32 %v6626_v30, %v746_v33  ;;  %v744_v38 = vmul.f32 %v6623_v26, %v676_v35  ;;  %v798_v46 = vmul.f32 0.01, %v766_v36  ;;  %vm782_vm5 = vcmp.gt.f32.partialorder %v766_v36, 0.0 }
 0x154   : > { %v5829_v39 = vpop.f32.mrf.mxu0  ;;  %v816_v53 = vsel %vm784_vm3, %v768_v34, %v800_v43 }
 0x155   : > { %vm785_vm2 = vcmp.gt.f32.partialorder %v769_v37, 0.0  ;;  %v801_v40 = vmul.f32 0.01, %v769_v37  ;;  %v767_v41 = vadd.f32 %v6626_v30, %v744_v38  ;;  %v749_v42 = vmul.f32 %v5829_v39, %v6623_v26 }
 0x156   : > { %v689_v44 = vpop.f32.mrf.mxu0  ;;  %v814_v57 = vsel %vm782_vm5, %v766_v36, %v798_v46 }
 0x157   : > { %v747_v45 = vmul.f32 %v6623_v26, %v689_v44  ;;  %vm783_vm4 = vcmp.gt.f32.partialorder %v767_v41, 0.0  ;;  %v817_v47 = vsel %vm785_vm2, %v769_v37, %v801_v40  ;;  %v772_v48 = vadd.f32 %v6626_v30, %v749_v42  ;;  %v6044_v44 = vld [vmem:[%s8278_s7 + $0x6c] ss:$16 sps:$4 sm:$0xff]  }
 0x158   : > { %v5830_v49 = vpop.f32.mrf.mxu0  ;;  %v799_v50 = vmul.f32 0.01, %v767_v41  ;;  %v831_v58 = vpack.c.bf16 %v817_v47, %v816_v53  ;;  %v6042_v53 = vld [vmem:[%s8278_s7 + $0x68] ss:$16 sps:$4 sm:$0xff]  }
 0x159   : > { %v770_v51 = vadd.f32 %v6626_v30, %v747_v45  ;;  %v750_v52 = vmul.f32 %v5830_v49, %v6623_v26  ;;  %vm788_vm7 = vcmp.gt.f32.partialorder %v772_v48, 0.0  ;;  %v804_v60 = vmul.f32 0.01, %v772_v48 }
 0x15a   : > { %v692_v54 = vpop.f32.mrf.mxu0  ;;  %v815_v55 = vsel %vm783_vm4, %v767_v41, %v799_v50  ;;  %v6036_v41 = vld [vmem:[%s8278_s7 + $0x88] ss:$16 sps:$4 sm:$0xff]  }
 0x15b   : > { %v773_v56 = vadd.f32 %v6626_v30, %v750_v52  ;;  %v748_v61 = vmul.f32 %v6623_v26, %v692_v54  ;;  %v830_v63 = vpack.c.bf16 %v815_v55, %v814_v57  ;;  %v802_v1 = vmul.f32 0.01, %v770_v51 }
 0x15c   : > { %v5833_v62 = vpop.f32.mrf.mxu0  ;;  %vm786_vm9 = vcmp.gt.f32.partialorder %v770_v51, 0.0  ;;  %v820_v8 = vsel %vm788_vm7, %v772_v48, %v804_v60 }
 0x15d   : > { %vm789_vm8 = vcmp.gt.f32.partialorder %v773_v56, 0.0  ;;  %v805_v2 = vmul.f32 0.01, %v773_v56  ;;  %v753_v3 = vmul.f32 %v5833_v62, %v6623_v26  ;;  %v771_v4 = vadd.f32 %v6626_v30, %v748_v61  ;;  %5847 = vmatprep.mubr.msk.bf16.mxu1 %vm870_vm6, %v830_v63  ;;  %v6047_v62 = vld [vmem:[%s8278_s7 + $0x44] ss:$16 sps:$4 sm:$0xff]  }
 0x15e   : > { %v705_v5 = vpop.f32.mrf.mxu0  ;;  %5848 = vmatmul.mubr.msk.bf16.vlgmr.msra.gmra.mxu1 %vm870_vm6, %v831_v58  ;;  %v818_v13 = vsel %vm786_vm9, %v770_v51, %v802_v1  ;;  %v6045_v63 = vld [vmem:[%s8278_s7 + $0x40] ss:$16 sps:$4 sm:$0xff]   ;;  %1296 = vmatprep.subr.bf16.mxu0 %v6047_v62  ;;  %v6053_v1 = vld [vmem:[%s8278_s7 + $0x24] ss:$16 sps:$4 sm:$0xff]  }
 0x15f   : > { %v776_v6 = vadd.f32 %v6626_v30, %v753_v3  ;;  %v751_v7 = vmul.f32 %v6623_v26, %v705_v5  ;;  %v821_v9 = vsel %vm789_vm8, %v773_v56, %v805_v2  ;;  %vm787_vm10 = vcmp.gt.f32.partialorder %v771_v4, 0.0  ;;  %1400 = vmatpush1.bf16.msra.mxu1 %v6018_v59  ;;  %1297 = vmatpush1.bf16.msra.mxu0 %v6045_v63  ;;  %v6056_v2 = vld [vmem:[%s8278_s7 + $0x2c] ss:$16 sps:$4 sm:$0xff]   ;;  %v6051_v3 = vld [vmem:[%s8278_s7 + $0x20] ss:$16 sps:$4 sm:$0xff]  }
 0x160   : > { %v803_v10 = vmul.f32 0.01, %v771_v4  ;;  %v5834_v11 = vpop.f32.mrf.mxu0  ;;  %1401 = vmatprep.subr.bf16.mxu1 %v6026_v0  ;;  %v833_v21 = vpack.c.bf16 %v821_v9, %v820_v8  ;;  %v6048_v0 = vld [vmem:[%s8278_s7 + $0x48] ss:$16 sps:$4 sm:$0xff]   ;;  %1298 = vmatprep.subr.bf16.mxu0 %v6053_v1  ;;  %v6059_v5 = vld [vmem:[%s8278_s7 + $0x4] ss:$16 sps:$4 sm:$0xff]  }
 0x161   : > { %v774_v14 = vadd.f32 %v6626_v30, %v751_v7  ;;  %v754_v15 = vmul.f32 %v5834_v11, %v6623_v26  ;;  %v808_v19 = vmul.f32 0.01, %v776_v6  ;;  %vm792_vm11 = vcmp.gt.f32.partialorder %v776_v6, 0.0  ;;  %v6057_v7 = vld [vmem:[%s8278_s7] ss:$16 sps:$4 sm:$0xff]   ;;  %v1968_v11 = vld [vmem:[#allocation11 + $0x1e0] sm:$0xff] }
 0x162   : > { %v819_v17 = vsel %vm787_vm10, %v771_v4, %v803_v10  ;;  %v708_v18 = vpop.f32.mrf.mxu0  ;;  %v6054_v4 = vld [vmem:[%s8278_s7 + $0x28] ss:$16 sps:$4 sm:$0xff]   ;;  %v6342_v9 = vmov 0  }
 0x163   : > { %v777_v20 = vadd.f32 %v6626_v30, %v754_v15  ;;  %v806_v22 = vmul.f32 0.01, %v774_v14  ;;  %v752_v23 = vmul.f32 %v6623_v26, %v708_v18  ;;  %v832_v24 = vpack.c.bf16 %v819_v17, %v818_v13  ;;  %1402 = vmatpush1.bf16.msra.mxu1 %v6024_v12  ;;  %1299 = vmatpush1.bf16.msra.mxu0 %v6051_v3  ;;  %v6060_v8 = vld [vmem:[%s8278_s7 + $0x8] ss:$16 sps:$4 sm:$0xff]  }
 0x164   : > { %v5837_v25 = vpop.f32.mrf.mxu0  ;;  %vm790_vm12 = vcmp.gt.f32.partialorder %v774_v14, 0.0  ;;  %1403 = vmatprep.subr.bf16.mxu1 %v6032_v16  ;;  %v824_v34 = vsel %vm792_vm11, %v776_v6, %v808_v19  ;;  %v6062_v6 = vld [vmem:[%s8278_s7 + $0xc] ss:$16 sps:$4 sm:$0xff]   ;;  %1300 = vmatprep.subr.bf16.mxu0 %v6059_v5  ;;  %v6734_v19 = vld [vmem:[#allocation8] ss:$0 sm:$0xff] }
 0x165   : > { %vm793_vm13 = vcmp.gt.f32.partialorder %v777_v20, 0.0  ;;  %v809_v28 = vmul.f32 0.01, %v777_v20  ;;  %v757_v29 = vmul.f32 %v5837_v25, %v6623_v26  ;;  %v775_v32 = vadd.f32 %v6626_v30, %v752_v23  ;;  %5851 = vmatprep.mubr.msk.bf16.mxu1 %vm870_vm6, %v832_v24  ;;  %1318 = vmatprep.mubr.bf16.mxu0 %v6342_v9  ;;  %v1964_v10 = vld [vmem:[#allocation11 + $0x1c0] sm:$0xff] }
 0x166   : > { %v721_v33 = vpop.f32.mrf.mxu0  ;;  %5852 = vmatmul.mubr.msk.bf16.gmra.mxu1 %vm870_vm6, %v833_v21  ;;  %v822_v37 = vsel %vm790_vm12, %v774_v14, %v806_v22  ;;  %v2092_v12 = vld [vmem:[#allocation11 + $0x5c0] sm:$0xff]  ;;  %v5594_v13 = vcombine.low %v1964_v10, %v1968_v11  ;;  %v5595_v14 = vcombine.high %v1964_v10, %v1968_v11  ;;  %v6737_v22 = vld [vmem:[#allocation10] ss:$0 sm:$0xff] }
 0x167   : > { %v780_v35 = vadd.f32 %v6626_v30, %v757_v29  ;;  %v755_v36 = vmul.f32 %v6623_v26, %v721_v33  ;;  %v825_v38 = vsel %vm793_vm13, %v777_v20, %v809_v28  ;;  %vm791_vm14 = vcmp.gt.f32.partialorder %v775_v32, 0.0  ;;  %1404 = vmatpush1.bf16.msra.mxu1 %v6030_v27  ;;  %1301 = vmatpush1.bf16.msra.mxu0 %v6057_v7  ;;  %v2096_v15 = vld [vmem:[#allocation11 + $0x5e0] sm:$0xff] }
 0x168   : > { %v807_v39 = vmul.f32 0.01, %v775_v32  ;;  %v5838_v40 = vpop.f32.mrf.mxu0  ;;  %1405 = vmatprep.subr.bf16.mxu1 %v6038_v31  ;;  %v835_v49 = vpack.c.bf16 %v825_v38, %v824_v34  ;;  %v5722_v16 = vcombine.low %v2092_v12, %v2096_v15  ;;  %v5723_v17 = vcombine.high %v2092_v12, %v2096_v15  ;;  %3444 = vmatprep.subr.bf16.mxu0 %v5595_v14  ;;  %v2068_v1 = vld [vmem:[#allocation11 + $0x500] sm:$0xff] }
 0x169   : > { %v778_v42 = vadd.f32 %v6626_v30, %v755_v36  ;;  %v758_v43 = vmul.f32 %v5838_v40, %v6623_v26  ;;  %v812_v47 = vmul.f32 0.01, %v780_v35  ;;  %vm796_vm15 = vcmp.gt.f32.partialorder %v780_v35, 0.0  ;;  %v2084_v40 = vld [vmem:[#allocation11 + $0x580] sm:$0xff] }
 0x16a   : > { %v823_v45 = vsel %vm791_vm14, %v775_v32, %v807_v39  ;;  %v724_v46 = vpop.f32.mrf.mxu0  ;;  %v1960_v39 = vld [vmem:[#allocation11 + $0x1a0] sm:$0xff] }
 0x16b   : > { %v834_v48 = vpack.c.bf16 %v823_v45, %v822_v37  ;;  %v810_v50 = vmul.f32 0.01, %v778_v42  ;;  %v781_v51 = vadd.f32 %v6626_v30, %v758_v43  ;;  %v756_v52 = vmul.f32 %v6623_v26, %v724_v46  ;;  %1406 = vmatpush1.bf16.msra.mxu1 %v6036_v41  ;;  %v1956_v37 = vld [vmem:[#allocation11 + $0x180] sm:$0xff] }
 0x16c   : > { %vm794_vm0 = vcmp.gt.f32.partialorder %v778_v42, 0.0  ;;  %1407 = vmatprep.subr.bf16.mxu1 %v6044_v44  ;;  %v828_v56 = vsel %vm796_vm15, %v780_v35, %v812_v47  ;;  %v2088_v41 = vld [vmem:[#allocation11 + $0x5a0] sm:$0xff] }
 0x16d   : > { %5855 = vmatprep.mubr.msk.bf16.mxu1 %vm870_vm6, %v834_v48  ;;  %vm797_vm1 = vcmp.gt.f32.partialorder %v781_v51, 0.0  ;;  %v813_v54 = vmul.f32 0.01, %v781_v51  ;;  %v779_v55 = vadd.f32 %v6626_v30, %v756_v52  ;;  %v826_v57 = vsel %vm794_vm0, %v778_v42, %v810_v50  ;;  %v6050_v30 = vld [vmem:[%s8278_s7 + $0x4c] ss:$16 sps:$4 sm:$0xff]  }
 0x16e   : > { %5856 = vmatmul.mubr.msk.bf16.gmra.mxu1 %vm870_vm6, %v835_v49  ;;  %v5587_v49 = vcombine.high %v1956_v37, %v1960_v39  ;;  %v5715_v50 = vcombine.high %v2084_v40, %v2088_v41  ;;  %v1952_v52 = vld [vmem:[#allocation11 + $0x160] sm:$0xff] }
 0x16f   : > { %v829_v58 = vsel %vm797_vm1, %v781_v51, %v813_v54  ;;  %vm795_vm2 = vcmp.gt.f32.partialorder %v779_v55, 0.0  ;;  %v811_v26 = vmul.f32 0.01, %v779_v55  ;;  %1408 = vmatpush1.bf16.msra.mxu1 %v6042_v53  ;;  %v1948_v51 = vld [vmem:[#allocation11 + $0x140] sm:$0xff] }
 0x170   : > { %v837_v61 = vpack.c.bf16 %v829_v58, %v828_v56  ;;  %1409 = vmatprep.subr.bf16.mxu1 %v6050_v30  ;;  %v2076_v54 = vld [vmem:[#allocation11 + $0x540] sm:$0xff]  ;;  %v5586_v58 = vcombine.low %v1956_v37, %v1960_v39 }
 0x171   : > { %v827_v59 = vsel %vm795_vm2, %v779_v55, %v811_v26  ;;  %v2080_v55 = vld [vmem:[#allocation11 + $0x560] sm:$0xff]  ;;  %v5714_v26 = vcombine.low %v2084_v40, %v2088_v41 }
 0x172   : > { %v836_v60 = vpack.c.bf16 %v827_v59, %v826_v57  ;;  %v5579_v59 = vcombine.high %v1948_v51, %v1952_v52  ;;  %v5707_v62 = vcombine.high %v2076_v54, %v2080_v55  ;;  %v1940_v30 = vld [vmem:[#allocation11 + $0x100] sm:$0xff]  ;;  %v5706_v7 = vcombine.low %v2076_v54, %v2080_v55 }
 0x173   : > { %1410 = vmatpush1.bf16.msra.mxu1 %v6048_v0  ;;  %v1944_v0 = vld [vmem:[#allocation11 + $0x120] sm:$0xff] }
 0x174   : > { %5859 = vmatprep.mubr.msk.bf16.mxu1 %vm870_vm6, %v836_v60  ;;  %1411 = vmatprep.subr.bf16.mxu1 %v6056_v2  ;;  %v2072_v2 = vld [vmem:[#allocation11 + $0x520] sm:$0xff]  ;;  %v5571_v11 = vcombine.high %v1940_v30, %v1944_v0 }
 0x175   : > { %v5699_v12 = vcombine.high %v2068_v1, %v2072_v2  ;;  %v1936_v14 = vld [vmem:[#allocation11 + $0xe0] sm:$0xff] }
 0x176   : > { %5860 = vmatmul.mubr.msk.bf16.gmra.mxu1 %vm870_vm6, %v837_v61  ;;  %v1916_v41 = vld [vmem:[#allocation11 + $0x40] sm:$0xff] }
 0x177   : > { %1412 = vmatpush1.bf16.msra.mxu1 %v6054_v4  ;;  %1431 = vmatprep.mubr.bf16.mxu1 %v6342_v9 }
 0x178   : > { %1413 = vmatprep.subr.bf16.mxu1 %v6062_v6  ;;  %v5578_v6 = vcombine.low %v1948_v51, %v1952_v52 }
 0x17b   : > { %1414 = vmatpush1.bf16.msra.mxu1 %v6060_v8 }
 0x17c   : > { %3557 = vmatprep.subr.bf16.mxu1 %v5723_v17  ;;  %v2064_v17 = vld [vmem:[#allocation11 + $0x4e0] sm:$0xff] }
 0x21e   : > { %v5849_v18 = vpop.f32.mrf.mxu1 }
 0x21f   : > { %v1001_v31 = vmul.f32 %v5849_v18, %v6734_v19 }
 0x220   : > { %v929_v20 = vpop.f32.mrf.mxu1 }
 0x221   : > { %v999_v21 = vmul.f32 %v6734_v19, %v929_v20  ;;  %v1024_v42 = vadd.f32 %v6737_v22, %v1001_v31  ;;  %v1924_v31 = vld [vmem:[#allocation11 + $0x80] sm:$0xff] }
 0x222   : > { %v5850_v23 = vpop.f32.mrf.mxu1 }
 0x223   : > { %v1022_v24 = vadd.f32 %v6737_v22, %v999_v21  ;;  %v1002_v27 = vmul.f32 %v5850_v23, %v6734_v19  ;;  %v1056_v56 = vmul.f32 0.01, %v1024_v42  ;;  %vm1040_vm6 = vcmp.gt.f32.partialorder %v1024_v42, 0.0 }
 0x224   : > { %v932_v25 = vpop.f32.mrf.mxu1  ;;  %v5570_v21 = vcombine.low %v1940_v30, %v1944_v0  ;;  %v5698_v23 = vcombine.low %v2068_v1, %v2072_v2 }
 0x225   : > { %v1000_v28 = vmul.f32 %v6734_v19, %v932_v25  ;;  %v1054_v32 = vmul.f32 0.01, %v1022_v24  ;;  %vm1038_vm3 = vcmp.gt.f32.partialorder %v1022_v24, 0.0  ;;  %v1025_v35 = vadd.f32 %v6737_v22, %v1002_v27 }
 0x226   : > { %v6742_v29 = vpop.f32.mrf.mxu1  ;;  %v1072_v4 = vsel %vm1040_vm6, %v1024_v42, %v1056_v56 }
 0x227   : > { %v1023_v33 = vadd.f32 %v6737_v22, %v1000_v28  ;;  %v1070_v43 = vsel %vm1038_vm3, %v1022_v24, %v1054_v32  ;;  %v1057_v47 = vmul.f32 0.01, %v1025_v35  ;;  %vm1041_vm5 = vcmp.gt.f32.partialorder %v1025_v35, 0.0  ;;  %v1928_v32 = vld [vmem:[#allocation11 + $0xa0] sm:$0xff] }
 0x228   : > { %v945_v34 = vpop.f32.mrf.mxu1  ;;  %v1005_v18 = vmul.f32 %v6742_v29, %v6734_v19  ;;  %v5555_v40 = vcombine.high %v1924_v31, %v1928_v32  ;;  %v5554_v51 = vcombine.low %v1924_v31, %v1928_v32 }
 0x229   : > { %vm1039_vm4 = vcmp.gt.f32.partialorder %v1023_v33, 0.0  ;;  %v1055_v36 = vmul.f32 0.01, %v1023_v33  ;;  %v1003_v57 = vmul.f32 %v6734_v19, %v945_v34  ;;  %v1073_v61 = vsel %vm1041_vm5, %v1025_v35, %v1057_v47  ;;  %v2056_v34 = vld [vmem:[#allocation11 + $0x4a0] sm:$0xff] }
 0x22a   : > { %v5854_v38 = vpop.f32.mrf.mxu1  ;;  %v1087_v5 = vpack.c.bf16 %v1073_v61, %v1072_v4  ;;  %v1028_v35 = vadd.f32 %v6737_v22, %v1005_v18  ;;  %v2044_v47 = vld [vmem:[#allocation11 + $0x440] sm:$0xff] }
 0x22b   : > { %v1071_v44 = vsel %vm1039_vm4, %v1023_v33, %v1055_v36  ;;  %v1026_v3 = vadd.f32 %v6737_v22, %v1003_v57  ;;  %v1006_v8 = vmul.f32 %v5854_v38, %v6734_v19  ;;  %v2052_v33 = vld [vmem:[#allocation11 + $0x480] sm:$0xff] }
 0x22c   : > { %v1086_v45 = vpack.c.bf16 %v1071_v44, %v1070_v43  ;;  %v948_v46 = vpop.f32.mrf.mxu1  ;;  %vm1044_vm10 = vcmp.gt.f32.partialorder %v1028_v35, 0.0  ;;  %v5682_v52 = vcombine.low %v2052_v33, %v2056_v34  ;;  %v2036_v61 = vld [vmem:[#allocation11 + $0x400] sm:$0xff] }
 0x22d   : > { %v1004_v48 = vmul.f32 %v6734_v19, %v948_v46  ;;  %v1058_v20 = vmul.f32 0.01, %v1026_v3  ;;  %vm1042_vm8 = vcmp.gt.f32.partialorder %v1026_v3, 0.0  ;;  %v1029_v25 = vadd.f32 %v6737_v22, %v1006_v8  ;;  %v1920_v46 = vld [vmem:[#allocation11 + $0x60] sm:$0xff] }
 0x22e   : > { %v6749_v53 = vpop.f32.mrf.mxu1  ;;  %1319 = vmatmul.mubr.bf16.vlgmr.msra.gmra.mxu0 %v1086_v45  ;;  %1432 = vmatmul.mubr.bf16.vlgmr.msra.gmra.mxu1 %v1086_v45  ;;  %v5683_v45 = vcombine.high %v2052_v33, %v2056_v34  ;;  %v5547_v54 = vcombine.high %v1916_v41, %v1920_v46  ;;  %v2028_v4 = vld [vmem:[#allocation11 + $0x3c0] sm:$0xff] }
 0x22f   : > { %1328 = vmatprep.mubr.bf16.mxu0 %v6342_v9  ;;  %1441 = vmatprep.mubr.bf16.mxu1 %v6342_v9  ;;  %v1027_v60 = vadd.f32 %v6737_v22, %v1004_v48  ;;  %v1074_v36 = vsel %vm1042_vm8, %v1026_v3, %v1058_v20  ;;  %v1061_v42 = vmul.f32 0.01, %v1029_v25  ;;  %v2048_v48 = vld [vmem:[#allocation11 + $0x460] sm:$0xff]  ;;  %vm1045_vm9 = vcmp.gt.f32.partialorder %v1029_v25, 0.0 }
 0x230   : > { %3445 = vmatpush1.bf16.msra.mxu0 %v5594_v13  ;;  %3558 = vmatpush1.bf16.msra.mxu1 %v5722_v16  ;;  %v961_v63 = vpop.f32.mrf.mxu1  ;;  %v1932_v13 = vld [vmem:[#allocation11 + $0xc0] sm:$0xff]  ;;  %v5675_v55 = vcombine.high %v2044_v47, %v2048_v48  ;;  %v5674_v0 = vcombine.low %v2044_v47, %v2048_v48  ;;  %v1009_v1 = vmul.f32 %v6749_v53, %v6734_v19 }
 0x231   : > { %3446 = vmatprep.subr.bf16.mxu0 %v5587_v49  ;;  %3559 = vmatprep.subr.bf16.mxu1 %v5715_v50  ;;  %v1059_v10 = vmul.f32 0.01, %v1027_v60  ;;  %vm1043_vm7 = vcmp.gt.f32.partialorder %v1027_v60, 0.0  ;;  %v2060_v16 = vld [vmem:[#allocation11 + $0x4c0] sm:$0xff]  ;;  %v5563_v24 = vcombine.high %v1932_v13, %v1936_v14  ;;  %v5562_v37 = vcombine.low %v1932_v13, %v1936_v14 }
 0x232   : > { %v6759_v15 = vpop.f32.mrf.mxu1  ;;  %v5691_v28 = vcombine.high %v2060_v16, %v2064_v17  ;;  %v5690_v39 = vcombine.low %v2060_v16, %v2064_v17  ;;  %v1007_v43 = vmul.f32 %v6734_v19, %v961_v63  ;;  %v1060_v50 = vmul.f32 0.01, %v1028_v35  ;;  %v2020_v18 = vld [vmem:[#allocation11 + $0x380] sm:$0xff] }
 0x233   : > { %v1075_v27 = vsel %vm1043_vm7, %v1027_v60, %v1059_v10  ;;  %v5546_v63 = vcombine.low %v1916_v41, %v1920_v46  ;;  %v2140_v41 = vld [vmem:[#allocation11 + $0x740] sm:$0xff] }
 0x234   : > { %3447 = vmatpush1.bf16.msra.mxu0 %v5586_v58  ;;  %3560 = vmatpush1.bf16.msra.mxu1 %v5714_v26  ;;  %v964_v29 = vpop.f32.mrf.mxu1  ;;  %v1088_v38 = vpack.c.bf16 %v1075_v27, %v1074_v36  ;;  %v1030_v56 = vadd.f32 %v6737_v22, %v1007_v43  ;;  %v1077_v58 = vsel %vm1045_vm9, %v1029_v25, %v1061_v42  ;;  %v1908_v26 = vld [vmem:[#allocation11] sm:$0xff] }
 0x235   : > { %3448 = vmatprep.subr.bf16.mxu0 %v5579_v59  ;;  %3561 = vmatprep.subr.bf16.mxu1 %v5707_v62  ;;  %v1008_v44 = vmul.f32 %v6734_v19, %v964_v29  ;;  %v1912_v59 = vld [vmem:[#allocation11 + $0x20] sm:$0xff]  ;;  %v1076_v30 = vsel %vm1044_vm10, %v1028_v35, %v1060_v50 }
 0x236   : > { %1329 = vmatmul.mubr.bf16.gmra.mxu0 %v1087_v5  ;;  %1442 = vmatmul.mubr.bf16.gmra.mxu1 %v1087_v5  ;;  %v6770_v49 = vpop.f32.mrf.mxu1  ;;  %v2040_v62 = vld [vmem:[#allocation11 + $0x420] sm:$0xff]  ;;  %v1089_v2 = vpack.c.bf16 %v1077_v58, %v1076_v30  ;;  %v5539_v3 = vcombine.high %v1908_v26, %v1912_v59  ;;  %vm1046_vm11 = vcmp.gt.f32.partialorder %v1030_v56, 0.0  ;;  %v5538_v53 = vcombine.low %v1908_v26, %v1912_v59 }
 0x237   : > { %1338 = vmatprep.mubr.bf16.mxu0 %v6342_v9  ;;  %1451 = vmatprep.mubr.bf16.mxu1 %v6342_v9  ;;  %v1031_v57 = vadd.f32 %v6737_v22, %v1008_v44  ;;  %v2032_v5 = vld [vmem:[#allocation11 + $0x3e0] sm:$0xff]  ;;  %v5667_v10 = vcombine.high %v2036_v61, %v2040_v62  ;;  %v5666_v14 = vcombine.low %v2036_v61, %v2040_v62 }
 0x238   : > { %3449 = vmatpush1.bf16.msra.mxu0 %v5578_v6  ;;  %3562 = vmatpush1.bf16.msra.mxu1 %v5706_v7  ;;  %v977_v60 = vpop.f32.mrf.mxu1  ;;  %v1062_v6 = vmul.f32 0.01, %v1030_v56  ;;  %v1010_v7 = vmul.f32 %v6759_v15, %v6734_v19  ;;  %v1032_v15 = vadd.f32 %v6737_v22, %v1009_v1  ;;  %v5659_v16 = vcombine.high %v2028_v4, %v2032_v5  ;;  %v2148_v25 = vld [vmem:[#allocation11 + $0x780] sm:$0xff] }
 0x239   : > { %3450 = vmatprep.subr.bf16.mxu0 %v5571_v11  ;;  %3563 = vmatprep.subr.bf16.mxu1 %v5699_v12  ;;  %v1063_v8 = vmul.f32 0.01, %v1031_v57  ;;  %v2156_v11 = vld [vmem:[#allocation11 + $0x7c0] sm:$0xff]  ;;  %vm1047_vm12 = vcmp.gt.f32.partialorder %v1031_v57, 0.0  ;;  %v5658_v31 = vcombine.low %v2028_v4, %v2032_v5  ;;  %v1013_v26 = vmul.f32 %v6770_v49, %v6734_v19 }
 0x23a   : > { %v2160_v12 = vld [vmem:[#allocation11 + $0x7e0] sm:$0xff]  ;;  %v6782_v13 = vpop.f32.mrf.mxu1  ;;  %v1033_v20 = vadd.f32 %v6737_v22, %v1010_v7  ;;  %v1064_v29 = vmul.f32 0.01, %v1032_v15  ;;  %vm1048_vm13 = vcmp.gt.f32.partialorder %v1032_v15, 0.0 }
 0x23b   : > { %v5787_v17 = vcombine.high %v2156_v11, %v2160_v12  ;;  %v2152_v27 = vld [vmem:[#allocation11 + $0x7a0] sm:$0xff]  ;;  %v5786_v32 = vcombine.low %v2156_v11, %v2160_v12  ;;  %v1014_v62 = vmul.f32 %v6782_v13, %v6734_v19  ;;  %v1036_v49 = vadd.f32 %v6737_v22, %v1013_v26 }
 0x23c   : > { %3451 = vmatpush1.bf16.msra.mxu0 %v5570_v21  ;;  %3564 = vmatpush1.bf16.msra.mxu1 %v5698_v23  ;;  %v1078_v21 = vsel %vm1046_vm11, %v1030_v56, %v1062_v6  ;;  %v1079_v23 = vsel %vm1047_vm12, %v1031_v57, %v1063_v8  ;;  %v5779_v35 = vcombine.high %v2148_v25, %v2152_v27  ;;  %v2012_v36 = vld [vmem:[#allocation11 + $0x340] sm:$0xff]  ;;  %vm1049_vm14 = vcmp.gt.f32.partialorder %v1033_v20, 0.0 }
 0x23d   : > { %3452 = vmatprep.subr.bf16.mxu0 %v5563_v24  ;;  %3565 = vmatprep.subr.bf16.mxu1 %v5691_v28  ;;  %v2024_v24 = vld [vmem:[#allocation11 + $0x3a0] sm:$0xff]  ;;  %v980_v28 = vpop.f32.mrf.mxu1  ;;  %v1090_v33 = vpack.c.bf16 %v1079_v23, %v1078_v21  ;;  %v5778_v44 = vcombine.low %v2148_v25, %v2152_v27  ;;  %v1068_v5 = vmul.f32 0.01, %v1036_v49  ;;  %vm1052_vm1 = vcmp.gt.f32.partialorder %v1036_v49, 0.0 }
 0x23e   : > { %1339 = vmatmul.mubr.bf16.gmra.mxu0 %v1088_v38  ;;  %1452 = vmatmul.mubr.bf16.gmra.mxu1 %v1088_v38  ;;  %v5651_v34 = vcombine.high %v2020_v18, %v2024_v24  ;;  %v1011_v38 = vmul.f32 %v6734_v19, %v977_v60  ;;  %v2144_v42 = vld [vmem:[#allocation11 + $0x760] sm:$0xff]  ;;  %v5650_v43 = vcombine.low %v2020_v18, %v2024_v24 }
 0x23f   : > { %1348 = vmatprep.mubr.bf16.mxu0 %v6342_v9  ;;  %1461 = vmatprep.mubr.bf16.mxu1 %v6342_v9  ;;  %v5771_v47 = vcombine.high %v2140_v41, %v2144_v42  ;;  %v2136_v56 = vld [vmem:[#allocation11 + $0x720] sm:$0xff]  ;;  %v5770_v58 = vcombine.low %v2140_v41, %v2144_v42  ;;  %v1084_v7 = vsel %vm1052_vm1, %v1036_v49, %v1068_v5  ;;  %v6850_v49 = vld [vmem:[#allocation11 + $0x148] sm:$0xff] }
 0x240   : > { %3453 = vmatpush1.bf16.msra.mxu0 %v5562_v37  ;;  %3566 = vmatpush1.bf16.msra.mxu1 %v5690_v39  ;;  %v1065_v37 = vmul.f32 0.01, %v1033_v20  ;;  %v1012_v39 = vmul.f32 %v6734_v19, %v980_v28  ;;  %v1034_v48 = vadd.f32 %v6737_v22, %v1011_v38  ;;  %v1037_v19 = vadd.f32 %v6737_v22, %v1014_v62  ;;  %v2000_v11 = vld [vmem:[#allocation11 + $0x2e0] sm:$0xff]  ;;  %v6865_v5 = vld [vmem:[#allocation11 + $0x508] sm:$0xff] }
 0x241   : > { %3454 = vmatprep.subr.bf16.mxu0 %v5555_v40  ;;  %3567 = vmatprep.subr.bf16.mxu1 %v5683_v45  ;;  %v2016_v40 = vld [vmem:[#allocation11 + $0x360] sm:$0xff]  ;;  %v1080_v45 = vsel %vm1048_vm13, %v1032_v15, %v1064_v29 }
 0x242   : > { %v5643_v46 = vcombine.high %v2012_v36, %v2016_v40  ;;  %v1035_v50 = vadd.f32 %v6737_v22, %v1012_v39  ;;  %v5642_v57 = vcombine.low %v2012_v36, %v2016_v40  ;;  %v1066_v61 = vmul.f32 0.01, %v1034_v48  ;;  %v2124_v13 = vld [vmem:[#allocation11 + $0x6c0] sm:$0xff] }
 0x243   : > { %vm1050_vm15 = vcmp.gt.f32.partialorder %v1034_v48, 0.0  ;;  %v1069_v6 = vmul.f32 0.01, %v1037_v19  ;;  %vm1053_vm2 = vcmp.gt.f32.partialorder %v1037_v19, 0.0  ;;  %v1992_v18 = vld [vmem:[#allocation11 + $0x2a0] sm:$0xff] }
 0x244   : > { %3455 = vmatpush1.bf16.msra.mxu0 %v5554_v51  ;;  %3568 = vmatpush1.bf16.msra.mxu1 %v5682_v52  ;;  %v1081_v51 = vsel %vm1049_vm14, %v1033_v20, %v1065_v37  ;;  %v2004_v52 = vld [vmem:[#allocation11 + $0x300] sm:$0xff]  ;;  %v1067_v30 = vmul.f32 0.01, %v1035_v50  ;;  %vm1051_vm0 = vcmp.gt.f32.partialorder %v1035_v50, 0.0 }
 0x245   : > { %3456 = vmatprep.subr.bf16.mxu0 %v5547_v54  ;;  %3569 = vmatprep.subr.bf16.mxu1 %v5675_v55  ;;  %v2008_v54 = vld [vmem:[#allocation11 + $0x320] sm:$0xff]  ;;  %v1091_v59 = vpack.c.bf16 %v1081_v51, %v1080_v45  ;;  %v1085_v8 = vsel %vm1053_vm2, %v1037_v19, %v1069_v6  ;;  %v6808_v45 = vld [vmem:[#allocation11 + $0x1e8] sm:$0xff] }
 0x246   : > { %1349 = vmatmul.mubr.bf16.gmra.mxu0 %v1089_v2  ;;  %1462 = vmatmul.mubr.bf16.gmra.mxu1 %v1089_v2  ;;  %v2132_v55 = vld [vmem:[#allocation11 + $0x700] sm:$0xff]  ;;  %v5635_v60 = vcombine.high %v2004_v52, %v2008_v54  ;;  %v1082_v2 = vsel %vm1050_vm15, %v1034_v48, %v1066_v61  ;;  %v1093_v22 = vpack.c.bf16 %v1085_v8, %v1084_v7  ;;  %v6814_v48 = vld [vmem:[#allocation11 + $0x5e8] sm:$0xff] }
 0x247   : > { %1358 = vmatprep.mubr.bf16.mxu0 %v6342_v9  ;;  %1471 = vmatprep.mubr.bf16.mxu1 %v6342_v9  ;;  %v5762_v1 = vcombine.low %v2132_v55, %v2136_v56  ;;  %v2116_v20 = vld [vmem:[#allocation11 + $0x680] sm:$0xff]  ;;  %v6841_v61 = vld [vmem:[#allocation11 + $0x1a8] sm:$0xff] }
 0x248   : > { %3457 = vmatpush1.bf16.msra.mxu0 %v5546_v63  ;;  %3570 = vmatpush1.bf16.msra.mxu1 %v5674_v0  ;;  %v5763_v63 = vcombine.high %v2132_v55, %v2136_v56  ;;  %v5634_v0 = vcombine.low %v2004_v52, %v2008_v54  ;;  %v2120_v21 = vld [vmem:[#allocation11 + $0x6a0] sm:$0xff]  ;;  %v1514_v54 = vlaneseq  ;;  %v1512_v56 = vld [vmem:[%s8279_s8] sm:$0xf]  ;;  %v6856_v19 = vld [vmem:[#allocation11 + $0x568] sm:$0xff] }
 0x249   : > { %3458 = vmatprep.subr.bf16.mxu0 %v5539_v3  ;;  %3571 = vmatprep.subr.bf16.mxu1 %v5667_v10  ;;  %v1083_v3 = vsel %vm1051_vm0, %v1035_v50, %v1067_v30  ;;  %v1996_v10 = vld [vmem:[#allocation11 + $0x2c0] sm:$0xff]  ;;  %v5746_v24 = vcombine.low %v2116_v20, %v2120_v21  ;;  %v5747_v25 = vcombine.high %v2116_v20, %v2120_v21  ;;  %v6846_v30 = vld [vmem:[#allocation11 + $0x588] sm:$0xff] }
 0x24a   : > { %v1092_v4 = vpack.c.bf16 %v1083_v3, %v1082_v2  ;;  %v5627_v12 = vcombine.high %v1996_v10, %v2000_v11  ;;  %v1980_v27 = vld [vmem:[#allocation11 + $0x240] sm:$0xff]  ;;  %v6822_v55 = vshrl.u32 %v1514_v54, 7  ;;  %v6858_v2 = vld [vmem:[#allocation11 + $0x108] sm:$0xff] }
 0x24b   : > { %v1984_v28 = vld [vmem:[#allocation11 + $0x260] sm:$0xff]  ;;  %v6860_v3 = vld [vmem:[#allocation11 + $0x128] sm:$0xff] }
 0x24c   : > { %3459 = vmatpush1.bf16.msra.mxu0 %v5538_v53  ;;  %3572 = vmatpush1.bf16.msra.mxu1 %v5666_v14  ;;  %v2128_v53 = vld [vmem:[#allocation11 + $0x6e0] sm:$0xff]  ;;  %v5626_v14 = vcombine.low %v1996_v10, %v2000_v11  ;;  %8434 = vst [vmem:[#allocation28_spill] sm:$0xff] %v6822_v55  ;;  %v6834_v26 = vsub.s32 2, %v6822_v55  ;;  %v6844_v62 = vsub.s32 3, %v6822_v55  ;;  %v6867_v6 = vld [vmem:[#allocation11 + $0x528] sm:$0xff] }
 0x24d   : > { %3460 = vmatprep.subr.bf16.mxu0 %v5659_v16  ;;  %3573 = vmatprep.subr.bf16.mxu1 %v5787_v17  ;;  %v5754_v15 = vcombine.low %v2124_v13, %v2128_v53  ;;  %v5755_v16 = vcombine.high %v2124_v13, %v2128_v53  ;;  %v1988_v17 = vld [vmem:[#allocation11 + $0x280] sm:$0xff]  ;;  %v6869_v7 = vld [vmem:[#allocation11 + $0xc8] sm:$0xff] }
 0x24e   : > { %1359 = vmatmul.mubr.bf16.gmra.mxu0 %v1090_v33  ;;  %1472 = vmatmul.mubr.bf16.gmra.mxu1 %v1090_v33  ;;  %v5618_v23 = vcombine.low %v1988_v17, %v1992_v18  ;;  %v2112_v29 = vld [vmem:[#allocation11 + $0x660] sm:$0xff]  ;;  %v5610_v33 = vcombine.low %v1980_v27, %v1984_v28  ;;  %8436 = vst [vmem:[#allocation30_spill] sm:$0xff] %v6834_v26  ;;  %8438 = vst [vmem:[#allocation32_spill] sm:$0xff] %v6844_v62  ;;  %v6871_v8 = vld [vmem:[#allocation11 + $0xe8] sm:$0xff] }
 0x24f   : > { %1368 = vmatprep.mubr.bf16.mxu0 %v6342_v9  ;;  %1481 = vmatprep.mubr.bf16.mxu1 %v6342_v9  ;;  %v1972_v36 = vld [vmem:[#allocation11 + $0x200] sm:$0xff]  ;;  %v6877_v10 = vrot.slane %v1512_v56, %v6834_v26  ;;  %v6885_v13 = vld [vmem:[#allocation11 + $0x4c8] sm:$0xff] }
 0x250   : > { %3461 = vmatpush2.bf16.msra.mxu0 %v5658_v31  ;;  %3574 = vmatpush2.bf16.msra.mxu1 %v5786_v32  ;;  %v2108_v31 = vld [vmem:[#allocation11 + $0x640] sm:$0xff]  ;;  %v5611_v32 = vcombine.high %v1980_v27, %v1984_v28  ;;  %v6887_v53 = vld [vmem:[#allocation11 + $0x4e8] sm:$0xff] }
 0x251   : > { %3462 = vmatprep.subr.bf16.mxu0 %v5651_v34  ;;  %3575 = vmatprep.subr.bf16.mxu1 %v5779_v35  ;;  %v5738_v34 = vcombine.low %v2108_v31, %v2112_v29  ;;  %v5739_v35 = vcombine.high %v2108_v31, %v2112_v29  ;;  %v1976_v37 = vld [vmem:[#allocation11 + $0x220] sm:$0xff]  ;;  %8439 = vst [vmem:[#allocation33_spill] sm:$0xff] %v6887_v53  ;;  %v6902_v20 = vld [vmem:[#allocation11 + $0xa8] sm:$0xff] }
 0x252   : > { %v2100_v38 = vld [vmem:[#allocation11 + $0x600] sm:$0xff]  ;;  %v5603_v39 = vcombine.high %v1972_v36, %v1976_v37  ;;  %v5602_v41 = vcombine.low %v1972_v36, %v1976_v37  ;;  %8441 = vst [vmem:[#allocation35_spill] sm:$0xff] %v6902_v20  ;;  %v6906_v21 = vld [vmem:[#allocation11 + $0x4a8] sm:$0xff] }
 0x253   : > { %v2104_v40 = vld [vmem:[#allocation11 + $0x620] sm:$0xff]  ;;  %8443 = vst [vmem:[#allocation37_spill] sm:$0xff] %v6906_v21  ;;  %v6916_v28 = vld [vmem:[#allocation11 + $0x48] sm:$0xff] }
 0x254   : > { %3463 = vmatpush2.bf16.msra.mxu0 %v5650_v43  ;;  %3576 = vmatpush2.bf16.msra.mxu1 %v5778_v44  ;;  %v5730_v42 = vcombine.low %v2100_v38, %v2104_v40  ;;  %v5731_v43 = vcombine.high %v2100_v38, %v2104_v40  ;;  %v6806_v44 = vld [vmem:[#allocation11 + $0x1c8] sm:$0xff]  ;;  %8444 = vst [vmem:[#allocation38_spill] sm:$0xff] %v6916_v28 }
 0x255   : > { %3464 = vmatprep.subr.bf16.mxu0 %v5643_v46  ;;  %3577 = vmatprep.subr.bf16.mxu1 %v5771_v47  ;;  %v6810_v46 = vld [vmem:[#allocation11 + $0x5c8] sm:$0xff]  ;;  %v5597_v47 = vcombine.high %v6806_v44, %v6808_v45 }
 0x256   : > { %1369 = vmatmul.mubr.bf16.gmra.mxu0 %v1091_v59  ;;  %1482 = vmatmul.mubr.bf16.gmra.mxu1 %v1091_v59  ;;  %v5725_v52 = vcombine.high %v6810_v46, %v6814_v48  ;;  %v6837_v59 = vsub.s32 1, %v6822_v55  ;;  %v6918_v31 = vld [vmem:[#allocation11 + $0x68] sm:$0xff] }
 0x257   : > { %1378 = vmatprep.mubr.bf16.mxu0 %v6342_v9  ;;  %1491 = vmatprep.mubr.bf16.mxu1 %v6342_v9  ;;  %8445 = vst [vmem:[#allocation39_spill] sm:$0xff] %v6918_v31  ;;  %v6930_v36 = vld [vmem:[#allocation11 + $0x468] sm:$0xff] }
 0x258   : > { %3465 = vmatpush2.bf16.msra.mxu0 %v5642_v57  ;;  %3578 = vmatpush2.bf16.msra.mxu1 %v5770_v58  ;;  %v6828_v57 = vsub.s32 0, %v6822_v55  ;;  %v1598_v58 = vld [vmem:[%s8280_s9] sm:$0xf]  ;;  %8437 = vst [vmem:[#allocation31_spill] sm:$0xff] %v6837_v59  ;;  %8447 = vst [vmem:[#allocation41_spill] sm:$0xff] %v6930_v36  ;;  %v6932_v37 = vld [vmem:[#allocation11 + $0x8] sm:$0xff] }
 0x259   : > { %3466 = vmatprep.subr.bf16.mxu0 %v5635_v60  ;;  %3579 = vmatprep.subr.bf16.mxu1 %v5763_v63  ;;  %v6839_v60 = vld [vmem:[#allocation11 + $0x188] sm:$0xff]  ;;  %v6880_v11 = vrot.slane %v1598_v58, %v6834_v26  ;;  %8448 = vst [vmem:[#allocation42_spill] sm:$0xff] %v6932_v37 }
 0x25a   : > { %8435 = vst [vmem:[#allocation29_spill] sm:$0xff] %v6828_v57  ;;  %v6848_v63 = vld [vmem:[#allocation11 + $0x5a8] sm:$0xff] }
 0x25b   : > { %v6934_v38 = vld [vmem:[#allocation11 + $0x28] sm:$0xff] }
 0x25c   : > { %3467 = vmatpush2.bf16.msra.mxu0 %v5634_v0  ;;  %3580 = vmatpush2.bf16.msra.mxu1 %v5762_v1  ;;  %v6852_v0 = vld [vmem:[#allocation11 + $0x168] sm:$0xff]  ;;  %8449 = vst [vmem:[#allocation43_spill] sm:$0xff] %v6934_v38 }
 0x25d   : > { %3468 = vmatprep.subr.bf16.mxu0 %v5627_v12  ;;  %3581 = vmatprep.subr.bf16.mxu1 %v5755_v16  ;;  %v6854_v1 = vld [vmem:[#allocation11 + $0x548] sm:$0xff]  ;;  %v6883_v12 = vrot.slane %v1512_v56, %v6837_v59  ;;  %v6895_v16 = vrot.slane %v1512_v56, %v6844_v62 }
 0x25e   : > { %1379 = vmatmul.mubr.bf16.gmra.mxu0 %v1092_v4  ;;  %1492 = vmatmul.mubr.bf16.gmra.mxu1 %v1092_v4  ;;  %v6863_v4 = vrot.slane %v1512_v56, %v6828_v57  ;;  %v6974_v40 = vld [vmem:[#allocation11 + $0x3a8] sm:$0xff] }
 0x25f   : > { %1388 = vmatprep.mubr.bf16.mxu0 %v6342_v9  ;;  %1501 = vmatprep.mubr.bf16.mxu1 %v6342_v9  ;;  %v5619_v9 = vcombine.high %v1988_v17, %v1992_v18  ;;  %v6898_v17 = vrot.slane %v1598_v58, %v6844_v62  ;;  %8457 = vst [vmem:[#allocation51_spill] sm:$0xff] %v6974_v40  ;;  %v6976_v29 = vld [vmem:[#allocation11 + $0x788] sm:$0xff] }
 0x260   : > { %3469 = vmatpush2.bf16.msra.mxu0 %v5626_v14  ;;  %3582 = vmatpush2.bf16.msra.mxu1 %v5754_v15  ;;  %v6889_v14 = vld [vmem:[#allocation11 + $0x88] sm:$0xff]  ;;  %v6892_v15 = vrot.slane %v1598_v58, %v6837_v59  ;;  %8458 = vst [vmem:[#allocation52_spill] sm:$0xff] %v6976_v29 }
 0x261   : > { %3470 = vmatprep.subr.bf16.mxu0 %v5619_v9  ;;  %3583 = vmatprep.subr.bf16.mxu1 %v5747_v25  ;;  %8440 = vst [vmem:[#allocation34_spill] sm:$0xff] %v6889_v14  ;;  %v6904_v9 = vld [vmem:[#allocation11 + $0x488] sm:$0xff] }
 0x262   : > { %8442 = vst [vmem:[#allocation36_spill] sm:$0xff] %v6904_v9  ;;  %v6986_v27 = vld [vmem:[#allocation11 + $0x7a8] sm:$0xff] }
 0x263   : > { %8459 = vst [vmem:[#allocation53_spill] sm:$0xff] %v6986_v27  ;;  %v7000_v25 = vld [vmem:[#allocation11 + $0x748] sm:$0xff] }
 0x264   : > { %3471 = vmatpush2.bf16.msra.mxu0 %v5618_v23  ;;  %3584 = vmatpush2.bf16.msra.mxu1 %v5746_v24  ;;  %v6990_v24 = vld [vmem:[#allocation11 + $0x368] sm:$0xff]  ;;  %8462 = vst [vmem:[#allocation56_spill] sm:$0xff] %v7000_v25 }
 0x265   : > { %3472 = vmatprep.subr.bf16.mxu0 %v5611_v32  ;;  %3585 = vmatprep.subr.bf16.mxu1 %v5739_v35  ;;  %v6920_v32 = vld [vmem:[#allocation11 + $0x448] sm:$0xff]  ;;  %8461 = vst [vmem:[#allocation55_spill] sm:$0xff] %v6990_v24 }
 0x266   : > { %1389 = vmatmul.mubr.bf16.gmra.mxu0 %v1093_v22  ;;  %1502 = vmatmul.mubr.bf16.gmra.mxu1 %v1093_v22  ;;  %v6874_v22 = vrot.slane %v1598_v58, %v6828_v57  ;;  %8446 = vst [vmem:[#allocation40_spill] sm:$0xff] %v6920_v32  ;;  %v6988_v58 = vld [vmem:[#allocation11 + $0x348] sm:$0xff] }
 0x267   : > { %8460 = vst [vmem:[#allocation54_spill] sm:$0xff] %v6988_v58  ;;  %v7002_v56 = vld [vmem:[#allocation11 + $0x768] sm:$0xff] }
 0x268   : > { %3473 = vmatpush2.bf16.msra.mxu0 %v5610_v33  ;;  %3586 = vmatpush2.bf16.msra.mxu1 %v5738_v34  ;;  %v6972_v33 = vld [vmem:[#allocation11 + $0x388] sm:$0xff]  ;;  %8463 = vst [vmem:[#allocation57_spill] sm:$0xff] %v7002_v56 }
 0x269   : > { %3474 = vmatprep.subr.bf16.mxu0 %v5603_v39  ;;  %3587 = vmatprep.subr.bf16.mxu1 %v5731_v43  ;;  %v6944_v43 = vld [vmem:[#allocation11 + $0x408] sm:$0xff]  ;;  %8456 = vst [vmem:[#allocation50_spill] sm:$0xff] %v6972_v33 }
 0x26a   : > { %8450 = vst [vmem:[#allocation44_spill] sm:$0xff] %v6944_v43  ;;  %v6958_v39 = vld [vmem:[#allocation11 + $0x3e8] sm:$0xff] }
 0x26b   : > { %8453 = vst [vmem:[#allocation47_spill] sm:$0xff] %v6958_v39  ;;  %v7004_v18 = vld [vmem:[#allocation11 + $0x308] sm:$0xff] }
 0x26c   : > { %3475 = vmatpush2.bf16.msra.mxu0 %v5602_v41  ;;  %3588 = vmatpush2.bf16.msra.mxu1 %v5730_v42  ;;  %v6960_v42 = vld [vmem:[#allocation11 + $0x7c8] sm:$0xff]  ;;  %8464 = vst [vmem:[#allocation58_spill] sm:$0xff] %v7004_v18 }
 0x26d   : > { %3670 = vmatprep.subr.bf16.mxu0 %v5597_v47  ;;  %3783 = vmatprep.subr.bf16.mxu1 %v5725_v52  ;;  %v6946_v47 = vld [vmem:[#allocation11 + $0x428] sm:$0xff]  ;;  %8454 = vst [vmem:[#allocation48_spill] sm:$0xff] %v6960_v42 }
 0x26e   : > { %8451 = vst [vmem:[#allocation45_spill] sm:$0xff] %v6946_v47  ;;  %v6948_v52 = vld [vmem:[#allocation11 + $0x3c8] sm:$0xff] }
 0x26f   : > { %8452 = vst [vmem:[#allocation46_spill] sm:$0xff] %v6948_v52  ;;  %v6962_v41 = vld [vmem:[#allocation11 + $0x7e8] sm:$0xff] }
 0x270   : > { %8455 = vst [vmem:[#allocation49_spill] sm:$0xff] %v6962_v41  ;;  %v7014_v50 = vld [vmem:[#allocation11 + $0x328] sm:$0xff] }
 0x271   : > { %8465 = vst [vmem:[#allocation59_spill] sm:$0xff] %v7014_v50  ;;  %v7016_v54 = vld [vmem:[#allocation11 + $0x708] sm:$0xff] }
 0x272   : > { %8466 = vst [vmem:[#allocation60_spill] sm:$0xff] %v7016_v54  ;;  %v7018_v55 = vld [vmem:[#allocation11 + $0x728] sm:$0xff] }
 0x273   : > { %8467 = vst [vmem:[#allocation61_spill] sm:$0xff] %v7018_v55  ;;  %v7028_v59 = vld [vmem:[#allocation11 + $0x2c8] sm:$0xff] }
 0x274   : > { %8468 = vst [vmem:[#allocation62_spill] sm:$0xff] %v7028_v59  ;;  %v7030_v57 = vld [vmem:[#allocation11 + $0x2e8] sm:$0xff] }
 0x275   : > { %8469 = vst [vmem:[#allocation63_spill] sm:$0xff] %v7030_v57  ;;  %v7032_v41 = vld [vmem:[#allocation11 + $0x6c8] sm:$0xff] }
 0x276   : > { %8470 = vst [vmem:[#allocation64_spill] sm:$0xff] %v7032_v41  ;;  %v7040_v34 = vld [vmem:[#allocation11 + $0x6e8] sm:$0xff] }
 0x277   : > { %8471 = vst [vmem:[#allocation65_spill] sm:$0xff] %v7040_v34  ;;  %v7042_v27 = vld [vmem:[#allocation11 + $0x288] sm:$0xff] }
 0x278   : > { %8472 = vst [vmem:[#allocation66_spill] sm:$0xff] %v7042_v27  ;;  %v7044_v35 = vld [vmem:[#allocation11 + $0x2a8] sm:$0xff] }
 0x279   : > { %8473 = vst [vmem:[#allocation67_spill] sm:$0xff] %v7044_v35  ;;  %v7054_v51 = vld [vmem:[#allocation11 + $0x688] sm:$0xff]  ;;  %v7114_v35 = vld [vmem:[#allocation11 + $0x1f0] sm:$0xff] }
 0x27a   : > { %8474 = vst [vmem:[#allocation68_spill] sm:$0xff] %v7054_v51  ;;  %v7056_v24 = vld [vmem:[#allocation11 + $0x6a8] sm:$0xff]  ;;  %8485 = vst [vmem:[#allocation79_spill] sm:$0xff] %v7114_v35  ;;  %v7120_v51 = vld [vmem:[#allocation11 + $0x5f0] sm:$0xff] }
 0x27b   : > { %8475 = vst [vmem:[#allocation69_spill] sm:$0xff] %v7056_v24  ;;  %v7065_v56 = vld [vmem:[#allocation11 + $0x248] sm:$0xff]  ;;  %8487 = vst [vmem:[#allocation81_spill] sm:$0xff] %v7120_v51 }
 0x27c   : > { %8476 = vst [vmem:[#allocation70_spill] sm:$0xff] %v7065_v56  ;;  %v7076_v55 = vld [vmem:[#allocation11 + $0x648] sm:$0xff]  ;;  %v7118_v56 = vld [vmem:[#allocation11 + $0x5d0] sm:$0xff] }
 0x27d   : > { %8478 = vst [vmem:[#allocation72_spill] sm:$0xff] %v7076_v55  ;;  %v7086_v54 = vld [vmem:[#allocation11 + $0x208] sm:$0xff]  ;;  %8486 = vst [vmem:[#allocation80_spill] sm:$0xff] %v7118_v56 }
 0x27e   : > { %8480 = vst [vmem:[#allocation74_spill] sm:$0xff] %v7086_v54  ;;  %v7088_v52 = vld [vmem:[#allocation11 + $0x228] sm:$0xff] }
 0x27f   : > { %8481 = vst [vmem:[#allocation75_spill] sm:$0xff] %v7088_v52 }
 0x2ee   : > { %v1320_v62 = vpop.f32.mrf.mxu0  ;;  %v1433_v26 = vpop.f32.mrf.mxu1 }
 0x2ef   : > { %v1534_v42 = vmul.f32 %v6863_v4, %v1320_v62  ;;  %v1536_v39 = vmul.f32 %v6877_v10, %v1433_v26  ;;  %v7067_v62 = vld [vmem:[#allocation11 + $0x268] sm:$0xff] }
 0x2f0   : > { %v1322_v29 = vpop.f32.mrf.mxu0  ;;  %v1435_v40 = vpop.f32.mrf.mxu1  ;;  %8477 = vst [vmem:[#allocation71_spill] sm:$0xff] %v7067_v62  ;;  %v7078_v26 = vld [vmem:[#allocation11 + $0x668] sm:$0xff]  ;;  %v7112_v62 = vld [vmem:[#allocation11 + $0x1d0] sm:$0xff] }
 0x2f1   : > { %v1535_v58 = vmul.f32 %v6883_v12, %v1322_v29  ;;  %v1620_v23 = vadd.f32 %v6874_v22, %v1534_v42  ;;  %8479 = vst [vmem:[#allocation73_spill] sm:$0xff] %v7078_v26  ;;  %v1622_v57 = vadd.f32 %v6880_v11, %v1536_v39  ;;  %v1537_v59 = vmul.f32 %v6895_v16, %v1435_v40  ;;  %v7110_v29 = vld [vmem:[#allocation11 + $0x628] sm:$0xff] }
 0x2f2   : > { %v1324_v50 = vpop.f32.mrf.mxu0  ;;  %v1437_v18 = vpop.f32.mrf.mxu1  ;;  %8483 = vst [vmem:[#allocation77_spill] sm:$0xff] %v7110_v29  ;;  %8484 = vst [vmem:[#allocation78_spill] sm:$0xff] %v7112_v62 }
 0x2f3   : > { %v1538_v33 = vmul.f32 %v6863_v4, %v1324_v50  ;;  %v1540_v34 = vmul.f32 %v6877_v10, %v1437_v18  ;;  %v1621_v42 = vadd.f32 %v6892_v15, %v1535_v58  ;;  %v7103_v18 = vld [vmem:[#allocation11 + $0x608] sm:$0xff]  ;;  %vm1684_vm3 = vcmp.gt.f32.partialorder %v1620_v23, 0.0 }
 0x2f4   : > { %v1326_v41 = vpop.f32.mrf.mxu0  ;;  %v1439_v25 = vpop.f32.mrf.mxu1  ;;  %8482 = vst [vmem:[#allocation76_spill] sm:$0xff] %v7103_v18  ;;  %v1748_v50 = vmul.f32 0.01, %v1620_v23  ;;  %v1750_v26 = vmul.f32 0.01, %v1622_v57  ;;  %v1623_v55 = vadd.f32 %v6898_v17, %v1537_v59  ;;  %vm1686_vm4 = vcmp.gt.f32.partialorder %v1622_v57, 0.0 }
 0x2f5   : > { %v1539_v27 = vmul.f32 %v6883_v12, %v1326_v41  ;;  %v1541_v41 = vmul.f32 %v6895_v16, %v1439_v25  ;;  %v1624_v40 = vadd.f32 %v6874_v22, %v1538_v33  ;;  %v1626_v58 = vadd.f32 %v6880_v11, %v1540_v34 }
 0x2f6   : > { %v1330_v39 = vpop.f32.mrf.mxu0  ;;  %v1443_v24 = vpop.f32.mrf.mxu1  ;;  %v1749_v43 = vmul.f32 0.01, %v1621_v42  ;;  %vm1685_vm5 = vcmp.gt.f32.partialorder %v1621_v42, 0.0  ;;  %v1812_v32 = vsel %vm1684_vm3, %v1620_v23, %v1748_v50  ;;  %vm1687_vm6 = vcmp.gt.f32.partialorder %v1623_v55, 0.0 }
 0x2f7   : > { %v1542_v52 = vmul.f32 %v6863_v4, %v1330_v39  ;;  %v1544_v38 = vmul.f32 %v6877_v10, %v1443_v24  ;;  %v1625_v37 = vadd.f32 %v6892_v15, %v1539_v27  ;;  %v1814_v24 = vsel %vm1686_vm4, %v1622_v57, %v1750_v26 }
 0x2f8   : > { %v1332_v54 = vpop.f32.mrf.mxu0  ;;  %v1445_v47 = vpop.f32.mrf.mxu1  ;;  %v1627_v59 = vadd.f32 %v6898_v17, %v1541_v41  ;;  %v1751_v31 = vmul.f32 0.01, %v1623_v55  ;;  %v1752_v25 = vmul.f32 0.01, %v1624_v40  ;;  %v1754_v29 = vmul.f32 0.01, %v1626_v58 }
 0x2f9   : > { %v1628_v27 = vadd.f32 %v6874_v22, %v1542_v52  ;;  %v1813_v21 = vsel %vm1685_vm5, %v1621_v42, %v1749_v43  ;;  %vm1688_vm7 = vcmp.gt.f32.partialorder %v1624_v40, 0.0  ;;  %vm1690_vm8 = vcmp.gt.f32.partialorder %v1626_v58, 0.0 }
 0x2fa   : > { %v1334_v36 = vpop.f32.mrf.mxu0  ;;  %v1447_v33 = vpop.f32.mrf.mxu1  ;;  %v1630_v39 = vadd.f32 %v6880_v11, %v1544_v38  ;;  %vm1689_vm9 = vcmp.gt.f32.partialorder %v1625_v37, 0.0  ;;  %v1753_v23 = vmul.f32 0.01, %v1625_v37  ;;  %v1543_v57 = vmul.f32 %v6883_v12, %v1332_v54 }
 0x2fb   : > { %v1545_v26 = vmul.f32 %v6895_v16, %v1445_v47  ;;  %vm1691_vm10 = vcmp.gt.f32.partialorder %v1627_v59, 0.0  ;;  %v1755_v34 = vmul.f32 0.01, %v1627_v59  ;;  %v1816_v56 = vsel %vm1688_vm7, %v1624_v40, %v1752_v25 }
 0x2fc   : > { %v1336_v18 = vpop.f32.mrf.mxu0  ;;  %v1449_v28 = vpop.f32.mrf.mxu1  ;;  %v1818_v43 = vsel %vm1690_vm8, %v1626_v58, %v1754_v29  ;;  %vm1692_vm11 = vcmp.gt.f32.partialorder %v1628_v27, 0.0  ;;  %v1756_v42 = vmul.f32 0.01, %v1628_v27  ;;  %v1758_v62 = vmul.f32 0.01, %v1630_v39 }
 0x2fd   : > { %v1547_v52 = vmul.f32 %v6883_v12, %v1336_v18  ;;  %v1549_v51 = vmul.f32 %v6895_v16, %v1449_v28  ;;  %v1629_v9 = vadd.f32 %v6892_v15, %v1543_v57  ;;  %v1546_v54 = vmul.f32 %v6863_v4, %v1334_v36 }
 0x2fe   : > { %v1340_v50 = vpop.f32.mrf.mxu0  ;;  %v1453_v41 = vpop.f32.mrf.mxu1  ;;  %v1548_v47 = vmul.f32 %v6877_v10, %v1447_v33  ;;  %v1815_v20 = vsel %vm1687_vm6, %v1623_v55, %v1751_v31  ;;  %vm1694_vm12 = vcmp.gt.f32.partialorder %v1630_v39, 0.0  ;;  %v7150_v18 = vadd.f32 %v6898_v17, %v1545_v26 }
 0x2ff   : > { %v1633_v28 = vadd.f32 %v6892_v15, %v1547_v52  ;;  %v7153_v58 = vpack.c.bf16 %v1816_v56, %v1812_v32  ;;  %v7155_v25 = vpack.c.bf16 %v1818_v43, %v1814_v24  ;;  %v1817_v57 = vsel %vm1689_vm9, %v1625_v37, %v1753_v23 }
 0x300   : > { %v1342_v35 = vpop.f32.mrf.mxu0  ;;  %v1455_v38 = vpop.f32.mrf.mxu1  ;;  %v1635_v36 = vadd.f32 %v6898_v17, %v1549_v51  ;;  %v1819_v33 = vsel %vm1691_vm10, %v1627_v59, %v1755_v34  ;;  %v7161_v55 = vsel %vm1692_vm11, %v1628_v27, %v1756_v42  ;;  %v1550_v31 = vmul.f32 %v6863_v4, %v1340_v50 }
 0x301   : > { %8488 = vst [vmem:[#allocation82_spill] sm:$0xff] %v7153_v58  ;;  %8489 = vst [vmem:[#allocation83_spill] sm:$0xff] %v7155_v25  ;;  %v1552_v26 = vmul.f32 %v6877_v10, %v1453_v41  ;;  %v7165_v53 = vsel %vm1694_vm12, %v1630_v39, %v1758_v62  ;;  %vm1693_vm13 = vcmp.gt.f32.partialorder %v1629_v9, 0.0  ;;  %v1632_v32 = vadd.f32 %v6874_v22, %v1546_v54 }
 0x302   : > { %v1344_v29 = vpop.f32.mrf.mxu0  ;;  %v1457_v40 = vpop.f32.mrf.mxu1  ;;  %v1634_v37 = vadd.f32 %v6880_v11, %v1548_v47  ;;  %v1757_v56 = vmul.f32 0.01, %v1629_v9  ;;  %vm1695_vm14 = vcmp.gt.f32.partialorder %v7150_v18, 0.0  ;;  %v1761_v51 = vmul.f32 0.01, %v1633_v28 }
 0x303   : > { %v7170_v59 = vpack.c.bf16 %v1817_v57, %v1813_v21  ;;  %v1763_v27 = vmul.f32 0.01, %v1635_v36  ;;  %v7172_v23 = vpack.c.bf16 %v1819_v33, %v1815_v20  ;;  %v1551_v50 = vmul.f32 %v6883_v12, %v1342_v35 }
 0x304   : > { %v1346_v52 = vpop.f32.mrf.mxu0  ;;  %v1459_v14 = vpop.f32.mrf.mxu1  ;;  %v1553_v62 = vmul.f32 %v6895_v16, %v1455_v38  ;;  %vm1697_vm15 = vcmp.gt.f32.partialorder %v1633_v28, 0.0  ;;  %vm1699_vm0 = vcmp.gt.f32.partialorder %v1635_v36, 0.0  ;;  %v1636_v39 = vadd.f32 %v6874_v22, %v1550_v31 }
 0x305   : > { %v1638_v41 = vadd.f32 %v6880_v11, %v1552_v26  ;;  %3476 = vmatprep.mubr.bf16.mxu0 %v7170_v59  ;;  %v1759_v42 = vmul.f32 0.01, %v7150_v18  ;;  %vm1696_vm1 = vcmp.gt.f32.partialorder %v1632_v32, 0.0  ;;  %v1760_v20 = vmul.f32 0.01, %v1632_v32  ;;  %3589 = vmatprep.mubr.bf16.mxu1 %v7172_v23 }
 0x306   : > { %v1350_v34 = vpop.f32.mrf.mxu0  ;;  %v1463_v24 = vpop.f32.mrf.mxu1  ;;  %3477 = vmatmul.mubr.bf16.vlgmr.msra.gmra.mxu0 %v7153_v58  ;;  %v1637_v35 = vadd.f32 %v6892_v15, %v1551_v50  ;;  %v1821_v38 = vsel %vm1693_vm13, %v1629_v9, %v1757_v56  ;;  %vm1698_vm2 = vcmp.gt.f32.partialorder %v1634_v37, 0.0  ;;  %3590 = vmatmul.mubr.bf16.vlgmr.msra.gmra.mxu1 %v7155_v25  ;;  %v8490_v54 = vcombine.low %v6806_v44, %v6808_v45 }
 0x307   : > { %v1639_v47 = vadd.f32 %v6898_v17, %v1553_v62  ;;  %v1554_v57 = vmul.f32 %v6863_v4, %v1344_v29  ;;  %v1762_v26 = vmul.f32 0.01, %v1634_v37  ;;  %v1825_v50 = vsel %vm1697_vm15, %v1633_v28, %v1761_v51 }
 0x308   : > { %v7179_v43 = vpop.f32.mrf.mxu0  ;;  %v7181_v21 = vpop.f32.mrf.mxu1  ;;  %3671 = vmatpush1.bf16.msra.mxu0 %v8490_v54  ;;  %v1827_v9 = vsel %vm1699_vm0, %v1635_v36, %v1763_v27  ;;  %v8491_v56 = vcombine.low %v6810_v46, %v6814_v48  ;;  %v1556_v44 = vmul.f32 %v6877_v10, %v1457_v40  ;;  %v8492_v45 = vcombine.high %v6839_v60, %v6841_v61 }
 0x309   : > { %vm1700_vm3 = vcmp.gt.f32.partialorder %v1636_v39, 0.0  ;;  %v1764_v29 = vmul.f32 0.01, %v1636_v39  ;;  %vm1702_vm4 = vcmp.gt.f32.partialorder %v1638_v41, 0.0  ;;  %v8493_v62 = vcombine.high %v6846_v30, %v6848_v63 }
 0x30a   : > { %v7194_v33 = vpop.f32.mrf.mxu0  ;;  %v7196_v31 = vpop.f32.mrf.mxu1  ;;  %3784 = vmatpush1.bf16.msra.mxu1 %v8491_v56  ;;  %3672 = vmatprep.subr.bf16.mxu0 %v8492_v45  ;;  %v1555_v28 = vmul.f32 %v6883_v12, %v1346_v52  ;;  %v1766_v46 = vmul.f32 0.01, %v1638_v41  ;;  %vm1701_vm5 = vcmp.gt.f32.partialorder %v1637_v35, 0.0  ;;  %v1765_v48 = vmul.f32 0.01, %v1637_v35 }
 0x30b   : > { %3785 = vmatprep.subr.bf16.mxu1 %v8493_v62  ;;  %v1557_v40 = vmul.f32 %v6895_v16, %v1459_v14  ;;  %v1767_v27 = vmul.f32 0.01, %v1639_v47  ;;  %v7215_v54 = vadd.f32 %v6874_v22, %v1554_v57  ;;  %v8494_v56 = vcombine.low %v6839_v60, %v6841_v61 }
 0x30c   : > { %v1356_v36 = vpop.f32.mrf.mxu0  ;;  %v7211_v51 = vpop.f32.mrf.mxu1  ;;  %v1558_v45 = vmul.f32 %v6863_v4, %v1350_v34  ;;  %v1560_v52 = vmul.f32 %v6877_v10, %v1463_v24  ;;  %v1823_v14 = vsel %vm1695_vm14, %v7150_v18, %v1759_v42  ;;  %v1824_v58 = vsel %vm1696_vm1, %v1632_v32, %v1760_v20 }
 0x30d   : > { %3673 = vmatpush1.bf16.msra.mxu0 %v8494_v56  ;;  %vm1703_vm6 = vcmp.gt.f32.partialorder %v1639_v47, 0.0  ;;  %v7231_v57 = vadd.f32 %v6880_v11, %v1556_v44  ;;  %v8495_v60 = vcombine.low %v6846_v30, %v6848_v63  ;;  %v1826_v61 = vsel %vm1698_vm2, %v1634_v37, %v1762_v26 }
 0x30e   : > { %v7222_v62 = vpop.f32.mrf.mxu0  ;;  %v7224_v25 = vpop.f32.mrf.mxu1  ;;  %v1641_v34 = vadd.f32 %v6892_v15, %v1555_v28  ;;  %v7238_v24 = vpack.c.bf16 %v1825_v50, %v1821_v38  ;;  %v7240_v56 = vpack.c.bf16 %v1827_v9, %v1823_v14  ;;  %v8496_v18 = vcombine.high %v6850_v49, %v6852_v0 }
 0x30f   : > { %3786 = vmatpush1.bf16.msra.mxu1 %v8495_v60  ;;  %v7250_v20 = vsel %vm1700_vm3, %v1636_v39, %v1764_v29  ;;  %v7253_v30 = vsel %vm1702_vm4, %v1638_v41, %v1766_v46  ;;  %v7256_v63 = vsel %vm1701_vm5, %v1637_v35, %v1765_v48  ;;  %v1643_v37 = vadd.f32 %v6898_v17, %v1557_v40 }
 0x310   : > { %3674 = vmatprep.subr.bf16.mxu0 %v8496_v18  ;;  %v7245_v32 = vpop.f32.mrf.mxu0  ;;  %v7247_v42 = vpop.f32.mrf.mxu1  ;;  %v8497_v38 = vcombine.high %v6854_v1, %v6856_v19  ;;  %v7262_v26 = vsel %vm1703_vm6, %v1639_v47, %v1767_v27  ;;  %vm1704_vm7 = vcmp.gt.f32.partialorder %v7215_v54, 0.0  ;;  %v1644_v50 = vadd.f32 %v6874_v22, %v1558_v45  ;;  %3486 = vmatprep.mubr.bf16.mxu0 %v7238_v24 }
 0x311   : > { %v1646_v39 = vadd.f32 %v6880_v11, %v1560_v52  ;;  %3599 = vmatprep.mubr.bf16.mxu1 %v7240_v56  ;;  %v1768_v9 = vmul.f32 0.01, %v7215_v54  ;;  %vm1706_vm8 = vcmp.gt.f32.partialorder %v7231_v57, 0.0  ;;  %v7276_v47 = vpack.c.bf16 %v1824_v58, %v7161_v55 }
 0x312   : > { %3787 = vmatprep.subr.bf16.mxu1 %v8497_v38  ;;  %v7269_v41 = vpop.f32.mrf.mxu0  ;;  %v7271_v35 = vpop.f32.mrf.mxu1  ;;  %v7279_v44 = vpack.c.bf16 %v1826_v61, %v7165_v53  ;;  %v8498_v29 = vcombine.low %v6850_v49, %v6852_v0  ;;  %v1770_v28 = vmul.f32 0.01, %v7231_v57  ;;  %v1769_v46 = vmul.f32 0.01, %v1641_v34 }
 0x313   : > { %v8499_v48 = vcombine.low %v6854_v1, %v6856_v19  ;;  %v1559_v40 = vmul.f32 %v6883_v12, %v7179_v43  ;;  %v1561_v58 = vmul.f32 %v6895_v16, %v7181_v21  ;;  %vm1705_vm9 = vcmp.gt.f32.partialorder %v1641_v34, 0.0  ;;  %3487 = vmatmul.mubr.bf16.gmra.mxu0 %v7276_v47 }
 0x314   : > { %3675 = vmatpush1.bf16.msra.mxu0 %v8498_v29  ;;  %v7292_v55 = vpop.f32.mrf.mxu0  ;;  %v7294_v53 = vpop.f32.mrf.mxu1  ;;  %v1771_v49 = vmul.f32 0.01, %v1643_v37  ;;  %3600 = vmatmul.mubr.bf16.gmra.mxu1 %v7279_v44  ;;  %v1562_v0 = vmul.f32 %v6863_v4, %v7194_v33  ;;  %v1564_v1 = vmul.f32 %v6877_v10, %v7196_v31  ;;  %vm1707_vm10 = vcmp.gt.f32.partialorder %v1643_v37, 0.0 }
 0x315   : > { %3788 = vmatpush1.bf16.msra.mxu1 %v8499_v48  ;;  %v1772_v19 = vmul.f32 0.01, %v1644_v50  ;;  %v1774_v43 = vmul.f32 0.01, %v1646_v39  ;;  %v8500_v21 = vcombine.high %v6858_v2, %v6860_v3  ;;  %v8501_v27 = vcombine.high %v6865_v5, %v6867_v6 }
 0x316   : > { %v1563_v45 = vmul.f32 %v6883_v12, %v1356_v36  ;;  %v7309_v52 = vpop.f32.mrf.mxu0  ;;  %v7311_v14 = vpop.f32.mrf.mxu1  ;;  %vm1708_vm11 = vcmp.gt.f32.partialorder %v1644_v50, 0.0  ;;  %vm1710_vm12 = vcmp.gt.f32.partialorder %v1646_v39, 0.0  ;;  %v1645_v33 = vadd.f32 %v6892_v15, %v1559_v40 }
 0x317   : > { %3676 = vmatprep.subr.bf16.mxu0 %v8500_v21  ;;  %3789 = vmatprep.subr.bf16.mxu1 %v8501_v27  ;;  %v1647_v31 = vadd.f32 %v6898_v17, %v1561_v58  ;;  %v8502_v60 = vcombine.low %v6858_v2, %v6860_v3  ;;  %v1832_v61 = vsel %vm1704_vm7, %v7215_v54, %v1768_v9  ;;  %v8512_v21 = vld [vmem:[#allocation36_spill] sm:$0xff] }
 0x318   : > { %v1833_v36 = vsel %vm1705_vm9, %v1641_v34, %v1769_v46  ;;  %v8503_v18 = vcombine.low %v6865_v5, %v6867_v6  ;;  %v1565_v38 = vmul.f32 %v6895_v16, %v7211_v51  ;;  %v8504_v29 = vcombine.high %v6869_v7, %v6871_v8  ;;  %v7330_v48 = vpop.f32.mrf.mxu0  ;;  %v7332_v2 = vpop.f32.mrf.mxu1  ;;  %v8505_v6 = vld [vmem:[#allocation33_spill] sm:$0xff] }
 0x319   : > { %3677 = vmatpush1.bf16.msra.mxu0 %v8502_v60  ;;  %v1835_v3 = vsel %vm1707_vm10, %v1643_v37, %v1771_v49  ;;  %v1648_v54 = vadd.f32 %v6874_v22, %v1562_v0  ;;  %v1650_v34 = vadd.f32 %v6880_v11, %v1564_v1  ;;  %v1566_v5 = vmul.f32 %v6863_v4, %v7222_v62 }
 0x31a   : > { %3790 = vmatpush1.bf16.msra.mxu1 %v8503_v18  ;;  %3678 = vmatprep.subr.bf16.mxu0 %v8504_v29  ;;  %v8506_v51 = vcombine.high %v6885_v13, %v8505_v6  ;;  %v1834_v9 = vsel %vm1706_vm8, %v7231_v57, %v1770_v28  ;;  %v7346_v46 = vsel %vm1708_vm11, %v1644_v50, %v1772_v19  ;;  %vm1709_vm13 = vcmp.gt.f32.partialorder %v1645_v33, 0.0  ;;  %v7367_v1 = vpop.f32.mrf.mxu0  ;;  %v7369_v19 = vpop.f32.mrf.mxu1 }
 0x31b   : > { %v7349_v37 = vsel %vm1710_vm12, %v1646_v39, %v1774_v43  ;;  %v1649_v40 = vadd.f32 %v6892_v15, %v1563_v45  ;;  %v1773_v58 = vmul.f32 0.01, %v1645_v33  ;;  %vm1711_vm14 = vcmp.gt.f32.partialorder %v1647_v31, 0.0  ;;  %v8510_v43 = vld [vmem:[#allocation35_spill] sm:$0xff] }
 0x31c   : > { %3791 = vmatprep.subr.bf16.mxu1 %v8506_v51  ;;  %v1775_v62 = vmul.f32 0.01, %v1647_v31  ;;  %v8507_v49 = vcombine.low %v6869_v7, %v6871_v8  ;;  %v1651_v0 = vadd.f32 %v6898_v17, %v1565_v38  ;;  %v1568_v57 = vmul.f32 %v6877_v10, %v7224_v25  ;;  %v8509_v25 = vld [vmem:[#allocation34_spill] sm:$0xff] }
 0x31d   : > { %v7359_v50 = vpack.c.bf16 %v1833_v36, %v7256_v63  ;;  %v7362_v39 = vpack.c.bf16 %v1835_v3, %v7262_v26  ;;  %v8508_v28 = vcombine.low %v6885_v13, %v8505_v6  ;;  %vm1712_vm15 = vcmp.gt.f32.partialorder %v1648_v54, 0.0  ;;  %v8513_v26 = vld [vmem:[#allocation37_spill] sm:$0xff] }
 0x31e   : > { %3679 = vmatpush1.bf16.msra.mxu0 %v8507_v49  ;;  %v1776_v7 = vmul.f32 0.01, %v1648_v54  ;;  %vm1714_vm0 = vcmp.gt.f32.partialorder %v1650_v34, 0.0  ;;  %v1652_v8 = vadd.f32 %v6874_v22, %v1566_v5  ;;  %v8511_v63 = vcombine.high %v8509_v25, %v8510_v43  ;;  %v8518_v49 = vld [vmem:[#allocation39_spill] sm:$0xff] }
 0x31f   : > { %3792 = vmatpush1.bf16.msra.mxu1 %v8508_v28  ;;  %v8514_v27 = vcombine.high %v8512_v21, %v8513_v26  ;;  %v1778_v45 = vmul.f32 0.01, %v1650_v34  ;;  %v1654_v13 = vadd.f32 %v6880_v11, %v1568_v57  ;;  %3496 = vmatprep.mubr.bf16.mxu0 %v7359_v50  ;;  %v7382_v60 = vpack.c.bf16 %v1832_v61, %v7250_v20 }
 0x320   : > { %3680 = vmatprep.subr.bf16.mxu0 %v8511_v63  ;;  %3609 = vmatprep.mubr.bf16.mxu1 %v7362_v39  ;;  %v7385_v36 = vpack.c.bf16 %v1834_v9, %v7253_v30  ;;  %v1837_v18 = vsel %vm1709_vm13, %v1645_v33, %v1773_v58  ;;  %vm1713_vm1 = vcmp.gt.f32.partialorder %v1649_v40, 0.0  ;;  %v1567_v38 = vmul.f32 %v6883_v12, %v7245_v32  ;;  %v7401_v32 = vpop.f32.mrf.mxu0  ;;  %v7403_v33 = vpop.f32.mrf.mxu1  ;;  %v8517_v58 = vld [vmem:[#allocation38_spill] sm:$0xff] }
 0x321   : > { %3793 = vmatprep.subr.bf16.mxu1 %v8514_v27  ;;  %v1569_v29 = vmul.f32 %v6895_v16, %v7247_v42  ;;  %v8515_v3 = vcombine.low %v8509_v25, %v8510_v43  ;;  %v1777_v5 = vmul.f32 0.01, %v1649_v40  ;;  %vm1715_vm2 = vcmp.gt.f32.partialorder %v1651_v0, 0.0  ;;  %3497 = vmatmul.mubr.bf16.gmra.mxu0 %v7382_v60  ;;  %v8520_v25 = vld [vmem:[#allocation40_spill] sm:$0xff]  ;;  %v8521_v43 = vld [vmem:[#allocation41_spill] sm:$0xff] }
 0x322   : > { %3610 = vmatmul.mubr.bf16.gmra.mxu1 %v7385_v36  ;;  %v1570_v20 = vmul.f32 %v6863_v4, %v7269_v41  ;;  %v1572_v30 = vmul.f32 %v6877_v10, %v7271_v35  ;;  %v1839_v42 = vsel %vm1711_vm14, %v1647_v31, %v1775_v62  ;;  %v1779_v61 = vmul.f32 0.01, %v1651_v0 }
 0x323   : > { %3681 = vmatpush1.bf16.msra.mxu0 %v8515_v3  ;;  %v1780_v6 = vmul.f32 0.01, %v1652_v8  ;;  %v1782_v51 = vmul.f32 0.01, %v1654_v13  ;;  %v8516_v9 = vcombine.low %v8512_v21, %v8513_v26  ;;  %vm1716_vm3 = vcmp.gt.f32.partialorder %v1652_v8, 0.0  ;;  %v8525_v3 = vld [vmem:[#allocation43_spill] sm:$0xff] }
 0x324   : > { %vm1718_vm4 = vcmp.gt.f32.partialorder %v1654_v13, 0.0  ;;  %v1653_v41 = vadd.f32 %v6892_v15, %v1567_v38  ;;  %v1571_v35 = vmul.f32 %v6883_v12, %v7292_v55  ;;  %v8519_v57 = vcombine.high %v8517_v58, %v8518_v49 }
 0x325   : > { %3794 = vmatpush1.bf16.msra.mxu1 %v8516_v9  ;;  %v7416_v31 = vadd.f32 %v6898_v17, %v1569_v29  ;;  %v7419_v62 = vadd.f32 %v6874_v22, %v1570_v20  ;;  %v1573_v28 = vmul.f32 %v6895_v16, %v7294_v53  ;;  %v8522_v63 = vcombine.high %v8520_v25, %v8521_v43  ;;  %v8524_v29 = vld [vmem:[#allocation42_spill] sm:$0xff]  ;;  %v1380_v20 = vpop.f32.mrf.mxu0  ;;  %v7437_v9 = vpop.f32.mrf.mxu1 }
 0x326   : > { %3682 = vmatprep.subr.bf16.mxu0 %v8519_v57  ;;  %v8523_v55 = vcombine.low %v8517_v58, %v8518_v49  ;;  %v1840_v21 = vsel %vm1712_vm15, %v1648_v54, %v1776_v7  ;;  %v1842_v26 = vsel %vm1714_vm0, %v1650_v34, %v1778_v45  ;;  %v1658_v27 = vadd.f32 %v6880_v11, %v1572_v30  ;;  %v8533_v49 = vld [vmem:[#allocation47_spill] sm:$0xff] }
 0x327   : > { %3795 = vmatprep.subr.bf16.mxu1 %v8522_v63  ;;  %v1574_v38 = vmul.f32 %v6863_v4, %v7309_v52  ;;  %v8526_v53 = vcombine.high %v8524_v29, %v8525_v3  ;;  %v1841_v57 = vsel %vm1713_vm1, %v1649_v40, %v1777_v5  ;;  %v1843_v58 = vsel %vm1715_vm2, %v1651_v0, %v1779_v61  ;;  %v8528_v40 = vld [vmem:[#allocation44_spill] sm:$0xff]  ;;  %v8529_v5 = vld [vmem:[#allocation45_spill] sm:$0xff]  ;;  %v7472_v63 = vpop.f32.mrf.mxu1 }
 0x328   : > { %3683 = vmatpush1.bf16.msra.mxu0 %v8523_v55  ;;  %v7442_v54 = vsel %vm1716_vm3, %v1652_v8, %v1780_v6  ;;  %v7445_v34 = vsel %vm1718_vm4, %v1654_v13, %v1782_v51  ;;  %v8527_v52 = vcombine.low %v8520_v25, %v8521_v43  ;;  %vm1717_vm5 = vcmp.gt.f32.partialorder %v1653_v41, 0.0  ;;  %v7470_v43 = vpop.f32.mrf.mxu0 }
 0x329   : > { %3684 = vmatprep.subr.bf16.mxu0 %v8526_v53  ;;  %v1781_v7 = vmul.f32 0.01, %v1653_v41  ;;  %v1657_v45 = vadd.f32 %v6892_v15, %v1571_v35  ;;  %v1576_v30 = vmul.f32 %v6877_v10, %v7311_v14  ;;  %v8530_v0 = vcombine.high %v8528_v40, %v8529_v5  ;;  %v8532_v35 = vld [vmem:[#allocation46_spill] sm:$0xff] }
 0x32a   : > { %3796 = vmatpush1.bf16.msra.mxu1 %v8527_v52  ;;  %vm1719_vm6 = vcmp.gt.f32.partialorder %v7416_v31, 0.0  ;;  %v1783_v8 = vmul.f32 0.01, %v7416_v31  ;;  %vm1720_vm7 = vcmp.gt.f32.partialorder %v7419_v62, 0.0  ;;  %v1659_v13 = vadd.f32 %v6898_v17, %v1573_v28  ;;  %v8536_v52 = vld [vmem:[#allocation48_spill] sm:$0xff] }
 0x32b   : > { %3797 = vmatprep.subr.bf16.mxu1 %v8530_v0  ;;  %v8531_v61 = vcombine.low %v8524_v29, %v8525_v3  ;;  %v1784_v6 = vmul.f32 0.01, %v7419_v62  ;;  %vm1722_vm8 = vcmp.gt.f32.partialorder %v1658_v27, 0.0  ;;  %v1660_v14 = vadd.f32 %v6874_v22, %v1574_v38 }
 0x32c   : > { %v7465_v51 = vpack.c.bf16 %v1841_v57, %v1837_v18  ;;  %v8534_v25 = vcombine.high %v8532_v35, %v8533_v49  ;;  %v1786_v28 = vmul.f32 0.01, %v1658_v27  ;;  %v1662_v55 = vadd.f32 %v6880_v11, %v1576_v30  ;;  %v8537_v30 = vld [vmem:[#allocation49_spill] sm:$0xff] }
 0x32d   : > { %3685 = vmatpush1.bf16.msra.mxu0 %v8531_v61  ;;  %v7475_v29 = vpack.c.bf16 %v1843_v58, %v1839_v42  ;;  %v7478_v3 = vpack.c.bf16 %v1840_v21, %v7346_v46  ;;  %v8535_v18 = vcombine.low %v8528_v40, %v8529_v5  ;;  %v1845_v38 = vsel %vm1717_vm5, %v1653_v41, %v1781_v7  ;;  %v1384_v7 = vpop.f32.mrf.mxu0  ;;  %v7502_v40 = vpop.f32.mrf.mxu1 }
 0x32e   : > { %3686 = vmatprep.subr.bf16.mxu0 %v8534_v25  ;;  %vm1721_vm9 = vcmp.gt.f32.partialorder %v1657_v45, 0.0  ;;  %v1785_v53 = vmul.f32 0.01, %v1657_v45  ;;  %3506 = vmatprep.mubr.bf16.mxu0 %v7465_v51  ;;  %v7486_v57 = vpack.c.bf16 %v1842_v26, %v7349_v37  ;;  %v8538_v42 = vcombine.high %v8536_v52, %v8537_v30 }
 0x32f   : > { %3798 = vmatpush1.bf16.msra.mxu1 %v8535_v18  ;;  %vm1723_vm10 = vcmp.gt.f32.partialorder %v1659_v13, 0.0  ;;  %3619 = vmatprep.mubr.bf16.mxu1 %v7475_v29  ;;  %v1575_v46 = vmul.f32 %v6883_v12, %v7330_v48  ;;  %v1577_v41 = vmul.f32 %v6895_v16, %v7332_v2  ;;  %v1578_v21 = vmul.f32 %v6863_v4, %v7367_v1  ;;  %v8541_v18 = vld [vmem:[#allocation50_spill] sm:$0xff] }
 0x330   : > { %3799 = vmatprep.subr.bf16.mxu1 %v8538_v42  ;;  %3507 = vmatmul.mubr.bf16.gmra.mxu0 %v7478_v3  ;;  %v1787_v37 = vmul.f32 0.01, %v1659_v13  ;;  %vm1724_vm11 = vcmp.gt.f32.partialorder %v1660_v14, 0.0  ;;  %v1788_v26 = vmul.f32 0.01, %v1660_v14  ;;  %v1580_v58 = vmul.f32 %v6877_v10, %v7369_v19  ;;  %v8542_v42 = vld [vmem:[#allocation51_spill] sm:$0xff] }
 0x331   : > { %3620 = vmatmul.mubr.bf16.gmra.mxu1 %v7486_v57  ;;  %v1790_v5 = vmul.f32 0.01, %v1662_v55  ;;  %v1661_v48 = vadd.f32 %v6892_v15, %v1575_v46  ;;  %v1579_v2 = vmul.f32 %v6883_v12, %v7401_v32  ;;  %v1581_v1 = vmul.f32 %v6895_v16, %v7403_v33  ;;  %v8545_v46 = vld [vmem:[#allocation53_spill] sm:$0xff] }
 0x332   : > { %v8539_v0 = vcombine.low %v8532_v35, %v8533_v49  ;;  %v1847_v19 = vsel %vm1719_vm6, %v7416_v31, %v1783_v8  ;;  %v1848_v61 = vsel %vm1720_vm7, %v7419_v62, %v1784_v6  ;;  %vm1726_vm12 = vcmp.gt.f32.partialorder %v1662_v55, 0.0  ;;  %v8544_v8 = vld [vmem:[#allocation52_spill] sm:$0xff] }
 0x333   : > { %v1663_v25 = vadd.f32 %v6898_v17, %v1577_v41  ;;  %v8540_v32 = vcombine.low %v8536_v52, %v8537_v30  ;;  %v1850_v33 = vsel %vm1722_vm8, %v1658_v27, %v1786_v28  ;;  %v1664_v35 = vadd.f32 %v6874_v22, %v1578_v21  ;;  %v1386_v28 = vpop.f32.mrf.mxu0  ;;  %v1499_v30 = vpop.f32.mrf.mxu1 }
 0x334   : > { %3687 = vmatpush2.bf16.msra.mxu0 %v8539_v0  ;;  %v1582_v49 = vmul.f32 %v6863_v4, %v1380_v20  ;;  %v8543_v31 = vcombine.high %v8541_v18, %v8542_v42  ;;  %v8546_v62 = vcombine.high %v8544_v8, %v8545_v46  ;;  %v1849_v6 = vsel %vm1721_vm9, %v1657_v45, %v1785_v53  ;;  %v8550_v53 = vld [vmem:[#allocation55_spill] sm:$0xff] }
 0x335   : > { %3800 = vmatpush2.bf16.msra.mxu1 %v8540_v32  ;;  %v1851_v41 = vsel %vm1723_vm10, %v1659_v13, %v1787_v37  ;;  %v7534_v52 = vsel %vm1724_vm11, %v1660_v14, %v1788_v26  ;;  %v1666_v27 = vadd.f32 %v6880_v11, %v1580_v58  ;;  %v7537_v20 = vsel %vm1726_vm12, %v1662_v55, %v1790_v5  ;;  %v8549_v55 = vld [vmem:[#allocation54_spill] sm:$0xff] }
 0x336   : > { %3688 = vmatprep.subr.bf16.mxu0 %v8543_v31  ;;  %3801 = vmatprep.subr.bf16.mxu1 %v8546_v62  ;;  %v1789_v21 = vmul.f32 0.01, %v1661_v48  ;;  %v1665_v0 = vadd.f32 %v6892_v15, %v1579_v2  ;;  %v1667_v32 = vadd.f32 %v6898_v17, %v1581_v1  ;;  %v8547_v31 = vcombine.low %v8541_v18, %v8542_v42  ;;  %v8552_v2 = vld [vmem:[#allocation56_spill] sm:$0xff]  ;;  %v8553_v1 = vld [vmem:[#allocation57_spill] sm:$0xff]  ;;  %v1503_v62 = vpop.f32.mrf.mxu1 }
 0x337   : > { %vm1725_vm13 = vcmp.gt.f32.partialorder %v1661_v48, 0.0  ;;  %vm1727_vm14 = vcmp.gt.f32.partialorder %v1663_v25, 0.0  ;;  %v1791_v45 = vmul.f32 0.01, %v1663_v25  ;;  %v1584_v13 = vmul.f32 %v6877_v10, %v7437_v9 }
 0x338   : > { %3689 = vmatpush2.bf16.msra.mxu0 %v8547_v31  ;;  %v8548_v14 = vcombine.low %v8544_v8, %v8545_v46  ;;  %v8551_v37 = vcombine.high %v8549_v55, %v8550_v53  ;;  %vm1728_vm15 = vcmp.gt.f32.partialorder %v1664_v35, 0.0  ;;  %v1792_v26 = vmul.f32 0.01, %v1664_v35  ;;  %v1390_v46 = vpop.f32.mrf.mxu0 }
 0x339   : > { %v1668_v58 = vadd.f32 %v6874_v22, %v1582_v49  ;;  %v7553_v5 = vpack.c.bf16 %v1849_v6, %v1845_v38  ;;  %v8554_v18 = vcombine.high %v8552_v2, %v8553_v1  ;;  %vm1730_vm0 = vcmp.gt.f32.partialorder %v1666_v27, 0.0 }
 0x33a   : > { %3802 = vmatpush2.bf16.msra.mxu1 %v8548_v14  ;;  %3690 = vmatprep.subr.bf16.mxu0 %v8551_v37  ;;  %v1794_v9 = vmul.f32 0.01, %v1666_v27  ;;  %v7558_v42 = vpack.c.bf16 %v1851_v41, %v1847_v19  ;;  %v7561_v8 = vpack.c.bf16 %v1848_v61, %v7442_v54  ;;  %v1853_v31 = vsel %vm1725_vm13, %v1661_v48, %v1789_v21  ;;  %v8560_v37 = vld [vmem:[#allocation59_spill] sm:$0xff] }
 0x33b   : > { %3803 = vmatprep.subr.bf16.mxu1 %v8554_v18  ;;  %vm1729_vm1 = vcmp.gt.f32.partialorder %v1665_v0, 0.0  ;;  %v1793_v14 = vmul.f32 0.01, %v1665_v0  ;;  %3516 = vmatprep.mubr.bf16.mxu0 %v7553_v5  ;;  %v7566_v38 = vpack.c.bf16 %v1850_v33, %v7445_v34  ;;  %v8557_v49 = vcombine.low %v8549_v55, %v8550_v53  ;;  %v1505_v55 = vpop.f32.mrf.mxu1 }
 0x33c   : > { %8555 = vst [vmem:[#allocation33_spill] sm:$0xff] %v7561_v8  ;;  %vm1731_vm2 = vcmp.gt.f32.partialorder %v1667_v32, 0.0  ;;  %v1795_v19 = vmul.f32 0.01, %v1667_v32  ;;  %3629 = vmatprep.mubr.bf16.mxu1 %v7558_v42  ;;  %3517 = vmatmul.mubr.bf16.gmra.mxu0 %v7561_v8  ;;  %v1583_v54 = vmul.f32 %v6883_v12, %v7470_v43  ;;  %v1585_v48 = vmul.f32 %v6895_v16, %v7472_v63 }
 0x33d   : > { %8556 = vst [vmem:[#allocation34_spill] sm:$0xff] %v7566_v38  ;;  %3691 = vmatpush2.bf16.msra.mxu0 %v8557_v49  ;;  %v1796_v61 = vmul.f32 0.01, %v1668_v58  ;;  %v7578_v34 = vadd.f32 %v6880_v11, %v1584_v13  ;;  %3630 = vmatmul.mubr.bf16.gmra.mxu1 %v7566_v38  ;;  %v1586_v33 = vmul.f32 %v6863_v4, %v1384_v7  ;;  %vm1732_vm3 = vcmp.gt.f32.partialorder %v1668_v58, 0.0  ;;  %v1392_v13 = vpop.f32.mrf.mxu0 }
 0x33e   : > { %v1587_v6 = vmul.f32 %v6883_v12, %v1386_v28  ;;  %v1855_v41 = vsel %vm1727_vm14, %v1663_v25, %v1791_v45  ;;  %v1669_v21 = vadd.f32 %v6892_v15, %v1583_v54  ;;  %v1588_v43 = vmul.f32 %v6877_v10, %v7502_v40  ;;  %v8559_v45 = vld [vmem:[#allocation58_spill] sm:$0xff]  ;;  %v8563_v54 = vld [vmem:[#allocation61_spill] sm:$0xff] }
 0x33f   : > { %v8558_v63 = vcombine.low %v8552_v2, %v8553_v1  ;;  %v1856_v53 = vsel %vm1728_vm15, %v1664_v35, %v1792_v26  ;;  %v1671_v7 = vadd.f32 %v6898_v17, %v1585_v48  ;;  %v1589_v25 = vmul.f32 %v6895_v16, %v1499_v30  ;;  %v8562_v1 = vld [vmem:[#allocation60_spill] sm:$0xff] }
 0x340   : > { %v1673_v28 = vadd.f32 %v6892_v15, %v1587_v6  ;;  %v8561_v18 = vcombine.high %v8559_v45, %v8560_v37  ;;  %v1858_v40 = vsel %vm1730_vm0, %v1666_v27, %v1794_v9  ;;  %v1857_v49 = vsel %vm1729_vm1, %v1665_v0, %v1793_v14  ;;  %v8566_v0 = vld [vmem:[#allocation62_spill] sm:$0xff]  ;;  %v8567_v9 = vld [vmem:[#allocation63_spill] sm:$0xff] }
 0x341   : > { %3804 = vmatpush2.bf16.msra.mxu1 %v8558_v63  ;;  %v1859_v2 = vsel %vm1731_vm2, %v1667_v32, %v1795_v19  ;;  %v8564_v63 = vcombine.high %v8562_v1, %v8563_v54  ;;  %v8565_v35 = vcombine.low %v8559_v45, %v8560_v37  ;;  %v7607_v30 = vsel %vm1732_vm3, %v1668_v58, %v1796_v61  ;;  %v1394_v45 = vpop.f32.mrf.mxu0  ;;  %v1507_v58 = vpop.f32.mrf.mxu1 }
 0x342   : > { %3692 = vmatprep.subr.bf16.mxu0 %v8561_v18  ;;  %vm1734_vm4 = vcmp.gt.f32.partialorder %v7578_v34, 0.0  ;;  %v1798_v26 = vmul.f32 0.01, %v7578_v34  ;;  %v1672_v27 = vadd.f32 %v6874_v22, %v1586_v33  ;;  %v8568_v32 = vcombine.high %v8566_v0, %v8567_v9  ;;  %v8570_v18 = vld [vmem:[#allocation64_spill] sm:$0xff] }
 0x343   : > { %3805 = vmatprep.subr.bf16.mxu1 %v8564_v63  ;;  %3693 = vmatpush2.bf16.msra.mxu0 %v8565_v35  ;;  %v1797_v14 = vmul.f32 0.01, %v1669_v21  ;;  %v1674_v19 = vadd.f32 %v6880_v11, %v1588_v43  ;;  %v1590_v48 = vmul.f32 %v6863_v4, %v1390_v46  ;;  %v1592_v6 = vmul.f32 %v6877_v10, %v1503_v62  ;;  %v8571_v63 = vld [vmem:[#allocation65_spill] sm:$0xff] }
 0x344   : > { %3694 = vmatprep.subr.bf16.mxu0 %v8568_v32  ;;  %v8569_v61 = vcombine.low %v8562_v1, %v8563_v54  ;;  %vm1733_vm5 = vcmp.gt.f32.partialorder %v1669_v21, 0.0  ;;  %vm1735_vm6 = vcmp.gt.f32.partialorder %v1671_v7, 0.0  ;;  %v1801_v33 = vmul.f32 0.01, %v1673_v28 }
 0x345   : > { %v1675_v37 = vadd.f32 %v6898_v17, %v1589_v25  ;;  %v8572_v35 = vcombine.high %v8570_v18, %v8571_v63  ;;  %v1799_v43 = vmul.f32 0.01, %v1671_v7  ;;  %vm1737_vm7 = vcmp.gt.f32.partialorder %v1673_v28, 0.0  ;;  %v8575_v25 = vld [vmem:[#allocation67_spill] sm:$0xff] }
 0x346   : > { %3806 = vmatpush2.bf16.msra.mxu1 %v8569_v61  ;;  %v7625_v46 = vpack.c.bf16 %v1857_v49, %v1853_v31  ;;  %v7627_v62 = vpack.c.bf16 %v1859_v2, %v1855_v41  ;;  %v8573_v32 = vcombine.low %v8566_v0, %v8567_v9  ;;  %vm1736_vm8 = vcmp.gt.f32.partialorder %v1672_v27, 0.0  ;;  %v8574_v61 = vld [vmem:[#allocation66_spill] sm:$0xff]  ;;  %v1396_v49 = vpop.f32.mrf.mxu0  ;;  %v1509_v2 = vpop.f32.mrf.mxu1 }
 0x347   : > { %3807 = vmatprep.subr.bf16.mxu1 %v8572_v35  ;;  %v1800_v1 = vmul.f32 0.01, %v1672_v27  ;;  %vm1739_vm9 = vcmp.gt.f32.partialorder %v1675_v37, 0.0  ;;  %v1803_v54 = vmul.f32 0.01, %v1675_v37  ;;  %v8576_v38 = vcombine.high %v8574_v61, %v8575_v25 }
 0x348   : > { %3695 = vmatpush2.bf16.msra.mxu0 %v8573_v32  ;;  %v1861_v8 = vsel %vm1733_vm5, %v1669_v21, %v1797_v14  ;;  %v1802_v35 = vmul.f32 0.01, %v1674_v19  ;;  %3526 = vmatprep.mubr.bf16.mxu0 %v7625_v46  ;;  %v7638_v31 = vpack.c.bf16 %v1856_v53, %v7534_v52  ;;  %v7641_v41 = vpack.c.bf16 %v1858_v40, %v7537_v20  ;;  %v8578_v40 = vld [vmem:[#allocation68_spill] sm:$0xff] }
 0x349   : > { %3696 = vmatprep.subr.bf16.mxu0 %v8576_v38  ;;  %3639 = vmatprep.mubr.bf16.mxu1 %v7627_v62  ;;  %v1865_v0 = vsel %vm1737_vm7, %v1673_v28, %v1801_v33  ;;  %v1867_v9 = vsel %vm1739_vm9, %v1675_v37, %v1803_v54  ;;  %v1591_v32 = vmul.f32 %v6883_v12, %v1392_v13  ;;  %vm1738_vm10 = vcmp.gt.f32.partialorder %v1674_v19, 0.0  ;;  %v8579_v33 = vld [vmem:[#allocation69_spill] sm:$0xff] }
 0x34a   : > { %v1593_v38 = vmul.f32 %v6895_v16, %v1505_v55  ;;  %v8577_v21 = vcombine.low %v8570_v18, %v8571_v63  ;;  %v1863_v14 = vsel %vm1735_vm6, %v1671_v7, %v1799_v43  ;;  %3527 = vmatmul.mubr.bf16.gmra.mxu0 %v7638_v31  ;;  %3640 = vmatmul.mubr.bf16.gmra.mxu1 %v7641_v41  ;;  %v8584_v43 = vld [vmem:[#allocation71_spill] sm:$0xff] }
 0x34b   : > { %v1594_v52 = vmul.f32 %v6863_v4, %v1394_v45  ;;  %v1596_v20 = vmul.f32 %v6877_v10, %v1507_v58  ;;  %v1677_v53 = vadd.f32 %v6892_v15, %v1591_v32  ;;  %v1595_v55 = vmul.f32 %v6883_v12, %v1396_v49  ;;  %v8592_v32 = vld [vmem:[#allocation75_spill] sm:$0xff] }
 0x34c   : > { %3808 = vmatpush2.bf16.msra.mxu1 %v8577_v21  ;;  %v1679_v13 = vadd.f32 %v6898_v17, %v1593_v38  ;;  %v1597_v28 = vmul.f32 %v6895_v16, %v1509_v2  ;;  %v8580_v7 = vcombine.high %v8578_v40, %v8579_v33  ;;  %v7663_v63 = vpack.c.bf16 %v1865_v0, %v1861_v8  ;;  %v8583_v8 = vld [vmem:[#allocation70_spill] sm:$0xff] }
 0x34d   : > { %v1680_v37 = vadd.f32 %v6874_v22, %v1594_v52  ;;  %v1682_v18 = vadd.f32 %v6880_v11, %v1596_v20  ;;  %v7665_v4 = vpack.c.bf16 %v1867_v9, %v1863_v14  ;;  %v8581_v10 = vcombine.low %v8574_v61, %v8575_v25  ;;  %v8591_v9 = vld [vmem:[#allocation74_spill] sm:$0xff] }
 0x34e   : > { %3809 = vmatprep.subr.bf16.mxu1 %v8580_v7  ;;  %v1862_v12 = vsel %vm1734_vm4, %v7578_v34, %v1798_v26  ;;  %v1864_v16 = vsel %vm1736_vm8, %v1672_v27, %v1800_v1  ;;  %v1866_v45 = vsel %vm1738_vm10, %v1674_v19, %v1802_v35  ;;  %v8582_v58 = vcombine.low %v8578_v40, %v8579_v33  ;;  %v8586_v19 = vld [vmem:[#allocation72_spill] sm:$0xff]  ;;  %v8587_v1 = vld [vmem:[#allocation73_spill] sm:$0xff] }
 0x34f   : > { %3697 = vmatpush2.bf16.msra.mxu0 %v8581_v10  ;;  %v8585_v54 = vcombine.high %v8583_v8, %v8584_v43  ;;  %v1676_v49 = vadd.f32 %v6874_v22, %v1590_v48  ;;  %v1678_v61 = vadd.f32 %v6880_v11, %v1592_v6  ;;  %vm1741_vm11 = vcmp.gt.f32.partialorder %v1677_v53, 0.0  ;;  %3536 = vmatprep.mubr.bf16.mxu0 %v7663_v63  ;;  %v8595_v40 = vld [vmem:[#allocation77_spill] sm:$0xff] }
 0x350   : > { %3810 = vmatpush2.bf16.msra.mxu1 %v8582_v58  ;;  %v1805_v25 = vmul.f32 0.01, %v1677_v53  ;;  %3649 = vmatprep.mubr.bf16.mxu1 %v7665_v4  ;;  %vm1743_vm12 = vcmp.gt.f32.partialorder %v1679_v13, 0.0  ;;  %v1807_v34 = vmul.f32 0.01, %v1679_v13  ;;  %v1681_v26 = vadd.f32 %v6892_v15, %v1595_v55  ;;  %v8600_v58 = vld [vmem:[#allocation79_spill] sm:$0xff] }
 0x351   : > { %3698 = vmatprep.subr.bf16.mxu0 %v8585_v54  ;;  %v1683_v27 = vadd.f32 %v6898_v17, %v1597_v28  ;;  %v8588_v35 = vcombine.high %v8586_v19, %v8587_v1  ;;  %v1808_v2 = vmul.f32 0.01, %v1680_v37  ;;  %v1810_v22 = vmul.f32 0.01, %v1682_v18  ;;  %v8594_v28 = vld [vmem:[#allocation76_spill] sm:$0xff] }
 0x352   : > { %v7691_v11 = vpack.c.bf16 %v1864_v16, %v7607_v30  ;;  %v7693_v48 = vpack.c.bf16 %v1866_v45, %v1862_v12  ;;  %v8589_v6 = vcombine.low %v8583_v8, %v8584_v43  ;;  %vm1745_vm13 = vcmp.gt.f32.partialorder %v1681_v26, 0.0  ;;  %v8599_v45 = vld [vmem:[#allocation78_spill] sm:$0xff] }
 0x353   : > { %3811 = vmatprep.subr.bf16.mxu1 %v8588_v35  ;;  %v1809_v0 = vmul.f32 0.01, %v1681_v26  ;;  %vm1747_vm14 = vcmp.gt.f32.partialorder %v1683_v27, 0.0  ;;  %v1811_v15 = vmul.f32 0.01, %v1683_v27  ;;  %v8590_v17 = vcombine.low %v8586_v19, %v8587_v1  ;;  %v1962_v19 = vld [vmem:[#allocation11 + $0x1b0] sm:$0xff] }
 0x354   : > { %3699 = vmatpush2.bf16.msra.mxu0 %v8589_v6  ;;  %v8593_v38 = vcombine.high %v8591_v9, %v8592_v32  ;;  %v1804_v30 = vmul.f32 0.01, %v1676_v49  ;;  %v1806_v21 = vmul.f32 0.01, %v1678_v61  ;;  %vm1744_vm15 = vcmp.gt.f32.partialorder %v1680_v37, 0.0  ;;  %3650 = vmatmul.mubr.bf16.gmra.mxu1 %v7693_v48 }
 0x355   : > { %3812 = vmatpush2.bf16.msra.mxu1 %v8590_v17  ;;  %vm1746_vm0 = vcmp.gt.f32.partialorder %v1682_v18, 0.0  ;;  %3537 = vmatmul.mubr.bf16.gmra.mxu0 %v7691_v11  ;;  %v1869_v14 = vsel %vm1741_vm11, %v1677_v53, %v1805_v25  ;;  %v1871_v52 = vsel %vm1743_vm12, %v1679_v13, %v1807_v34  ;;  %v1873_v20 = vsel %vm1745_vm13, %v1681_v26, %v1809_v0  ;;  %v8602_v25 = vld [vmem:[#allocation80_spill] sm:$0xff]  ;;  %v8603_v34 = vld [vmem:[#allocation81_spill] sm:$0xff] }
 0x356   : > { %3700 = vmatprep.subr.bf16.mxu0 %v8593_v38  ;;  %v1875_v55 = vsel %vm1747_vm14, %v1683_v27, %v1811_v15  ;;  %v8596_v33 = vcombine.high %v8594_v28, %v8595_v40  ;;  %vm1740_vm1 = vcmp.gt.f32.partialorder %v1676_v49, 0.0  ;;  %vm1742_vm2 = vcmp.gt.f32.partialorder %v1678_v61, 0.0  ;;  %v1958_v27 = vld [vmem:[#allocation11 + $0x190] sm:$0xff] }
 0x357   : > { %v7711_v7 = vpack.c.bf16 %v1873_v20, %v1869_v14  ;;  %v7713_v10 = vpack.c.bf16 %v1875_v55, %v1871_v52  ;;  %v8597_v12 = vcombine.low %v8591_v9, %v8592_v32  ;;  %v1872_v16 = vsel %vm1744_vm15, %v1680_v37, %v1808_v2  ;;  %v1950_v2 = vld [vmem:[#allocation11 + $0x150] sm:$0xff]  ;;  %v8605_v9 = vld [vmem:[#allocation82_spill] sm:$0xff]  ;;  %v8606_v32 = vld [vmem:[#allocation83_spill] sm:$0xff] }
 0x358   : > { %3813 = vmatprep.subr.bf16.mxu1 %v8596_v33  ;;  %v1874_v53 = vsel %vm1746_vm0, %v1682_v18, %v1810_v22  ;;  %v8598_v13 = vcombine.low %v8594_v28, %v8595_v40  ;;  %v8601_v8 = vcombine.high %v8599_v45, %v8600_v58  ;;  %v1868_v43 = vsel %vm1740_vm1, %v1676_v49, %v1804_v30  ;;  %v2086_v49 = vld [vmem:[#allocation11 + $0x590] sm:$0xff] }
 0x359   : > { %3701 = vmatpush2.bf16.msra.mxu0 %v8597_v12  ;;  %3546 = vmatprep.mubr.bf16.mxu0 %v7711_v7  ;;  %v1870_v54 = vsel %vm1742_vm2, %v1678_v61, %v1806_v21  ;;  %v8604_v26 = vcombine.high %v8602_v25, %v8603_v34  ;;  %v7729_v37 = vpack.c.bf16 %v1872_v16, %v1868_v43  ;;  %v2090_v61 = vld [vmem:[#allocation11 + $0x5b0] sm:$0xff] }
 0x35a   : > { %3814 = vmatpush2.bf16.msra.mxu1 %v8598_v13  ;;  %3896 = vmatprep.subr.bf16.mxu0 %v8601_v8  ;;  %v7731_v18 = vpack.c.bf16 %v1874_v53, %v1870_v54  ;;  %v5598_v1 = vcombine.low %v8599_v45, %v8600_v58  ;;  %v5726_v35 = vcombine.low %v8602_v25, %v8603_v34  ;;  %v1954_v0 = vld [vmem:[#allocation11 + $0x170] sm:$0xff] }
 0x35b   : > { %3659 = vmatprep.mubr.bf16.mxu1 %v7713_v10  ;;  %4009 = vmatprep.subr.bf16.mxu1 %v8604_v26  ;;  %v5591_v22 = vcombine.high %v1958_v27, %v1962_v19  ;;  %v5719_v6 = vcombine.high %v2086_v49, %v2090_v61  ;;  %v2078_v15 = vld [vmem:[#allocation11 + $0x550] sm:$0xff]  ;;  %v5590_v38 = vcombine.low %v1958_v27, %v1962_v19 }
 0x35c   : > { %3660 = vmatmul.mubr.bf16.gmra.mxu1 %v7731_v18  ;;  %v2082_v17 = vld [vmem:[#allocation11 + $0x570] sm:$0xff]  ;;  %v5718_v30 = vcombine.low %v2086_v49, %v2090_v61  ;;  %v5583_v21 = vcombine.high %v1950_v2, %v1954_v0  ;;  %v5582_v40 = vcombine.low %v1950_v2, %v1954_v0 }
 0x35d   : > { %3547 = vmatmul.mubr.bf16.gmra.mxu0 %v7729_v37  ;;  %3815 = vmatprep.mubr.bf16.mxu1 %v7172_v23  ;;  %v5711_v14 = vcombine.high %v2078_v15, %v2082_v17  ;;  %v1942_v52 = vld [vmem:[#allocation11 + $0x110] sm:$0xff]  ;;  %v5710_v33 = vcombine.low %v2078_v15, %v2082_v17 }
 0x35e   : > { %3702 = vmatprep.mubr.bf16.mxu0 %v7170_v59  ;;  %v1946_v20 = vld [vmem:[#allocation11 + $0x130] sm:$0xff] }
 0x35f   : > { %v2070_v55 = vld [vmem:[#allocation11 + $0x510] sm:$0xff]  ;;  %v5575_v16 = vcombine.high %v1942_v52, %v1946_v20  ;;  %v5574_v8 = vcombine.low %v1942_v52, %v1946_v20 }
 0x360   : > { %v2074_v28 = vld [vmem:[#allocation11 + $0x530] sm:$0xff] }
 0x361   : > { %v1934_v12 = vld [vmem:[#allocation11 + $0xd0] sm:$0xff]  ;;  %v5703_v53 = vcombine.high %v2070_v55, %v2074_v28  ;;  %v5702_v43 = vcombine.low %v2070_v55, %v2074_v28 }
 0x362   : > { %v1938_v13 = vld [vmem:[#allocation11 + $0xf0] sm:$0xff] }
 0x363   : > { %v2062_v45 = vld [vmem:[#allocation11 + $0x4d0] sm:$0xff]  ;;  %v5567_v54 = vcombine.high %v1934_v12, %v1938_v13  ;;  %v5566_v49 = vcombine.low %v1934_v12, %v1938_v13 }
 0x364   : > { %3816 = vmatmul.mubr.bf16.vlgmr.msra.gmra.mxu1 %v8606_v32  ;;  %v2066_v58 = vld [vmem:[#allocation11 + $0x4f0] sm:$0xff] }
 0x365   : > { %3703 = vmatmul.mubr.bf16.vlgmr.msra.gmra.mxu0 %v8605_v9  ;;  %4010 = vmatpush1.bf16.msra.mxu1 %v5726_v35  ;;  %v5695_v25 = vcombine.high %v2062_v45, %v2066_v58  ;;  %v1926_v34 = vld [vmem:[#allocation11 + $0x90] sm:$0xff]  ;;  %v5694_v61 = vcombine.low %v2062_v45, %v2066_v58 }
 0x366   : > { %3897 = vmatpush1.bf16.msra.mxu0 %v5598_v1  ;;  %3712 = vmatprep.mubr.bf16.mxu0 %v7238_v24  ;;  %v1930_v26 = vld [vmem:[#allocation11 + $0xb0] sm:$0xff] }
 0x367   : > { %3825 = vmatprep.mubr.bf16.mxu1 %v7240_v56  ;;  %3898 = vmatprep.subr.bf16.mxu0 %v5591_v22  ;;  %v2054_v27 = vld [vmem:[#allocation11 + $0x490] sm:$0xff]  ;;  %v5559_v35 = vcombine.high %v1926_v34, %v1930_v26  ;;  %v5558_v15 = vcombine.low %v1926_v34, %v1930_v26 }
 0x368   : > { %4011 = vmatprep.subr.bf16.mxu1 %v5719_v6  ;;  %v2058_v19 = vld [vmem:[#allocation11 + $0x4b0] sm:$0xff] }
 0x369   : > { %4012 = vmatpush1.bf16.msra.mxu1 %v5718_v30  ;;  %v1918_v1 = vld [vmem:[#allocation11 + $0x50] sm:$0xff]  ;;  %v5687_v2 = vcombine.high %v2054_v27, %v2058_v19  ;;  %v5686_v17 = vcombine.low %v2054_v27, %v2058_v19 }
 0x36a   : > { %3899 = vmatpush1.bf16.msra.mxu0 %v5590_v38  ;;  %4013 = vmatprep.subr.bf16.mxu1 %v5711_v14  ;;  %v1922_v22 = vld [vmem:[#allocation11 + $0x70] sm:$0xff] }
 0x36b   : > { %3900 = vmatprep.subr.bf16.mxu0 %v5583_v21  ;;  %v2046_v6 = vld [vmem:[#allocation11 + $0x450] sm:$0xff]  ;;  %v5551_v38 = vcombine.high %v1918_v1, %v1922_v22  ;;  %v5550_v55 = vcombine.low %v1918_v1, %v1922_v22 }
 0x36c   : > { %3826 = vmatmul.mubr.bf16.gmra.mxu1 %v7279_v44  ;;  %v2050_v0 = vld [vmem:[#allocation11 + $0x470] sm:$0xff] }
 0x36d   : > { %3713 = vmatmul.mubr.bf16.gmra.mxu0 %v7276_v47  ;;  %4014 = vmatpush1.bf16.msra.mxu1 %v5710_v33  ;;  %v5679_v30 = vcombine.high %v2046_v6, %v2050_v0  ;;  %v1910_v21 = vld [vmem:[#allocation11 + $0x10] sm:$0xff]  ;;  %v5678_v28 = vcombine.low %v2046_v6, %v2050_v0  ;;  %v8607_v6 = vld [vmem:[#allocation33_spill] sm:$0xff]  ;;  %v8608_v0 = vld [vmem:[#allocation34_spill] sm:$0xff] }
 0x36e   : > { %3901 = vmatpush1.bf16.msra.mxu0 %v5582_v40  ;;  %3722 = vmatprep.mubr.bf16.mxu0 %v7359_v50  ;;  %v1914_v14 = vld [vmem:[#allocation11 + $0x30] sm:$0xff] }
 0x36f   : > { %3835 = vmatprep.mubr.bf16.mxu1 %v7362_v39  ;;  %3902 = vmatprep.subr.bf16.mxu0 %v5575_v16  ;;  %v2038_v52 = vld [vmem:[#allocation11 + $0x410] sm:$0xff]  ;;  %v5543_v33 = vcombine.high %v1910_v21, %v1914_v14  ;;  %v5542_v45 = vcombine.low %v1910_v21, %v1914_v14 }
 0x370   : > { %4015 = vmatprep.subr.bf16.mxu1 %v5703_v53  ;;  %v2042_v20 = vld [vmem:[#allocation11 + $0x430] sm:$0xff] }
 0x371   : > { %4016 = vmatpush1.bf16.msra.mxu1 %v5702_v43  ;;  %v2030_v40 = vld [vmem:[#allocation11 + $0x3d0] sm:$0xff]  ;;  %v5671_v12 = vcombine.high %v2038_v52, %v2042_v20  ;;  %v5670_v58 = vcombine.low %v2038_v52, %v2042_v20 }
 0x372   : > { %3903 = vmatpush1.bf16.msra.mxu0 %v5574_v8  ;;  %4017 = vmatprep.subr.bf16.mxu1 %v5695_v25  ;;  %v2034_v16 = vld [vmem:[#allocation11 + $0x3f0] sm:$0xff] }
 0x373   : > { %3904 = vmatprep.subr.bf16.mxu0 %v5567_v54  ;;  %v2158_v53 = vld [vmem:[#allocation11 + $0x7d0] sm:$0xff]  ;;  %v5663_v8 = vcombine.high %v2030_v40, %v2034_v16  ;;  %v5662_v27 = vcombine.low %v2030_v40, %v2034_v16 }
 0x374   : > { %3836 = vmatmul.mubr.bf16.gmra.mxu1 %v7385_v36  ;;  %v2162_v13 = vld [vmem:[#allocation11 + $0x7f0] sm:$0xff] }
 0x375   : > { %3723 = vmatmul.mubr.bf16.gmra.mxu0 %v7382_v60  ;;  %4018 = vmatpush1.bf16.msra.mxu1 %v5694_v61  ;;  %v5791_v43 = vcombine.high %v2158_v53, %v2162_v13  ;;  %v2022_v54 = vld [vmem:[#allocation11 + $0x390] sm:$0xff]  ;;  %v5790_v19 = vcombine.low %v2158_v53, %v2162_v13 }
 0x376   : > { %3905 = vmatpush1.bf16.msra.mxu0 %v5566_v49  ;;  %3732 = vmatprep.mubr.bf16.mxu0 %v7465_v51  ;;  %v2026_v25 = vld [vmem:[#allocation11 + $0x3b0] sm:$0xff] }
 0x377   : > { %3845 = vmatprep.mubr.bf16.mxu1 %v7475_v29  ;;  %3906 = vmatprep.subr.bf16.mxu0 %v5559_v35  ;;  %v2150_v34 = vld [vmem:[#allocation11 + $0x790] sm:$0xff]  ;;  %v5655_v61 = vcombine.high %v2022_v54, %v2026_v25 }
 0x378   : > { %4019 = vmatprep.subr.bf16.mxu1 %v5687_v2  ;;  %v2154_v26 = vld [vmem:[#allocation11 + $0x7b0] sm:$0xff] }
 0x379   : > { %4020 = vmatpush1.bf16.msra.mxu1 %v5686_v17  ;;  %v2014_v49 = vld [vmem:[#allocation11 + $0x350] sm:$0xff]  ;;  %v5783_v1 = vcombine.high %v2150_v34, %v2154_v26  ;;  %v5782_v17 = vcombine.low %v2150_v34, %v2154_v26 }
 0x37a   : > { %3907 = vmatpush1.bf16.msra.mxu0 %v5558_v15  ;;  %4021 = vmatprep.subr.bf16.mxu1 %v5679_v30  ;;  %v2018_v35 = vld [vmem:[#allocation11 + $0x370] sm:$0xff]  ;;  %v5654_v15 = vcombine.low %v2022_v54, %v2026_v25 }
 0x37b   : > { %3908 = vmatprep.subr.bf16.mxu0 %v5551_v38  ;;  %v2142_v2 = vld [vmem:[#allocation11 + $0x750] sm:$0xff]  ;;  %v5647_v38 = vcombine.high %v2014_v49, %v2018_v35 }
 0x37c   : > { %3846 = vmatmul.mubr.bf16.gmra.mxu1 %v7486_v57  ;;  %v2146_v22 = vld [vmem:[#allocation11 + $0x770] sm:$0xff] }
 0x37d   : > { %3733 = vmatmul.mubr.bf16.gmra.mxu0 %v7478_v3  ;;  %4022 = vmatpush1.bf16.msra.mxu1 %v5678_v28  ;;  %v5775_v30 = vcombine.high %v2142_v2, %v2146_v22  ;;  %v2006_v21 = vld [vmem:[#allocation11 + $0x310] sm:$0xff]  ;;  %v5774_v28 = vcombine.low %v2142_v2, %v2146_v22 }
 0x37e   : > { %3909 = vmatpush1.bf16.msra.mxu0 %v5550_v55  ;;  %3742 = vmatprep.mubr.bf16.mxu0 %v7553_v5  ;;  %v2010_v14 = vld [vmem:[#allocation11 + $0x330] sm:$0xff]  ;;  %v5646_v55 = vcombine.low %v2014_v49, %v2018_v35 }
 0x37f   : > { %3855 = vmatprep.mubr.bf16.mxu1 %v7558_v42  ;;  %3910 = vmatprep.subr.bf16.mxu0 %v5543_v33  ;;  %v2134_v52 = vld [vmem:[#allocation11 + $0x710] sm:$0xff]  ;;  %v5639_v33 = vcombine.high %v2006_v21, %v2010_v14 }
 0x380   : > { %4023 = vmatprep.subr.bf16.mxu1 %v5671_v12  ;;  %v2138_v20 = vld [vmem:[#allocation11 + $0x730] sm:$0xff] }
 0x381   : > { %4024 = vmatpush1.bf16.msra.mxu1 %v5670_v58  ;;  %v1998_v40 = vld [vmem:[#allocation11 + $0x2d0] sm:$0xff]  ;;  %v5767_v12 = vcombine.high %v2134_v52, %v2138_v20  ;;  %v5766_v58 = vcombine.low %v2134_v52, %v2138_v20 }
 0x382   : > { %3911 = vmatpush1.bf16.msra.mxu0 %v5542_v45  ;;  %4025 = vmatprep.subr.bf16.mxu1 %v5791_v43  ;;  %v2002_v16 = vld [vmem:[#allocation11 + $0x2f0] sm:$0xff]  ;;  %v5638_v45 = vcombine.low %v2006_v21, %v2010_v14 }
 0x383   : > { %3912 = vmatprep.subr.bf16.mxu0 %v5663_v8  ;;  %v2126_v53 = vld [vmem:[#allocation11 + $0x6d0] sm:$0xff]  ;;  %v5631_v8 = vcombine.high %v1998_v40, %v2002_v16 }
 0x384   : > { %3856 = vmatmul.mubr.bf16.gmra.mxu1 %v8608_v0  ;;  %v2130_v13 = vld [vmem:[#allocation11 + $0x6f0] sm:$0xff] }
 0x385   : > { %3743 = vmatmul.mubr.bf16.gmra.mxu0 %v8607_v6  ;;  %4026 = vmatpush2.bf16.msra.mxu1 %v5790_v19  ;;  %v5759_v43 = vcombine.high %v2126_v53, %v2130_v13  ;;  %v1990_v54 = vld [vmem:[#allocation11 + $0x290] sm:$0xff]  ;;  %v5758_v19 = vcombine.low %v2126_v53, %v2130_v13  ;;  %v2095_v53 = vld [vmem:[#allocation11 + $0x5d8] sm:$0xff] }
 0x386   : > { %3913 = vmatpush2.bf16.msra.mxu0 %v5662_v27  ;;  %3752 = vmatprep.mubr.bf16.mxu0 %v7625_v46  ;;  %v1994_v25 = vld [vmem:[#allocation11 + $0x2b0] sm:$0xff]  ;;  %v5630_v27 = vcombine.low %v1998_v40, %v2002_v16  ;;  %v1967_v40 = vld [vmem:[#allocation11 + $0x1d8] sm:$0xff] }
 0x387   : > { %3865 = vmatprep.mubr.bf16.mxu1 %v7627_v62  ;;  %3914 = vmatprep.subr.bf16.mxu0 %v5655_v61  ;;  %v2118_v34 = vld [vmem:[#allocation11 + $0x690] sm:$0xff]  ;;  %v5623_v61 = vcombine.high %v1990_v54, %v1994_v25  ;;  %v1971_v16 = vld [vmem:[#allocation11 + $0x1f8] sm:$0xff] }
 0x388   : > { %4027 = vmatprep.subr.bf16.mxu1 %v5783_v1  ;;  %v2122_v26 = vld [vmem:[#allocation11 + $0x6b0] sm:$0xff]  ;;  %v2099_v13 = vld [vmem:[#allocation11 + $0x5f8] sm:$0xff] }
 0x389   : > { %4028 = vmatpush2.bf16.msra.mxu1 %v5782_v17  ;;  %v1982_v49 = vld [vmem:[#allocation11 + $0x250] sm:$0xff]  ;;  %v5751_v1 = vcombine.high %v2118_v34, %v2122_v26  ;;  %v5750_v17 = vcombine.low %v2118_v34, %v2122_v26  ;;  %v2087_v34 = vld [vmem:[#allocation11 + $0x598] sm:$0xff] }
 0x38a   : > { %3915 = vmatpush2.bf16.msra.mxu0 %v5654_v15  ;;  %4029 = vmatprep.subr.bf16.mxu1 %v5775_v30  ;;  %v1986_v35 = vld [vmem:[#allocation11 + $0x270] sm:$0xff]  ;;  %v5622_v15 = vcombine.low %v1990_v54, %v1994_v25  ;;  %v1959_v54 = vld [vmem:[#allocation11 + $0x198] sm:$0xff] }
 0x38b   : > { %3916 = vmatprep.subr.bf16.mxu0 %v5647_v38  ;;  %v2110_v2 = vld [vmem:[#allocation11 + $0x650] sm:$0xff]  ;;  %v5615_v38 = vcombine.high %v1982_v49, %v1986_v35  ;;  %v1963_v25 = vld [vmem:[#allocation11 + $0x1b8] sm:$0xff] }
 0x38c   : > { %3866 = vmatmul.mubr.bf16.gmra.mxu1 %v7641_v41  ;;  %v2114_v22 = vld [vmem:[#allocation11 + $0x670] sm:$0xff]  ;;  %v2091_v26 = vld [vmem:[#allocation11 + $0x5b8] sm:$0xff] }
 0x38d   : > { %3753 = vmatmul.mubr.bf16.gmra.mxu0 %v7638_v31  ;;  %4030 = vmatpush2.bf16.msra.mxu1 %v5774_v28  ;;  %v5743_v30 = vcombine.high %v2110_v2, %v2114_v22  ;;  %v1974_v21 = vld [vmem:[#allocation11 + $0x210] sm:$0xff]  ;;  %v5742_v28 = vcombine.low %v2110_v2, %v2114_v22  ;;  %v2079_v2 = vld [vmem:[#allocation11 + $0x558] sm:$0xff] }
 0x38e   : > { %3917 = vmatpush2.bf16.msra.mxu0 %v5646_v55  ;;  %3762 = vmatprep.mubr.bf16.mxu0 %v7663_v63  ;;  %v1978_v14 = vld [vmem:[#allocation11 + $0x230] sm:$0xff]  ;;  %v5614_v55 = vcombine.low %v1982_v49, %v1986_v35  ;;  %v1951_v49 = vld [vmem:[#allocation11 + $0x158] sm:$0xff] }
 0x38f   : > { %3875 = vmatprep.mubr.bf16.mxu1 %v7665_v4  ;;  %3918 = vmatprep.subr.bf16.mxu0 %v5639_v33  ;;  %v2102_v52 = vld [vmem:[#allocation11 + $0x610] sm:$0xff]  ;;  %v5607_v33 = vcombine.high %v1974_v21, %v1978_v14  ;;  %v1955_v35 = vld [vmem:[#allocation11 + $0x178] sm:$0xff] }
 0x390   : > { %4031 = vmatprep.subr.bf16.mxu1 %v5767_v12  ;;  %v2106_v20 = vld [vmem:[#allocation11 + $0x630] sm:$0xff]  ;;  %v2083_v22 = vld [vmem:[#allocation11 + $0x578] sm:$0xff] }
 0x391   : > { %4032 = vmatpush2.bf16.msra.mxu1 %v5766_v58  ;;  %v5735_v12 = vcombine.high %v2102_v52, %v2106_v20  ;;  %v5734_v58 = vcombine.low %v2102_v52, %v2106_v20  ;;  %v2071_v52 = vld [vmem:[#allocation11 + $0x518] sm:$0xff] }
 0x392   : > { %3919 = vmatpush2.bf16.msra.mxu0 %v5638_v45  ;;  %4033 = vmatprep.subr.bf16.mxu1 %v5759_v43  ;;  %v5606_v45 = vcombine.low %v1974_v21, %v1978_v14  ;;  %v5729_v43 = vcombine.high %v2095_v53, %v2099_v13  ;;  %v1943_v21 = vld [vmem:[#allocation11 + $0x118] sm:$0xff] }
 0x393   : > { %3920 = vmatprep.subr.bf16.mxu0 %v5631_v8  ;;  %v5601_v8 = vcombine.high %v1967_v40, %v1971_v16  ;;  %v1947_v14 = vld [vmem:[#allocation11 + $0x138] sm:$0xff] }
 0x394   : > { %3876 = vmatmul.mubr.bf16.gmra.mxu1 %v7693_v48  ;;  %v2075_v20 = vld [vmem:[#allocation11 + $0x538] sm:$0xff] }
 0x395   : > { %3763 = vmatmul.mubr.bf16.gmra.mxu0 %v7691_v11  ;;  %4034 = vmatpush2.bf16.msra.mxu1 %v5758_v19  ;;  %v5728_v19 = vcombine.low %v2095_v53, %v2099_v13  ;;  %v2063_v53 = vld [vmem:[#allocation11 + $0x4d8] sm:$0xff] }
 0x396   : > { %3921 = vmatpush2.bf16.msra.mxu0 %v5630_v27  ;;  %3772 = vmatprep.mubr.bf16.mxu0 %v7711_v7  ;;  %v5600_v27 = vcombine.low %v1967_v40, %v1971_v16  ;;  %v1935_v40 = vld [vmem:[#allocation11 + $0xd8] sm:$0xff] }
 0x397   : > { %3885 = vmatprep.mubr.bf16.mxu1 %v7713_v10  ;;  %3922 = vmatprep.subr.bf16.mxu0 %v5623_v61  ;;  %v5593_v61 = vcombine.high %v1959_v54, %v1963_v25  ;;  %v1939_v16 = vld [vmem:[#allocation11 + $0xf8] sm:$0xff] }
 0x398   : > { %4035 = vmatprep.subr.bf16.mxu1 %v5751_v1  ;;  %v5721_v1 = vcombine.high %v2087_v34, %v2091_v26  ;;  %v2067_v13 = vld [vmem:[#allocation11 + $0x4f8] sm:$0xff] }
 0x399   : > { %4036 = vmatpush2.bf16.msra.mxu1 %v5750_v17  ;;  %v5720_v17 = vcombine.low %v2087_v34, %v2091_v26  ;;  %v2055_v34 = vld [vmem:[#allocation11 + $0x498] sm:$0xff] }
 0x39a   : > { %3923 = vmatpush2.bf16.msra.mxu0 %v5622_v15  ;;  %4037 = vmatprep.subr.bf16.mxu1 %v5743_v30  ;;  %v5592_v15 = vcombine.low %v1959_v54, %v1963_v25  ;;  %v5713_v30 = vcombine.high %v2079_v2, %v2083_v22  ;;  %v1927_v54 = vld [vmem:[#allocation11 + $0x98] sm:$0xff] }
 0x39b   : > { %3924 = vmatprep.subr.bf16.mxu0 %v5615_v38  ;;  %v5585_v38 = vcombine.high %v1951_v49, %v1955_v35  ;;  %v1931_v25 = vld [vmem:[#allocation11 + $0xb8] sm:$0xff] }
 0x39c   : > { %3886 = vmatmul.mubr.bf16.gmra.mxu1 %v7731_v18  ;;  %v2059_v26 = vld [vmem:[#allocation11 + $0x4b8] sm:$0xff] }
 0x39d   : > { %3773 = vmatmul.mubr.bf16.gmra.mxu0 %v7729_v37  ;;  %4038 = vmatpush2.bf16.msra.mxu1 %v5742_v28  ;;  %v5712_v28 = vcombine.low %v2079_v2, %v2083_v22  ;;  %v2047_v2 = vld [vmem:[#allocation11 + $0x458] sm:$0xff] }
 0x39e   : > { %3925 = vmatpush2.bf16.msra.mxu0 %v5614_v55  ;;  %3928 = vmatprep.mubr.bf16.mxu0 %v7170_v59  ;;  %v5584_v55 = vcombine.low %v1951_v49, %v1955_v35  ;;  %v1919_v49 = vld [vmem:[#allocation11 + $0x58] sm:$0xff] }
 0x39f   : > { %4041 = vmatprep.mubr.bf16.mxu1 %v7172_v23  ;;  %3926 = vmatprep.subr.bf16.mxu0 %v5607_v33  ;;  %v5577_v33 = vcombine.high %v1943_v21, %v1947_v14  ;;  %v1923_v35 = vld [vmem:[#allocation11 + $0x78] sm:$0xff] }
 0x3a0   : > { %4039 = vmatprep.subr.bf16.mxu1 %v5735_v12  ;;  %v5705_v12 = vcombine.high %v2071_v52, %v2075_v20  ;;  %v2051_v22 = vld [vmem:[#allocation11 + $0x478] sm:$0xff] }
 0x3a1   : > { %4040 = vmatpush2.bf16.msra.mxu1 %v5734_v58  ;;  %v5704_v58 = vcombine.low %v2071_v52, %v2075_v20  ;;  %v2039_v52 = vld [vmem:[#allocation11 + $0x418] sm:$0xff] }
 0x3a2   : > { %3927 = vmatpush2.bf16.msra.mxu0 %v5606_v45  ;;  %4235 = vmatprep.subr.bf16.mxu1 %v5729_v43  ;;  %v5576_v45 = vcombine.low %v1943_v21, %v1947_v14  ;;  %v5697_v43 = vcombine.high %v2063_v53, %v2067_v13  ;;  %v1911_v21 = vld [vmem:[#allocation11 + $0x18] sm:$0xff] }
 0x3a3   : > { %4122 = vmatprep.subr.bf16.mxu0 %v5601_v8  ;;  %v5569_v8 = vcombine.high %v1935_v40, %v1939_v16  ;;  %v1915_v14 = vld [vmem:[#allocation11 + $0x38] sm:$0xff] }
 0x3a4   : > { %4042 = vmatmul.mubr.bf16.vlgmr.msra.gmra.mxu1 %v8606_v32  ;;  %v2043_v20 = vld [vmem:[#allocation11 + $0x438] sm:$0xff] }
 0x3a5   : > { %3929 = vmatmul.mubr.bf16.vlgmr.msra.gmra.mxu0 %v8605_v9  ;;  %4236 = vmatpush1.bf16.msra.mxu1 %v5728_v19  ;;  %v5696_v19 = vcombine.low %v2063_v53, %v2067_v13  ;;  %v2159_v53 = vld [vmem:[#allocation11 + $0x7d8] sm:$0xff] }
 0x3a6   : > { %4123 = vmatpush1.bf16.msra.mxu0 %v5600_v27  ;;  %3938 = vmatprep.mubr.bf16.mxu0 %v7238_v24  ;;  %v5568_v27 = vcombine.low %v1935_v40, %v1939_v16  ;;  %v2031_v40 = vld [vmem:[#allocation11 + $0x3d8] sm:$0xff] }
 0x3a7   : > { %4051 = vmatprep.mubr.bf16.mxu1 %v7240_v56  ;;  %4124 = vmatprep.subr.bf16.mxu0 %v5593_v61  ;;  %v5561_v61 = vcombine.high %v1927_v54, %v1931_v25  ;;  %v2035_v16 = vld [vmem:[#allocation11 + $0x3f8] sm:$0xff] }
 0x3a8   : > { %4237 = vmatprep.subr.bf16.mxu1 %v5721_v1  ;;  %v5689_v1 = vcombine.high %v2055_v34, %v2059_v26  ;;  %v2163_v13 = vld [vmem:[#allocation11 + $0x7f8] sm:$0xff] }
 0x3a9   : > { %4238 = vmatpush1.bf16.msra.mxu1 %v5720_v17  ;;  %v5688_v17 = vcombine.low %v2055_v34, %v2059_v26  ;;  %v2151_v34 = vld [vmem:[#allocation11 + $0x798] sm:$0xff] }
 0x3aa   : > { %4125 = vmatpush1.bf16.msra.mxu0 %v5592_v15  ;;  %4239 = vmatprep.subr.bf16.mxu1 %v5713_v30  ;;  %v5560_v15 = vcombine.low %v1927_v54, %v1931_v25  ;;  %v5681_v30 = vcombine.high %v2047_v2, %v2051_v22  ;;  %v2023_v54 = vld [vmem:[#allocation11 + $0x398] sm:$0xff] }
 0x3ab   : > { %4126 = vmatprep.subr.bf16.mxu0 %v5585_v38  ;;  %v5553_v38 = vcombine.high %v1919_v49, %v1923_v35  ;;  %v2027_v25 = vld [vmem:[#allocation11 + $0x3b8] sm:$0xff] }
 0x3ac   : > { %4052 = vmatmul.mubr.bf16.gmra.mxu1 %v7279_v44  ;;  %v2155_v26 = vld [vmem:[#allocation11 + $0x7b8] sm:$0xff] }
 0x3ad   : > { %3939 = vmatmul.mubr.bf16.gmra.mxu0 %v7276_v47  ;;  %4240 = vmatpush1.bf16.msra.mxu1 %v5712_v28  ;;  %v5680_v28 = vcombine.low %v2047_v2, %v2051_v22  ;;  %v2143_v2 = vld [vmem:[#allocation11 + $0x758] sm:$0xff] }
 0x3ae   : > { %4127 = vmatpush1.bf16.msra.mxu0 %v5584_v55  ;;  %3948 = vmatprep.mubr.bf16.mxu0 %v7359_v50  ;;  %v5552_v55 = vcombine.low %v1919_v49, %v1923_v35  ;;  %v2015_v49 = vld [vmem:[#allocation11 + $0x358] sm:$0xff] }
 0x3af   : > { %4061 = vmatprep.mubr.bf16.mxu1 %v7362_v39  ;;  %4128 = vmatprep.subr.bf16.mxu0 %v5577_v33  ;;  %v5545_v33 = vcombine.high %v1911_v21, %v1915_v14  ;;  %v2019_v35 = vld [vmem:[#allocation11 + $0x378] sm:$0xff] }
 0x3b0   : > { %4241 = vmatprep.subr.bf16.mxu1 %v5705_v12  ;;  %v5673_v12 = vcombine.high %v2039_v52, %v2043_v20  ;;  %v2147_v22 = vld [vmem:[#allocation11 + $0x778] sm:$0xff] }
 0x3b1   : > { %4242 = vmatpush1.bf16.msra.mxu1 %v5704_v58  ;;  %v5672_v58 = vcombine.low %v2039_v52, %v2043_v20  ;;  %v2135_v52 = vld [vmem:[#allocation11 + $0x718] sm:$0xff] }
 0x3b2   : > { %4129 = vmatpush1.bf16.msra.mxu0 %v5576_v45  ;;  %4243 = vmatprep.subr.bf16.mxu1 %v5697_v43  ;;  %v5544_v45 = vcombine.low %v1911_v21, %v1915_v14  ;;  %v5793_v43 = vcombine.high %v2159_v53, %v2163_v13  ;;  %v2007_v21 = vld [vmem:[#allocation11 + $0x318] sm:$0xff] }
 0x3b3   : > { %4130 = vmatprep.subr.bf16.mxu0 %v5569_v8  ;;  %v5665_v8 = vcombine.high %v2031_v40, %v2035_v16  ;;  %v2011_v14 = vld [vmem:[#allocation11 + $0x338] sm:$0xff] }
 0x3b4   : > { %4062 = vmatmul.mubr.bf16.gmra.mxu1 %v7385_v36  ;;  %v2139_v20 = vld [vmem:[#allocation11 + $0x738] sm:$0xff] }
 0x3b5   : > { %3949 = vmatmul.mubr.bf16.gmra.mxu0 %v7382_v60  ;;  %4244 = vmatpush1.bf16.msra.mxu1 %v5696_v19  ;;  %v5792_v19 = vcombine.low %v2159_v53, %v2163_v13  ;;  %v2127_v53 = vld [vmem:[#allocation11 + $0x6d8] sm:$0xff] }
 0x3b6   : > { %4131 = vmatpush1.bf16.msra.mxu0 %v5568_v27  ;;  %3958 = vmatprep.mubr.bf16.mxu0 %v7465_v51  ;;  %v5664_v27 = vcombine.low %v2031_v40, %v2035_v16  ;;  %v1999_v40 = vld [vmem:[#allocation11 + $0x2d8] sm:$0xff] }
 0x3b7   : > { %4071 = vmatprep.mubr.bf16.mxu1 %v7475_v29  ;;  %4132 = vmatprep.subr.bf16.mxu0 %v5561_v61  ;;  %v5657_v61 = vcombine.high %v2023_v54, %v2027_v25  ;;  %v2003_v16 = vld [vmem:[#allocation11 + $0x2f8] sm:$0xff] }
 0x3b8   : > { %4245 = vmatprep.subr.bf16.mxu1 %v5689_v1  ;;  %v5785_v1 = vcombine.high %v2151_v34, %v2155_v26  ;;  %v2131_v13 = vld [vmem:[#allocation11 + $0x6f8] sm:$0xff] }
 0x3b9   : > { %4246 = vmatpush1.bf16.msra.mxu1 %v5688_v17  ;;  %v5784_v17 = vcombine.low %v2151_v34, %v2155_v26  ;;  %v2119_v34 = vld [vmem:[#allocation11 + $0x698] sm:$0xff] }
 0x3ba   : > { %4133 = vmatpush1.bf16.msra.mxu0 %v5560_v15  ;;  %4247 = vmatprep.subr.bf16.mxu1 %v5681_v30  ;;  %v5656_v15 = vcombine.low %v2023_v54, %v2027_v25  ;;  %v5777_v30 = vcombine.high %v2143_v2, %v2147_v22  ;;  %v1991_v54 = vld [vmem:[#allocation11 + $0x298] sm:$0xff] }
 0x3bb   : > { %4134 = vmatprep.subr.bf16.mxu0 %v5553_v38  ;;  %v5649_v38 = vcombine.high %v2015_v49, %v2019_v35  ;;  %v1995_v25 = vld [vmem:[#allocation11 + $0x2b8] sm:$0xff] }
 0x3bc   : > { %4072 = vmatmul.mubr.bf16.gmra.mxu1 %v7486_v57  ;;  %v2123_v26 = vld [vmem:[#allocation11 + $0x6b8] sm:$0xff] }
 0x3bd   : > { %3959 = vmatmul.mubr.bf16.gmra.mxu0 %v7478_v3  ;;  %4248 = vmatpush1.bf16.msra.mxu1 %v5680_v28  ;;  %v5776_v28 = vcombine.low %v2143_v2, %v2147_v22  ;;  %v5753_v2 = vcombine.high %v2119_v34, %v2123_v26  ;;  %v1987_v22 = vld [vmem:[#allocation11 + $0x278] sm:$0xff] }
 0x3be   : > { %4135 = vmatpush1.bf16.msra.mxu0 %v5552_v55  ;;  %3968 = vmatprep.mubr.bf16.mxu0 %v7553_v5  ;;  %v5648_v55 = vcombine.low %v2015_v49, %v2019_v35  ;;  %v5760_v49 = vcombine.low %v2127_v53, %v2131_v13  ;;  %v5625_v35 = vcombine.high %v1991_v54, %v1995_v25 }
 0x3bf   : > { %4081 = vmatprep.mubr.bf16.mxu1 %v7558_v42  ;;  %4136 = vmatprep.subr.bf16.mxu0 %v5545_v33  ;;  %v5641_v33 = vcombine.high %v2007_v21, %v2011_v14 }
 0x3c0   : > { %4249 = vmatprep.subr.bf16.mxu1 %v5673_v12  ;;  %v5769_v12 = vcombine.high %v2135_v52, %v2139_v20 }
 0x3c1   : > { %4250 = vmatpush1.bf16.msra.mxu1 %v5672_v58  ;;  %v5768_v58 = vcombine.low %v2135_v52, %v2139_v20  ;;  %v5752_v52 = vcombine.low %v2119_v34, %v2123_v26  ;;  %v1979_v26 = vld [vmem:[#allocation11 + $0x238] sm:$0xff] }
 0x3c2   : > { %4137 = vmatpush1.bf16.msra.mxu0 %v5544_v45  ;;  %4251 = vmatprep.subr.bf16.mxu1 %v5793_v43  ;;  %v5640_v45 = vcombine.low %v2007_v21, %v2011_v14  ;;  %v5761_v43 = vcombine.high %v2127_v53, %v2131_v13  ;;  %v5624_v14 = vcombine.low %v1991_v54, %v1995_v25 }
 0x3c3   : > { %4138 = vmatprep.subr.bf16.mxu0 %v5665_v8  ;;  %v5633_v8 = vcombine.high %v1999_v40, %v2003_v16 }
 0x3c4   : > { %4082 = vmatmul.mubr.bf16.gmra.mxu1 %v8608_v0 }
 0x3c5   : > { %3969 = vmatmul.mubr.bf16.gmra.mxu0 %v8607_v6  ;;  %4252 = vmatpush2.bf16.msra.mxu1 %v5792_v19  ;;  %v5632_v19 = vcombine.low %v1999_v40, %v2003_v16 }
 0x3c6   : > { %4139 = vmatpush2.bf16.msra.mxu0 %v5664_v27  ;;  %3978 = vmatprep.mubr.bf16.mxu0 %v7625_v46  ;;  %v7800_v27 = vld [vmem:[%s8282_s11] sm:$0xff]  ;;  %v3591_v20 = vpop.f32.mrf.mxu1 }
 0x3c7   : > { %4091 = vmatprep.mubr.bf16.mxu1 %v7627_v62  ;;  %4140 = vmatprep.subr.bf16.mxu0 %v5657_v61  ;;  %v1983_v61 = vld [vmem:[#allocation11 + $0x258] sm:$0xff] }
 0x3c8   : > { %4253 = vmatprep.subr.bf16.mxu1 %v5785_v1  ;;  %v7805_v1 = vld [vmem:[%s8283_s12] sm:$0xff]  ;;  %v5617_v16 = vcombine.high %v1983_v61, %v1987_v22  ;;  %v3593_v13 = vpop.f32.mrf.mxu1  ;;  %v5616_v25 = vcombine.low %v1983_v61, %v1987_v22 }
 0x3c9   : > { %4254 = vmatpush2.bf16.msra.mxu1 %v5784_v17  ;;  %v2115_v17 = vld [vmem:[#allocation11 + $0x678] sm:$0xff] }
 0x3ca   : > { %4141 = vmatpush2.bf16.msra.mxu0 %v5656_v15  ;;  %4255 = vmatprep.subr.bf16.mxu1 %v5777_v30  ;;  %v2111_v15 = vld [vmem:[#allocation11 + $0x658] sm:$0xff] }
 0x3cb   : > { %4142 = vmatprep.subr.bf16.mxu0 %v5649_v38  ;;  %v3478_v38 = vpop.f32.mrf.mxu0  ;;  %v8609_v30 = vld [vmem:[#allocation29_spill] sm:$0xff]  ;;  %v5745_v53 = vcombine.high %v2111_v15, %v2115_v17  ;;  %v5744_v34 = vcombine.low %v2111_v15, %v2115_v17 }
 0x3cc   : > { %4092 = vmatmul.mubr.bf16.gmra.mxu1 %v7641_v41  ;;  %v7809_v21 = vrot.slane %v7800_v27, %v8609_v30 }
 0x3cd   : > { %3979 = vmatmul.mubr.bf16.gmra.mxu0 %v7638_v31  ;;  %4256 = vmatpush2.bf16.msra.mxu1 %v5776_v28  ;;  %v7815_v28 = vrot.slane %v7805_v1, %v8609_v30  ;;  %v3480_v40 = vpop.f32.mrf.mxu0 }
 0x3ce   : > { %4143 = vmatpush2.bf16.msra.mxu0 %v5648_v55  ;;  %3988 = vmatprep.mubr.bf16.mxu0 %v7663_v63  ;;  %v3592_v55 = vadd.f32 %v3591_v20, %v3478_v38  ;;  %v3595_v38 = vpop.f32.mrf.mxu1 }
 0x3cf   : > { %4101 = vmatprep.mubr.bf16.mxu1 %v7665_v4  ;;  %4144 = vmatprep.subr.bf16.mxu0 %v5641_v33  ;;  %v8610_v33 = vld [vmem:[#allocation31_spill] sm:$0xff]  ;;  %v3482_v54 = vpop.f32.mrf.mxu0 }
 0x3d0   : > { %4257 = vmatprep.subr.bf16.mxu1 %v5769_v12  ;;  %v7819_v12 = vrot.slane %v7800_v27, %v8610_v33  ;;  %v3596_v30 = vadd.f32 %v3595_v38, %v3482_v54 }
 0x3d1   : > { %4258 = vmatpush2.bf16.msra.mxu1 %v5768_v58  ;;  %v4390_v58 = vmul.f32 %v7809_v21, %v3592_v55  ;;  %v3484_v20 = vpop.f32.mrf.mxu0  ;;  %v3597_v55 = vpop.f32.mrf.mxu1 }
 0x3d2   : > { %4145 = vmatpush2.bf16.msra.mxu0 %v5640_v45  ;;  %4259 = vmatprep.subr.bf16.mxu1 %v5761_v43  ;;  %v1975_v45 = vld [vmem:[#allocation11 + $0x218] sm:$0xff]  ;;  %v7826_v43 = vrot.slane %v7805_v1, %v8610_v33  ;;  %v4398_v22 = vmul.f32 %v7809_v21, %v3596_v30  ;;  %v3598_v15 = vadd.f32 %v3597_v55, %v3484_v20 }
 0x3d3   : > { %4146 = vmatprep.subr.bf16.mxu0 %v5633_v8  ;;  %v3594_v8 = vadd.f32 %v3593_v13, %v3480_v40  ;;  %v5609_v40 = vcombine.high %v1975_v45, %v1979_v26  ;;  %v5608_v17 = vcombine.low %v1975_v45, %v1979_v26 }
 0x3d4   : > { %4102 = vmatmul.mubr.bf16.gmra.mxu1 %v7693_v48  ;;  %v3601_v54 = vpop.f32.mrf.mxu1 }
 0x3d5   : > { %3989 = vmatmul.mubr.bf16.gmra.mxu0 %v7691_v11  ;;  %4260 = vmatpush2.bf16.msra.mxu1 %v5760_v49  ;;  %v2107_v49 = vld [vmem:[#allocation11 + $0x638] sm:$0xff] }
 0x3d6   : > { %4147 = vmatpush2.bf16.msra.mxu0 %v5632_v19  ;;  %3998 = vmatprep.mubr.bf16.mxu0 %v7711_v7  ;;  %v2103_v19 = vld [vmem:[#allocation11 + $0x618] sm:$0xff] }
 0x3d7   : > { %4111 = vmatprep.mubr.bf16.mxu1 %v7713_v10  ;;  %4148 = vmatprep.subr.bf16.mxu0 %v5625_v35  ;;  %v4560_v35 = vadd.f32 %v7815_v28, %v4390_v58  ;;  %v5737_v33 = vcombine.high %v2103_v19, %v2107_v49 }
 0x3d8   : > { %4261 = vmatprep.subr.bf16.mxu1 %v5753_v2  ;;  %v4391_v2 = vmul.f32 %v7819_v12, %v3594_v8  ;;  %v3488_v8 = vpop.f32.mrf.mxu0 }
 0x3d9   : > { %4262 = vmatpush2.bf16.msra.mxu1 %v5752_v52  ;;  %v4816_v52 = vmul.f32 0.01, %v4560_v35  ;;  %vm4688_vm3 = vcmp.gt.f32.partialorder %v4560_v35, 0.0 }
 0x3da   : > { %4149 = vmatpush2.bf16.msra.mxu0 %v5624_v14  ;;  %4263 = vmatprep.subr.bf16.mxu1 %v5745_v53  ;;  %v4561_v61 = vadd.f32 %v7826_v43, %v4391_v2  ;;  %v5736_v14 = vcombine.low %v2103_v19, %v2107_v49  ;;  %v4399_v53 = vmul.f32 %v7819_v12, %v3598_v15  ;;  %v3490_v26 = vpop.f32.mrf.mxu0 }
 0x3db   : > { %4150 = vmatprep.subr.bf16.mxu0 %v5617_v16  ;;  %v4568_v16 = vadd.f32 %v7815_v28, %v4398_v22 }
 0x3dc   : > { %4112 = vmatmul.mubr.bf16.gmra.mxu1 %v7731_v18  ;;  %v4817_v13 = vmul.f32 0.01, %v4561_v61  ;;  %vm4689_vm5 = vcmp.gt.f32.partialorder %v4561_v61, 0.0  ;;  %v4569_v45 = vadd.f32 %v7826_v43, %v4399_v53  ;;  %v3492_v20 = vpop.f32.mrf.mxu0 }
 0x3dd   : > { %3999 = vmatmul.mubr.bf16.gmra.mxu0 %v7729_v37  ;;  %4264 = vmatpush2.bf16.msra.mxu1 %v5744_v34  ;;  %vm4696_vm4 = vcmp.gt.f32.partialorder %v4568_v16, 0.0  ;;  %v4824_v58 = vmul.f32 0.01, %v4568_v16  ;;  %v4944_v34 = vsel %vm4688_vm3, %v4560_v35, %v4816_v52 }
 0x3de   : > { %4151 = vmatpush2.bf16.msra.mxu0 %v5616_v25  ;;  %4154 = vmatprep.mubr.bf16.mxu0 %v7170_v59  ;;  %v3602_v25 = vadd.f32 %v3601_v54, %v3488_v8  ;;  %vm4697_vm6 = vcmp.gt.f32.partialorder %v4569_v45, 0.0  ;;  %v4825_v49 = vmul.f32 0.01, %v4569_v45  ;;  %v4945_v2 = vsel %vm4689_vm5, %v4561_v61, %v4817_v13 }
 0x3df   : > { %4267 = vmatprep.mubr.bf16.mxu1 %v7172_v23  ;;  %4152 = vmatprep.subr.bf16.mxu0 %v5609_v40  ;;  %v4952_v59 = vsel %vm4696_vm4, %v4568_v16, %v4824_v58  ;;  %v3603_v23 = vpop.f32.mrf.mxu1 }
 0x3e0   : > { %4265 = vmatprep.subr.bf16.mxu1 %v5737_v33  ;;  %v5072_v19 = vmax.f32 %v4944_v34, %v4952_v59  ;;  %v4406_v38 = vmul.f32 %v7809_v21, %v3602_v25  ;;  %v3604_v30 = vadd.f32 %v3603_v23, %v3490_v26  ;;  %v4953_v40 = vsel %vm4697_vm6, %v4569_v45, %v4825_v49 }
 0x3e1   : > { %4266 = vmatpush2.bf16.msra.mxu1 %v5736_v14  ;;  %v3605_v55 = vpop.f32.mrf.mxu1  ;;  %v5093_v22 = vmax.f32 %v4945_v2, %v4953_v40 }
 0x3e2   : > { %4153 = vmatpush2.bf16.msra.mxu0 %v5608_v17  ;;  %v4576_v33 = vadd.f32 %v7815_v28, %v4406_v38  ;;  %v3606_v35 = vadd.f32 %v3605_v55, %v3492_v20  ;;  %v4407_v15 = vmul.f32 %v7819_v12, %v3604_v30  ;;  %v3494_v17 = vpop.f32.mrf.mxu0 }
 0x3e3   : > { %v3607_v61 = vpop.f32.mrf.mxu1 }
 0x3e4   : > { %4268 = vmatmul.mubr.bf16.vlgmr.msra.gmra.mxu1 %v8606_v32  ;;  %vm4704_vm7 = vcmp.gt.f32.partialorder %v4576_v33, 0.0  ;;  %v4832_v14 = vmul.f32 0.01, %v4576_v33  ;;  %v4414_v52 = vmul.f32 %v7809_v21, %v3606_v35  ;;  %v4577_v32 = vadd.f32 %v7826_v43, %v4407_v15  ;;  %v3498_v54 = vpop.f32.mrf.mxu0 }
 0x3e5   : > { %4155 = vmatmul.mubr.bf16.vlgmr.msra.gmra.mxu0 %v8605_v9  ;;  %4277 = vmatprep.mubr.bf16.mxu1 %v7240_v56  ;;  %v3608_v9 = vadd.f32 %v3607_v61, %v3494_v17  ;;  %v3611_v45 = vpop.f32.mrf.mxu1 }
 0x3e6   : > { %4164 = vmatprep.mubr.bf16.mxu0 %v7238_v24  ;;  %v4960_v16 = vsel %vm4704_vm7, %v4576_v33, %v4832_v14  ;;  %v4584_v53 = vadd.f32 %v7815_v28, %v4414_v52  ;;  %vm4705_vm8 = vcmp.gt.f32.partialorder %v4577_v32, 0.0  ;;  %v4833_v56 = vmul.f32 0.01, %v4577_v32  ;;  %v3500_v49 = vpop.f32.mrf.mxu0 }
 0x3e7   : > { %v4415_v13 = vmul.f32 %v7819_v12, %v3608_v9  ;;  %v5073_v24 = vmax.f32 %v5072_v19, %v4960_v16  ;;  %v3612_v34 = vadd.f32 %v3611_v45, %v3498_v54  ;;  %v3613_v19 = vpop.f32.mrf.mxu1 }
 0x3e8   : > { %vm4712_vm9 = vcmp.gt.f32.partialorder %v4584_v53, 0.0  ;;  %v4840_v58 = vmul.f32 0.01, %v4584_v53  ;;  %v4961_v25 = vsel %vm4705_vm8, %v4577_v32, %v4833_v56  ;;  %v3614_v30 = vadd.f32 %v3613_v19, %v3500_v49  ;;  %v3502_v55 = vpop.f32.mrf.mxu0 }
 0x3e9   : > { %v4585_v8 = vadd.f32 %v7826_v43, %v4415_v13  ;;  %v5094_v59 = vmax.f32 %v5093_v22, %v4961_v25  ;;  %v4422_v2 = vmul.f32 %v7809_v21, %v3612_v34  ;;  %v3615_v40 = vpop.f32.mrf.mxu1 }
 0x3ea   : > { %v4968_v26 = vsel %vm4712_vm9, %v4584_v53, %v4840_v58  ;;  %v4423_v33 = vmul.f32 %v7819_v12, %v3614_v30  ;;  %v3616_v35 = vadd.f32 %v3615_v40, %v3502_v55  ;;  %v3504_v22 = vpop.f32.mrf.mxu0 }
 0x3eb   : > { %vm4713_vm10 = vcmp.gt.f32.partialorder %v4585_v8, 0.0  ;;  %v4841_v23 = vmul.f32 0.01, %v4585_v8  ;;  %v5074_v38 = vmax.f32 %v5073_v24, %v4968_v26  ;;  %v3617_v15 = vpop.f32.mrf.mxu1 }
 0x3ec   : > { %4278 = vmatmul.mubr.bf16.gmra.mxu1 %v7279_v44  ;;  %v4592_v44 = vadd.f32 %v7815_v28, %v4422_v2  ;;  %v3618_v61 = vadd.f32 %v3617_v15, %v3504_v22 }
 0x3ed   : > { %4165 = vmatmul.mubr.bf16.gmra.mxu0 %v7276_v47  ;;  %4287 = vmatprep.mubr.bf16.mxu1 %v7362_v39  ;;  %v4969_v20 = vsel %vm4713_vm10, %v4585_v8, %v4841_v23  ;;  %v4430_v39 = vmul.f32 %v7809_v21, %v3616_v35 }
 0x3ee   : > { %4174 = vmatprep.mubr.bf16.mxu0 %v7359_v50  ;;  %v5095_v47 = vmax.f32 %v5094_v59, %v4969_v20  ;;  %vm4720_vm11 = vcmp.gt.f32.partialorder %v4592_v44, 0.0  ;;  %v4848_v17 = vmul.f32 0.01, %v4592_v44  ;;  %v4593_v50 = vadd.f32 %v7826_v43, %v4423_v33 }
 0x3ef   : > { %v4600_v9 = vadd.f32 %v7815_v28, %v4430_v39  ;;  %v4431_v16 = vmul.f32 %v7819_v12, %v3618_v61 }
 0x3f0   : > { %v4976_v14 = vsel %vm4720_vm11, %v4592_v44, %v4848_v17  ;;  %vm4721_vm12 = vcmp.gt.f32.partialorder %v4593_v50, 0.0  ;;  %v4849_v52 = vmul.f32 0.01, %v4593_v50  ;;  %v3508_v24 = vpop.f32.mrf.mxu0 }
 0x3f1   : > { %v5075_v32 = vmax.f32 %v5074_v38, %v4976_v14  ;;  %vm4728_vm13 = vcmp.gt.f32.partialorder %v4600_v9, 0.0  ;;  %v4856_v13 = vmul.f32 0.01, %v4600_v9  ;;  %v4601_v58 = vadd.f32 %v7826_v43, %v4431_v16  ;;  %v3621_v8 = vpop.f32.mrf.mxu1 }
 0x3f2   : > { %v4977_v53 = vsel %vm4721_vm12, %v4593_v50, %v4849_v52  ;;  %v3622_v45 = vadd.f32 %v3621_v8, %v3508_v24  ;;  %v3510_v25 = vpop.f32.mrf.mxu0 }
 0x3f3   : > { %v5096_v56 = vmax.f32 %v5095_v47, %v4977_v53  ;;  %v4984_v54 = vsel %vm4728_vm13, %v4600_v9, %v4856_v13  ;;  %vm4729_vm14 = vcmp.gt.f32.partialorder %v4601_v58, 0.0  ;;  %v3623_v34 = vpop.f32.mrf.mxu1 }
 0x3f4   : > { %4288 = vmatmul.mubr.bf16.gmra.mxu1 %v7385_v36  ;;  %v4857_v36 = vmul.f32 0.01, %v4601_v58  ;;  %v4438_v59 = vmul.f32 %v7809_v21, %v3622_v45  ;;  %v3512_v26 = vpop.f32.mrf.mxu0 }
 0x3f5   : > { %4175 = vmatmul.mubr.bf16.gmra.mxu0 %v7382_v60  ;;  %4297 = vmatprep.mubr.bf16.mxu1 %v7475_v29  ;;  %v5076_v60 = vmax.f32 %v5075_v32, %v4984_v54  ;;  %v3625_v23 = vpop.f32.mrf.mxu1 }
 0x3f6   : > { %4184 = vmatprep.mubr.bf16.mxu0 %v7465_v51  ;;  %v3624_v51 = vadd.f32 %v3623_v34, %v3510_v25  ;;  %v4985_v29 = vsel %vm4729_vm14, %v4601_v58, %v4857_v36  ;;  %v4608_v19 = vadd.f32 %v7815_v28, %v4438_v59  ;;  %v3626_v2 = vadd.f32 %v3625_v23, %v3512_v26  ;;  %v3514_v30 = vpop.f32.mrf.mxu0 }
 0x3f7   : > { %v5097_v49 = vmax.f32 %v5096_v56, %v4985_v29  ;;  %v3627_v20 = vpop.f32.mrf.mxu1 }
 0x3f8   : > { %v4439_v38 = vmul.f32 %v7819_v12, %v3624_v51  ;;  %vm4736_vm15 = vcmp.gt.f32.partialorder %v4608_v19, 0.0  ;;  %v4864_v55 = vmul.f32 0.01, %v4608_v19  ;;  %v4446_v47 = vmul.f32 %v7809_v21, %v3626_v2 }
 0x3f9   : > { %v3628_v44 = vadd.f32 %v3627_v20, %v3514_v30 }
 0x3fa   : > { %v4609_v40 = vadd.f32 %v7826_v43, %v4439_v38  ;;  %v4992_v33 = vsel %vm4736_vm15, %v4608_v19, %v4864_v55  ;;  %v4616_v22 = vadd.f32 %v7815_v28, %v4446_v47 }
 0x3fc   : > { %4298 = vmatmul.mubr.bf16.gmra.mxu1 %v7486_v57  ;;  %vm4737_vm0 = vcmp.gt.f32.partialorder %v4609_v40, 0.0  ;;  %v4865_v35 = vmul.f32 0.01, %v4609_v40  ;;  %v4447_v57 = vmul.f32 %v7819_v12, %v3628_v44  ;;  %v3518_v15 = vpop.f32.mrf.mxu0  ;;  %vm4744_vm1 = vcmp.gt.f32.partialorder %v4616_v22, 0.0 }
 0x3fd   : > { %4185 = vmatmul.mubr.bf16.gmra.mxu0 %v7478_v3  ;;  %4307 = vmatprep.mubr.bf16.mxu1 %v7558_v42  ;;  %v5077_v3 = vmax.f32 %v5076_v60, %v4992_v33  ;;  %v4872_v50 = vmul.f32 0.01, %v4616_v22 }
 0x3fe   : > { %4194 = vmatprep.mubr.bf16.mxu0 %v7553_v5  ;;  %v4993_v17 = vsel %vm4737_vm0, %v4609_v40, %v4865_v35  ;;  %v3631_v5 = vpop.f32.mrf.mxu1  ;;  %v4617_v42 = vadd.f32 %v7826_v43, %v4447_v57  ;;  %v3520_v14 = vpop.f32.mrf.mxu0 }
 0x3ff   : > { %v5098_v39 = vmax.f32 %v5097_v49, %v4993_v17  ;;  %v3632_v61 = vadd.f32 %v3631_v5, %v3518_v15  ;;  %v5000_v52 = vsel %vm4744_vm1, %v4616_v22, %v4872_v50 }
 0x400   : > { %v3633_v9 = vpop.f32.mrf.mxu1  ;;  %v5078_v32 = vmax.f32 %v5077_v3, %v5000_v52  ;;  %vm4745_vm2 = vcmp.gt.f32.partialorder %v4617_v42, 0.0  ;;  %v4873_v16 = vmul.f32 0.01, %v4617_v42  ;;  %v3522_v13 = vpop.f32.mrf.mxu0 }
 0x401   : > { %v4454_v53 = vmul.f32 %v7809_v21, %v3632_v61  ;;  %v3634_v24 = vadd.f32 %v3633_v9, %v3520_v14 }
 0x402   : > { %v3635_v56 = vpop.f32.mrf.mxu1  ;;  %v5001_v58 = vsel %vm4745_vm2, %v4617_v42, %v4873_v16  ;;  %v3524_v45 = vpop.f32.mrf.mxu0 }
 0x403   : > { %v4624_v8 = vadd.f32 %v7815_v28, %v4454_v53  ;;  %v3636_v54 = vadd.f32 %v3635_v56, %v3522_v13  ;;  %v5099_v25 = vmax.f32 %v5098_v39, %v5001_v58  ;;  %v4455_v60 = vmul.f32 %v7819_v12, %v3634_v24 }
 0x404   : > { %4308 = vmatmul.mubr.bf16.gmra.mxu1 %v8608_v0  ;;  %v3637_v36 = vpop.f32.mrf.mxu1 }
 0x405   : > { %4195 = vmatmul.mubr.bf16.gmra.mxu0 %v8607_v6  ;;  %4317 = vmatprep.mubr.bf16.mxu1 %v7627_v62  ;;  %vm4752_vm3 = vcmp.gt.f32.partialorder %v4624_v8, 0.0  ;;  %v4880_v6 = vmul.f32 0.01, %v4624_v8  ;;  %v4462_v0 = vmul.f32 %v7809_v21, %v3636_v54  ;;  %v3638_v34 = vadd.f32 %v3637_v36, %v3524_v45 }
 0x406   : > { %4204 = vmatprep.mubr.bf16.mxu0 %v7625_v46  ;;  %v4625_v46 = vadd.f32 %v7826_v43, %v4455_v60 }
 0x407   : > { %v5008_v59 = vsel %vm4752_vm3, %v4624_v8, %v4880_v6  ;;  %v4632_v62 = vadd.f32 %v7815_v28, %v4462_v0  ;;  %v4463_v51 = vmul.f32 %v7819_v12, %v3638_v34 }
 0x408   : > { %v5079_v26 = vmax.f32 %v5078_v32, %v5008_v59  ;;  %vm4753_vm4 = vcmp.gt.f32.partialorder %v4625_v46, 0.0  ;;  %v4881_v29 = vmul.f32 0.01, %v4625_v46 }
 0x409   : > { %vm4760_vm5 = vcmp.gt.f32.partialorder %v4632_v62, 0.0  ;;  %v4888_v23 = vmul.f32 0.01, %v4632_v62  ;;  %v4633_v49 = vadd.f32 %v7826_v43, %v4463_v51 }
 0x40a   : > { %v3528_v19 = vpop.f32.mrf.mxu0  ;;  %v3641_v38 = vpop.f32.mrf.mxu1  ;;  %v5009_v2 = vsel %vm4753_vm4, %v4625_v46, %v4881_v29 }
 0x40b   : > { %v3642_v30 = vadd.f32 %v3641_v38, %v3528_v19  ;;  %v5100_v20 = vmax.f32 %v5099_v25, %v5009_v2  ;;  %v5016_v55 = vsel %vm4760_vm5, %v4632_v62, %v4888_v23  ;;  %vm4761_vm6 = vcmp.gt.f32.partialorder %v4633_v49, 0.0 }
 0x40c   : > { %4318 = vmatmul.mubr.bf16.gmra.mxu1 %v7641_v41  ;;  %v4889_v40 = vmul.f32 0.01, %v4633_v49  ;;  %v3530_v47 = vpop.f32.mrf.mxu0  ;;  %v3643_v44 = vpop.f32.mrf.mxu1  ;;  %v5080_v33 = vmax.f32 %v5079_v26, %v5016_v55 }
 0x40d   : > { %4205 = vmatmul.mubr.bf16.gmra.mxu0 %v7638_v31  ;;  %4327 = vmatprep.mubr.bf16.mxu1 %v7665_v4  ;;  %v4470_v35 = vmul.f32 %v7809_v21, %v3642_v30  ;;  %v3644_v22 = vadd.f32 %v3643_v44, %v3530_v47 }
 0x40e   : > { %4214 = vmatprep.mubr.bf16.mxu0 %v7663_v63  ;;  %v5017_v3 = vsel %vm4761_vm6, %v4633_v49, %v4889_v40  ;;  %v3532_v31 = vpop.f32.mrf.mxu0  ;;  %v3645_v57 = vpop.f32.mrf.mxu1 }
 0x40f   : > { %v5101_v41 = vmax.f32 %v5100_v20, %v5017_v3  ;;  %v4640_v15 = vadd.f32 %v7815_v28, %v4470_v35  ;;  %v4471_v63 = vmul.f32 %v7819_v12, %v3644_v22  ;;  %v3646_v17 = vadd.f32 %v3645_v57, %v3532_v31 }
 0x410   : > { %v3534_v4 = vpop.f32.mrf.mxu0  ;;  %v3647_v50 = vpop.f32.mrf.mxu1 }
 0x411   : > { %vm4768_vm7 = vcmp.gt.f32.partialorder %v4640_v15, 0.0  ;;  %v4896_v5 = vmul.f32 0.01, %v4640_v15  ;;  %v4641_v39 = vadd.f32 %v7826_v43, %v4471_v63  ;;  %v4478_v42 = vmul.f32 %v7809_v21, %v3646_v17 }
 0x412   : > { %v3648_v61 = vadd.f32 %v3647_v50, %v3534_v4 }
 0x413   : > { %v5024_v9 = vsel %vm4768_vm7, %v4640_v15, %v4896_v5  ;;  %vm4769_vm8 = vcmp.gt.f32.partialorder %v4641_v39, 0.0  ;;  %v4897_v32 = vmul.f32 0.01, %v4641_v39  ;;  %v4648_v16 = vadd.f32 %v7815_v28, %v4478_v42 }
 0x414   : > { %v3651_v52 = vpop.f32.mrf.mxu1  ;;  %4328 = vmatmul.mubr.bf16.gmra.mxu1 %v7693_v48  ;;  %v5081_v53 = vmax.f32 %v5080_v33, %v5024_v9  ;;  %v4479_v13 = vmul.f32 %v7819_v12, %v3648_v61 }
 0x415   : > { %v3538_v14 = vpop.f32.mrf.mxu0  ;;  %4215 = vmatmul.mubr.bf16.gmra.mxu0 %v7691_v11  ;;  %4337 = vmatprep.mubr.bf16.mxu1 %v7713_v10  ;;  %v5025_v8 = vsel %vm4769_vm8, %v4641_v39, %v4897_v32  ;;  %vm4776_vm9 = vcmp.gt.f32.partialorder %v4648_v16, 0.0  ;;  %v4904_v11 = vmul.f32 0.01, %v4648_v16 }
 0x416   : > { %4224 = vmatprep.mubr.bf16.mxu0 %v7711_v7  ;;  %v3652_v24 = vadd.f32 %v3651_v52, %v3538_v14  ;;  %v3653_v58 = vpop.f32.mrf.mxu1  ;;  %v5102_v48 = vmax.f32 %v5101_v41, %v5025_v8  ;;  %v4649_v45 = vadd.f32 %v7826_v43, %v4479_v13  ;;  %v8611_v13 = vld [vmem:[#allocation30_spill] sm:$0xff] }
 0x417   : > { %v3540_v56 = vpop.f32.mrf.mxu0  ;;  %v5032_v7 = vsel %vm4776_vm9, %v4648_v16, %v4904_v11 }
 0x418   : > { %v3654_v54 = vadd.f32 %v3653_v58, %v3540_v56  ;;  %v4486_v25 = vmul.f32 %v7809_v21, %v3652_v24  ;;  %v3655_v36 = vpop.f32.mrf.mxu1  ;;  %v5082_v0 = vmax.f32 %v5081_v53, %v5032_v7  ;;  %vm4777_vm10 = vcmp.gt.f32.partialorder %v4649_v45, 0.0 }
 0x419   : > { %v3542_v60 = vpop.f32.mrf.mxu0  ;;  %v4905_v34 = vmul.f32 0.01, %v4649_v45  ;;  %v7923_v24 = vrot.slane %v7800_v27, %v8611_v13 }
 0x41a   : > { %v4487_v10 = vmul.f32 %v7819_v12, %v3654_v54  ;;  %v3656_v6 = vadd.f32 %v3655_v36, %v3542_v60  ;;  %v4656_v46 = vadd.f32 %v7815_v28, %v4486_v25  ;;  %v3657_v62 = vpop.f32.mrf.mxu1  ;;  %v8612_v60 = vld [vmem:[#allocation32_spill] sm:$0xff] }
 0x41b   : > { %v3544_v59 = vpop.f32.mrf.mxu0  ;;  %v5033_v23 = vsel %vm4777_vm10, %v4649_v45, %v4905_v34  ;;  %v7934_v36 = vrot.slane %v7800_v27, %v8612_v60 }
 0x41c   : > { %v4657_v51 = vadd.f32 %v7826_v43, %v4487_v10  ;;  %v4494_v26 = vmul.f32 %v7809_v21, %v3656_v6  ;;  %v3658_v29 = vadd.f32 %v3657_v62, %v3544_v59  ;;  %vm4784_vm11 = vcmp.gt.f32.partialorder %v4656_v46, 0.0  ;;  %v3661_v38 = vpop.f32.mrf.mxu1  ;;  %4338 = vmatmul.mubr.bf16.gmra.mxu1 %v7731_v18 }
 0x41d   : > { %v4912_v49 = vmul.f32 0.01, %v4656_v46  ;;  %v3548_v19 = vpop.f32.mrf.mxu0  ;;  %4225 = vmatmul.mubr.bf16.gmra.mxu0 %v7729_v37  ;;  %v5103_v2 = vmax.f32 %v5102_v48, %v5033_v23  ;;  %v7940_v62 = vrot.slane %v7805_v1, %v8612_v60 }
 0x41e   : > { %vm4785_vm12 = vcmp.gt.f32.partialorder %v4657_v51, 0.0  ;;  %v4913_v30 = vmul.f32 0.01, %v4657_v51  ;;  %v4664_v20 = vadd.f32 %v7815_v28, %v4494_v26  ;;  %v4495_v40 = vmul.f32 %v7819_v12, %v3658_v29  ;;  %v3663_v33 = vpop.f32.mrf.mxu1 }
 0x41f   : > { %v5040_v55 = vsel %vm4784_vm11, %v4656_v46, %v4912_v49  ;;  %v3662_v47 = vadd.f32 %v3661_v38, %v3548_v19  ;;  %v3550_v44 = vpop.f32.mrf.mxu0 }
 0x420   : > { %v5083_v35 = vmax.f32 %v5082_v0, %v5040_v55  ;;  %v5041_v22 = vsel %vm4785_vm12, %v4657_v51, %v4913_v30  ;;  %vm4792_vm13 = vcmp.gt.f32.partialorder %v4664_v20, 0.0  ;;  %v4920_v3 = vmul.f32 0.01, %v4664_v20  ;;  %v3665_v15 = vpop.f32.mrf.mxu1 }
 0x421   : > { %v5104_v31 = vmax.f32 %v5103_v2, %v5041_v22  ;;  %v4665_v37 = vadd.f32 %v7826_v43, %v4495_v40  ;;  %v4502_v18 = vmul.f32 %v7809_v21, %v3662_v47  ;;  %v3664_v57 = vadd.f32 %v3663_v33, %v3550_v44  ;;  %v3552_v41 = vpop.f32.mrf.mxu0 }
 0x422   : > { %v5048_v63 = vsel %vm4792_vm13, %v4664_v20, %v4920_v3  ;;  %v3666_v17 = vadd.f32 %v3665_v15, %v3552_v41  ;;  %v3667_v42 = vpop.f32.mrf.mxu1 }
 0x423   : > { %v5084_v4 = vmax.f32 %v5083_v35, %v5048_v63  ;;  %vm4793_vm14 = vcmp.gt.f32.partialorder %v4665_v37, 0.0  ;;  %v4921_v50 = vmul.f32 0.01, %v4665_v37  ;;  %v4672_v5 = vadd.f32 %v7815_v28, %v4502_v18  ;;  %v3554_v39 = vpop.f32.mrf.mxu0 }
 0x424   : > { %v4503_v61 = vmul.f32 %v7819_v12, %v3664_v57  ;;  %v4510_v14 = vmul.f32 %v7809_v21, %v3666_v17  ;;  %v3668_v52 = vadd.f32 %v3667_v42, %v3554_v39  ;;  %v3817_v53 = vpop.f32.mrf.mxu1  ;;  %v7930_v21 = vrot.slane %v7805_v1, %v8611_v13 }
 0x425   : > { %v5049_v9 = vsel %vm4793_vm14, %v4665_v37, %v4921_v50  ;;  %vm4800_vm15 = vcmp.gt.f32.partialorder %v4672_v5, 0.0  ;;  %v4928_v32 = vmul.f32 0.01, %v4672_v5  ;;  %v3704_v16 = vpop.f32.mrf.mxu0 }
 0x426   : > { %v5105_v56 = vmax.f32 %v5104_v31, %v5049_v9  ;;  %v4673_v58 = vadd.f32 %v7826_v43, %v4503_v61  ;;  %v4680_v8 = vadd.f32 %v7815_v28, %v4510_v14  ;;  %v4511_v11 = vmul.f32 %v7819_v12, %v3668_v52  ;;  %v3819_v25 = vpop.f32.mrf.mxu1 }
 0x427   : > { %v5056_v54 = vsel %vm4800_vm15, %v4672_v5, %v4928_v32  ;;  %v3818_v48 = vadd.f32 %v3817_v53, %v3704_v16  ;;  %v3706_v45 = vpop.f32.mrf.mxu0 }
 0x428   : > { %v5085_v7 = vmax.f32 %v5084_v4, %v5056_v54  ;;  %vm4801_vm0 = vcmp.gt.f32.partialorder %v4673_v58, 0.0  ;;  %v4929_v10 = vmul.f32 0.01, %v4673_v58  ;;  %vm4808_vm1 = vcmp.gt.f32.partialorder %v4680_v8, 0.0  ;;  %v3821_v46 = vpop.f32.mrf.mxu1 }
 0x429   : > { %v4936_v6 = vmul.f32 0.01, %v4680_v8  ;;  %v4681_v28 = vadd.f32 %v7826_v43, %v4511_v11  ;;  %v4392_v12 = vmul.f32 %v7923_v24, %v3818_v48  ;;  %v3820_v0 = vadd.f32 %v3819_v25, %v3706_v45  ;;  %v3708_v34 = vpop.f32.mrf.mxu0 }
 0x42a   : > { %v5057_v59 = vsel %vm4801_vm0, %v4673_v58, %v4929_v10  ;;  %v3822_v51 = vadd.f32 %v3821_v46, %v3708_v34  ;;  %v3823_v49 = vpop.f32.mrf.mxu1 }
 0x42b   : > { %v5106_v27 = vmax.f32 %v5105_v56, %v5057_v59  ;;  %v5064_v26 = vsel %vm4808_vm1, %v4680_v8, %v4936_v6  ;;  %vm4809_vm2 = vcmp.gt.f32.partialorder %v4681_v28, 0.0  ;;  %v4937_v29 = vmul.f32 0.01, %v4681_v28  ;;  %v3710_v23 = vpop.f32.mrf.mxu0 }
 0x42c   : > { %v5086_v19 = vmax.f32 %v5085_v7, %v5064_v26  ;;  %v4562_v43 = vadd.f32 %v7930_v21, %v4392_v12  ;;  %v4393_v38 = vmul.f32 %v7934_v36, %v3820_v0  ;;  %v4400_v2 = vmul.f32 %v7923_v24, %v3822_v51  ;;  %v3827_v40 = vpop.f32.mrf.mxu1 }
 0x42d   : > { %v5065_v30 = vsel %vm4809_vm2, %v4681_v28, %v4937_v29  ;;  %v3824_v20 = vadd.f32 %v3823_v49, %v3710_v23  ;;  %v3714_v55 = vpop.f32.mrf.mxu0 }
 0x42e   : > { %v5087_v1 = vrot.slane %v5086_v19, 4  ;;  %v5107_v47 = vmax.f32 %v5106_v27, %v5065_v30  ;;  %v4818_v44 = vmul.f32 0.01, %v4562_v43  ;;  %v4563_v33 = vadd.f32 %v7940_v62, %v4393_v38  ;;  %v3829_v37 = vpop.f32.mrf.mxu1 }
 0x42f   : > { %v4570_v35 = vadd.f32 %v7930_v21, %v4400_v2  ;;  %v4401_v22 = vmul.f32 %v7934_v36, %v3824_v20  ;;  %v3828_v3 = vadd.f32 %v3827_v40, %v3714_v55  ;;  %v3716_v31 = vpop.f32.mrf.mxu0  ;;  %vm4690_vm3 = vcmp.gt.f32.partialorder %v4562_v43, 0.0 }
 0x430   : > { %v5088_v18 = vmax.f32 %v5086_v19, %v5087_v1  ;;  %v5108_v57 = vrot.slane %v5107_v47, 4  ;;  %v3830_v41 = vadd.f32 %v3829_v37, %v3716_v31  ;;  %vm4691_vm4 = vcmp.gt.f32.partialorder %v4563_v33, 0.0  ;;  %v3831_v4 = vpop.f32.mrf.mxu1 }
 0x431   : > { %v4819_v15 = vmul.f32 0.01, %v4563_v33  ;;  %vm4698_vm5 = vcmp.gt.f32.partialorder %v4570_v35, 0.0  ;;  %v4826_v63 = vmul.f32 0.01, %v4570_v35  ;;  %v3718_v17 = vpop.f32.mrf.mxu0  ;;  %v4571_v39 = vadd.f32 %v7940_v62, %v4401_v22 }
 0x432   : > { %v5089_v50 = vrot.slane %v5088_v18, 2  ;;  %v5109_v5 = vmax.f32 %v5107_v47, %v5108_v57  ;;  %v4408_v42 = vmul.f32 %v7923_v24, %v3828_v3  ;;  %v4946_v61 = vsel %vm4690_vm3, %v4562_v43, %v4818_v44  ;;  %v3833_v16 = vpop.f32.mrf.mxu1 }
 0x433   : > { %v4954_v14 = vsel %vm4698_vm5, %v4570_v35, %v4826_v63  ;;  %v4409_v52 = vmul.f32 %v7934_v36, %v3830_v41  ;;  %v3832_v9 = vadd.f32 %v3831_v4, %v3718_v17  ;;  %v3720_v32 = vpop.f32.mrf.mxu0  ;;  %v4947_v13 = vsel %vm4691_vm4, %v4563_v33, %v4819_v15 }
 0x434   : > { %v5110_v53 = vrot.slane %v5109_v5, 2  ;;  %v5114_v56 = vmax.f32 %v4946_v61, %v4954_v14  ;;  %vm4699_vm6 = vcmp.gt.f32.partialorder %v4571_v39, 0.0  ;;  %v4827_v58 = vmul.f32 0.01, %v4571_v39  ;;  %v3837_v45 = vpop.f32.mrf.mxu1 }
 0x435   : > { %v4578_v8 = vadd.f32 %v7930_v21, %v4408_v42  ;;  %v4579_v11 = vadd.f32 %v7940_v62, %v4409_v52  ;;  %v4416_v54 = vmul.f32 %v7923_v24, %v3832_v9  ;;  %v3724_v48 = vpop.f32.mrf.mxu0  ;;  %v5090_v25 = vmax.f32 %v5088_v18, %v5089_v50 }
 0x436   : > { %v5111_v60 = vmax.f32 %v5109_v5, %v5110_v53  ;;  %v3834_v7 = vadd.f32 %v3833_v16, %v3720_v32  ;;  %v3838_v10 = vadd.f32 %v3837_v45, %v3724_v48  ;;  %v4955_v6 = vsel %vm4699_vm6, %v4571_v39, %v4827_v58  ;;  %v3839_v0 = vpop.f32.mrf.mxu1 }
 0x437   : > { %vm4706_vm7 = vcmp.gt.f32.partialorder %v4578_v8, 0.0  ;;  %v4834_v28 = vmul.f32 0.01, %v4578_v8  ;;  %vm4707_vm8 = vcmp.gt.f32.partialorder %v4579_v11, 0.0  ;;  %v3726_v12 = vpop.f32.mrf.mxu0  ;;  %v5135_v46 = vmax.f32 %v4947_v13, %v4955_v6 }
 0x438   : > { %v5112_v34 = vrot.slane %v5111_v60, 1  ;;  %v4835_v59 = vmul.f32 0.01, %v4579_v11  ;;  %v4586_v27 = vadd.f32 %v7930_v21, %v4416_v54  ;;  %v4417_v26 = vmul.f32 %v7934_v36, %v3834_v7  ;;  %v3841_v49 = vpop.f32.mrf.mxu1 }
 0x439   : > { %v4962_v51 = vsel %vm4706_vm7, %v4578_v8, %v4834_v28  ;;  %v4424_v29 = vmul.f32 %v7923_v24, %v3838_v10  ;;  %v3728_v23 = vpop.f32.mrf.mxu0  ;;  %v5091_v19 = vrot.slane %v5090_v25, 1  ;;  %v3840_v2 = vadd.f32 %v3839_v0, %v3726_v12 }
 0x43a   : > { %v5115_v43 = vmax.f32 %v5114_v56, %v4962_v51  ;;  %v4963_v38 = vsel %vm4707_vm8, %v4579_v11, %v4835_v59  ;;  %vm4714_vm9 = vcmp.gt.f32.partialorder %v4586_v27, 0.0  ;;  %v4842_v20 = vmul.f32 0.01, %v4586_v27  ;;  %v3843_v1 = vpop.f32.mrf.mxu1 }
 0x43b   : > { %v5136_v30 = vmax.f32 %v5135_v46, %v4963_v38  ;;  %v4587_v55 = vadd.f32 %v7940_v62, %v4417_v26  ;;  %v3730_v40 = vpop.f32.mrf.mxu0  ;;  %v4594_v47 = vadd.f32 %v7930_v21, %v4424_v29  ;;  %v4425_v44 = vmul.f32 %v7934_v36, %v3840_v2 }
 0x43c   : > { %v3842_v33 = vadd.f32 %v3841_v49, %v3728_v23  ;;  %v3844_v35 = vadd.f32 %v3843_v1, %v3730_v40  ;;  %v7961_v22 = vmax.f32 %v5111_v60, %v5112_v34  ;;  %v4970_v3 = vsel %vm4714_vm9, %v4586_v27, %v4842_v20  ;;  %v3847_v18 = vpop.f32.mrf.mxu1 }
 0x43d   : > { %vm4715_vm10 = vcmp.gt.f32.partialorder %v4587_v55, 0.0  ;;  %v4843_v31 = vmul.f32 0.01, %v4587_v55  ;;  %v3734_v37 = vpop.f32.mrf.mxu0  ;;  %v5116_v57 = vmax.f32 %v5115_v43, %v4970_v3  ;;  %vm4722_vm11 = vcmp.gt.f32.partialorder %v4594_v47, 0.0 }
 0x43e   : > { %v4850_v41 = vmul.f32 0.01, %v4594_v47  ;;  %v4595_v15 = vadd.f32 %v7940_v62, %v4425_v44  ;;  %v4432_v17 = vmul.f32 %v7923_v24, %v3842_v33  ;;  %v4433_v4 = vmul.f32 %v7934_v36, %v3844_v35  ;;  %v3849_v39 = vpop.f32.mrf.mxu1 }
 0x43f   : > { %v4971_v63 = vsel %vm4715_vm10, %v4587_v55, %v4843_v31  ;;  %v3848_v50 = vadd.f32 %v3847_v18, %v3734_v37  ;;  %v3736_v5 = vpop.f32.mrf.mxu0  ;;  %v7969_v56 = vmax.f32 %v5090_v25, %v5091_v19 }
 0x440   : > { %v5137_v42 = vmax.f32 %v5136_v30, %v4971_v63  ;;  %v4978_v61 = vsel %vm4722_vm11, %v4594_v47, %v4850_v41  ;;  %vm4723_vm12 = vcmp.gt.f32.partialorder %v4595_v15, 0.0  ;;  %v4851_v14 = vmul.f32 0.01, %v4595_v15  ;;  %v3851_v13 = vpop.f32.mrf.mxu1 }
 0x441   : > { %v5117_v52 = vmax.f32 %v5116_v57, %v4978_v61  ;;  %v4602_v9 = vadd.f32 %v7930_v21, %v4432_v17  ;;  %v4603_v32 = vadd.f32 %v7940_v62, %v4433_v4  ;;  %v4440_v16 = vmul.f32 %v7923_v24, %v3848_v50  ;;  %v3738_v53 = vpop.f32.mrf.mxu0 }
 0x442   : > { %v4979_v58 = vsel %vm4723_vm12, %v4595_v15, %v4851_v14  ;;  %v3850_v8 = vadd.f32 %v3849_v39, %v3736_v5  ;;  %v3852_v11 = vadd.f32 %v3851_v13, %v3738_v53  ;;  %v3853_v60 = vpop.f32.mrf.mxu1  ;;  %v5249_v46 = vcombine.low %v7969_v56, %v7961_v22 }
 0x443   : > { %v5138_v54 = vmax.f32 %v5137_v42, %v4979_v58  ;;  %vm4730_vm13 = vcmp.gt.f32.partialorder %v4602_v9, 0.0  ;;  %v4858_v48 = vmul.f32 0.01, %v4602_v9  ;;  %vm4731_vm14 = vcmp.gt.f32.partialorder %v4603_v32, 0.0  ;;  %v3740_v45 = vpop.f32.mrf.mxu0 }
 0x444   : > { %v4859_v7 = vmul.f32 0.01, %v4603_v32  ;;  %v4610_v10 = vadd.f32 %v7930_v21, %v4440_v16  ;;  %v4441_v6 = vmul.f32 %v7934_v36, %v3850_v8  ;;  %v4448_v28 = vmul.f32 %v7923_v24, %v3852_v11  ;;  %v3857_v34 = vpop.f32.mrf.mxu1 }
 0x445   : > { %v4986_v12 = vsel %vm4730_vm13, %v4602_v9, %v4858_v48  ;;  %v3854_v0 = vadd.f32 %v3853_v60, %v3740_v45  ;;  %v3744_v25 = vpop.f32.mrf.mxu0 }
 0x446   : > { %v5118_v59 = vmax.f32 %v5117_v52, %v4986_v12  ;;  %v4987_v51 = vsel %vm4731_vm14, %v4603_v32, %v4859_v7  ;;  %vm4738_vm15 = vcmp.gt.f32.partialorder %v4610_v10, 0.0  ;;  %v4866_v27 = vmul.f32 0.01, %v4610_v10  ;;  %v3859_v43 = vpop.f32.mrf.mxu1 }
 0x447   : > { %v5139_v26 = vmax.f32 %v5138_v54, %v4987_v51  ;;  %v4611_v29 = vadd.f32 %v7940_v62, %v4441_v6  ;;  %v4618_v23 = vadd.f32 %v7930_v21, %v4448_v28  ;;  %v4449_v49 = vmul.f32 %v7934_v36, %v3854_v0  ;;  %v3746_v19 = vpop.f32.mrf.mxu0 }
 0x448   : > { %v4994_v38 = vsel %vm4738_vm15, %v4610_v10, %v4866_v27  ;;  %v3858_v2 = vadd.f32 %v3857_v34, %v3744_v25  ;;  %v3860_v30 = vadd.f32 %v3859_v43, %v3746_v19  ;;  %v3861_v1 = vpop.f32.mrf.mxu1 }
 0x449   : > { %v5119_v20 = vmax.f32 %v5118_v59, %v4994_v38  ;;  %vm4739_vm0 = vcmp.gt.f32.partialorder %v4611_v29, 0.0  ;;  %v4867_v55 = vmul.f32 0.01, %v4611_v29  ;;  %vm4746_vm1 = vcmp.gt.f32.partialorder %v4618_v23, 0.0  ;;  %v3748_v40 = vpop.f32.mrf.mxu0 }
 0x44a   : > { %v4874_v47 = vmul.f32 0.01, %v4618_v23  ;;  %v4619_v44 = vadd.f32 %v7940_v62, %v4449_v49  ;;  %v4456_v33 = vmul.f32 %v7923_v24, %v3858_v2  ;;  %v4457_v35 = vmul.f32 %v7934_v36, %v3860_v30  ;;  %v3863_v18 = vpop.f32.mrf.mxu1 }
 0x44b   : > { %v4995_v3 = vsel %vm4739_vm0, %v4611_v29, %v4867_v55  ;;  %v3862_v31 = vadd.f32 %v3861_v1, %v3748_v40  ;;  %v3750_v37 = vpop.f32.mrf.mxu0  ;;  %v6343_v1 = vmov 1966171168  }
 0x44c   : > { %v5140_v57 = vmax.f32 %v5139_v26, %v4995_v3  ;;  %v5002_v41 = vsel %vm4746_vm1, %v4618_v23, %v4874_v47  ;;  %vm4747_vm2 = vcmp.gt.f32.partialorder %v4619_v44, 0.0  ;;  %v4875_v15 = vmul.f32 0.01, %v4619_v44  ;;  %v3867_v39 = vpop.f32.mrf.mxu1 }
 0x44d   : > { %v5120_v63 = vmax.f32 %v5119_v20, %v5002_v41  ;;  %v4626_v17 = vadd.f32 %v7930_v21, %v4456_v33  ;;  %v4627_v4 = vadd.f32 %v7940_v62, %v4457_v35  ;;  %v4464_v50 = vmul.f32 %v7923_v24, %v3862_v31  ;;  %v3754_v5 = vpop.f32.mrf.mxu0 }
 0x44e   : > { %v5003_v42 = vsel %vm4747_vm2, %v4619_v44, %v4875_v15  ;;  %v3864_v61 = vadd.f32 %v3863_v18, %v3750_v37  ;;  %v3868_v14 = vadd.f32 %v3867_v39, %v3754_v5  ;;  %v3869_v16 = vpop.f32.mrf.mxu1  ;;  %v7994_v47 = vunpack.c.l.s4 %v6343_v1 }
 0x44f   : > { %v5141_v52 = vmax.f32 %v5140_v57, %v5003_v42  ;;  %vm4754_vm3 = vcmp.gt.f32.partialorder %v4626_v17, 0.0  ;;  %v4882_v9 = vmul.f32 0.01, %v4626_v17  ;;  %vm4755_vm4 = vcmp.gt.f32.partialorder %v4627_v4, 0.0  ;;  %v3756_v32 = vpop.f32.mrf.mxu0 }
 0x450   : > { %v4883_v53 = vmul.f32 0.01, %v4627_v4  ;;  %v4634_v13 = vadd.f32 %v7930_v21, %v4464_v50  ;;  %v4465_v58 = vmul.f32 %v7934_v36, %v3864_v61  ;;  %v4472_v8 = vmul.f32 %v7923_v24, %v3868_v14  ;;  %v3871_v45 = vpop.f32.mrf.mxu1 }
 0x451   : > { %v5010_v11 = vsel %vm4754_vm3, %v4626_v17, %v4882_v9  ;;  %v3870_v54 = vadd.f32 %v3869_v16, %v3756_v32  ;;  %v3758_v48 = vpop.f32.mrf.mxu0 }
 0x452   : > { %v5121_v60 = vmax.f32 %v5120_v63, %v5010_v11  ;;  %v5011_v7 = vsel %vm4755_vm4, %v4627_v4, %v4883_v53  ;;  %vm4762_vm5 = vcmp.gt.f32.partialorder %v4634_v13, 0.0  ;;  %v4890_v10 = vmul.f32 0.01, %v4634_v13  ;;  %v3873_v34 = vpop.f32.mrf.mxu1 }
 0x453   : > { %v5142_v6 = vmax.f32 %v5141_v52, %v5011_v7  ;;  %v4635_v28 = vadd.f32 %v7940_v62, %v4465_v58  ;;  %v4642_v12 = vadd.f32 %v7930_v21, %v4472_v8  ;;  %v4473_v0 = vmul.f32 %v7934_v36, %v3870_v54  ;;  %v3760_v25 = vpop.f32.mrf.mxu0 }
 0x454   : > { %v5018_v59 = vsel %vm4762_vm5, %v4634_v13, %v4890_v10  ;;  %v3872_v51 = vadd.f32 %v3871_v45, %v3758_v48  ;;  %v3874_v27 = vadd.f32 %v3873_v34, %v3760_v25  ;;  %v3877_v49 = vpop.f32.mrf.mxu1  ;;  %v8613_v13 = vld [vmem:[#allocation28_spill] sm:$0xff]  ;;  %v5255_v8 = vunpack.c.0.s8 %v7994_v47 }
 0x455   : > { %v5122_v26 = vmax.f32 %v5121_v60, %v5018_v59  ;;  %vm4763_vm6 = vcmp.gt.f32.partialorder %v4635_v28, 0.0  ;;  %v4891_v29 = vmul.f32 0.01, %v4635_v28  ;;  %vm4770_vm7 = vcmp.gt.f32.partialorder %v4642_v12, 0.0  ;;  %v3764_v23 = vpop.f32.mrf.mxu0 }
 0x456   : > { %v4898_v19 = vmul.f32 0.01, %v4642_v12  ;;  %v4643_v43 = vadd.f32 %v7940_v62, %v4473_v0  ;;  %v4480_v38 = vmul.f32 %v7923_v24, %v3872_v51  ;;  %v4481_v2 = vmul.f32 %v7934_v36, %v3874_v27  ;;  %v3879_v40 = vpop.f32.mrf.mxu1 }
 0x457   : > { %v5019_v30 = vsel %vm4763_vm6, %v4635_v28, %v4891_v29  ;;  %v3878_v20 = vadd.f32 %v3877_v49, %v3764_v23  ;;  %v3766_v55 = vpop.f32.mrf.mxu0  ;;  %v4368_v58 = vsub.s32 4, %v8613_v13  ;;  %v4372_v34 = vsub.s32 5, %v8613_v13 }
 0x458   : > { %v5143_v44 = vmax.f32 %v5142_v6, %v5019_v30  ;;  %v5026_v33 = vsel %vm4770_vm7, %v4642_v12, %v4898_v19  ;;  %vm4771_vm8 = vcmp.gt.f32.partialorder %v4643_v43, 0.0  ;;  %v4899_v35 = vmul.f32 0.01, %v4643_v43  ;;  %v3881_v41 = vpop.f32.mrf.mxu1 }
 0x459   : > { %v5123_v3 = vmax.f32 %v5122_v26, %v5026_v33  ;;  %v4650_v31 = vadd.f32 %v7930_v21, %v4480_v38  ;;  %v4651_v37 = vadd.f32 %v7940_v62, %v4481_v2  ;;  %v4488_v18 = vmul.f32 %v7923_v24, %v3878_v20  ;;  %v3768_v57 = vpop.f32.mrf.mxu0  ;;  %v8014_v20 = vld [vmem:[%s8282_s11] sm:$0xff] }
 0x45a   : > { %v5027_v15 = vsel %vm4771_vm8, %v4643_v43, %v4899_v35  ;;  %v3880_v63 = vadd.f32 %v3879_v40, %v3766_v55  ;;  %v3882_v17 = vadd.f32 %v3881_v41, %v3768_v57  ;;  %v3883_v39 = vpop.f32.mrf.mxu1  ;;  %v8017_v55 = vrot.slane %v8014_v20, %v4368_v58  ;;  %v8022_v40 = vld [vmem:[%s8283_s12] sm:$0xff] }
 0x45b   : > { %v5144_v4 = vmax.f32 %v5143_v44, %v5027_v15  ;;  %vm4778_vm9 = vcmp.gt.f32.partialorder %v4650_v31, 0.0  ;;  %v4906_v50 = vmul.f32 0.01, %v4650_v31  ;;  %vm4779_vm10 = vcmp.gt.f32.partialorder %v4651_v37, 0.0  ;;  %v3770_v5 = vpop.f32.mrf.mxu0 }
 0x45c   : > { %v4907_v42 = vmul.f32 0.01, %v4651_v37  ;;  %v4658_v61 = vadd.f32 %v7930_v21, %v4488_v18  ;;  %v4489_v14 = vmul.f32 %v7934_v36, %v3880_v63  ;;  %v4496_v52 = vmul.f32 %v7923_v24, %v3882_v17  ;;  %v3887_v53 = vpop.f32.mrf.mxu1 }
 0x45d   : > { %v5034_v9 = vsel %vm4778_vm9, %v4650_v31, %v4906_v50  ;;  %v3884_v32 = vadd.f32 %v3883_v39, %v3770_v5  ;;  %v3774_v16 = vpop.f32.mrf.mxu0  ;;  %v8025_v1 = vrot.slane %v8022_v40, %v4368_v58  ;;  %v8032_v17 = vrot.slane %v8014_v20, %v4372_v34 }
 0x45e   : > { %v5124_v11 = vmax.f32 %v5123_v3, %v5034_v9  ;;  %v5035_v54 = vsel %vm4779_vm10, %v4651_v37, %v4907_v42  ;;  %vm4786_vm11 = vcmp.gt.f32.partialorder %v4658_v61, 0.0  ;;  %v4914_v48 = vmul.f32 0.01, %v4658_v61  ;;  %v3889_v28 = vpop.f32.mrf.mxu1 }
 0x45f   : > { %v5145_v45 = vmax.f32 %v5144_v4, %v5035_v54  ;;  %v4659_v60 = vadd.f32 %v7940_v62, %v4489_v14  ;;  %v4666_v7 = vadd.f32 %v7930_v21, %v4496_v52  ;;  %v4497_v10 = vmul.f32 %v7934_v36, %v3884_v32  ;;  %v3776_v6 = vpop.f32.mrf.mxu0 }
 0x460   : > { %v5042_v12 = vsel %vm4786_vm11, %v4658_v61, %v4914_v48  ;;  %v3888_v0 = vadd.f32 %v3887_v53, %v3774_v16  ;;  %v3890_v25 = vadd.f32 %v3889_v28, %v3776_v6  ;;  %v3891_v26 = vpop.f32.mrf.mxu1  ;;  %v8038_v32 = vrot.slane %v8022_v40, %v4372_v34 }
 0x461   : > { %v5125_v59 = vmax.f32 %v5124_v11, %v5042_v12  ;;  %vm4787_vm12 = vcmp.gt.f32.partialorder %v4659_v60, 0.0  ;;  %v4915_v51 = vmul.f32 0.01, %v4659_v60  ;;  %vm4794_vm13 = vcmp.gt.f32.partialorder %v4666_v7, 0.0  ;;  %v3778_v27 = vpop.f32.mrf.mxu0 }
 0x462   : > { %v4922_v29 = vmul.f32 0.01, %v4666_v7  ;;  %v4667_v23 = vadd.f32 %v7940_v62, %v4497_v10  ;;  %v4504_v49 = vmul.f32 %v7923_v24, %v3888_v0  ;;  %v4505_v19 = vmul.f32 %v7934_v36, %v3890_v25  ;;  %v3893_v30 = vpop.f32.mrf.mxu1 }
 0x463   : > { %v5043_v43 = vsel %vm4787_vm12, %v4659_v60, %v4915_v51  ;;  %v3892_v38 = vadd.f32 %v3891_v26, %v3778_v27  ;;  %v3780_v2 = vpop.f32.mrf.mxu0  ;;  %v8041_v58 = vsub.s32 %v5255_v8, %v8613_v13 }
 0x464   : > { %v5146_v47 = vmax.f32 %v5145_v45, %v5043_v43  ;;  %v5050_v44 = vsel %vm4794_vm13, %v4666_v7, %v4922_v29  ;;  %vm4795_vm14 = vcmp.gt.f32.partialorder %v4667_v23, 0.0  ;;  %v4923_v33 = vmul.f32 0.01, %v4667_v23  ;;  %v4043_v57 = vpop.f32.mrf.mxu1 }
 0x465   : > { %v5126_v35 = vmax.f32 %v5125_v59, %v5050_v44  ;;  %v4674_v3 = vadd.f32 %v7930_v21, %v4504_v49  ;;  %v4675_v31 = vadd.f32 %v7940_v62, %v4505_v19  ;;  %v4512_v37 = vmul.f32 %v7923_v24, %v3892_v38  ;;  %v3930_v18 = vpop.f32.mrf.mxu0 }
 0x466   : > { %v5051_v41 = vsel %vm4795_vm14, %v4667_v23, %v4923_v33  ;;  %v3894_v15 = vadd.f32 %v3893_v30, %v3780_v2  ;;  %v4044_v63 = vadd.f32 %v4043_v57, %v3930_v18  ;;  %v4045_v39 = vpop.f32.mrf.mxu1  ;;  %v8053_v43 = vrot.slane %v5249_v46, %v8041_v58 }
 0x467   : > { %v5147_v4 = vmax.f32 %v5146_v47, %v5051_v41  ;;  %vm4802_vm15 = vcmp.gt.f32.partialorder %v4674_v3, 0.0  ;;  %v4930_v50 = vmul.f32 0.01, %v4674_v3  ;;  %vm4803_vm0 = vcmp.gt.f32.partialorder %v4675_v31, 0.0  ;;  %v3932_v5 = vpop.f32.mrf.mxu0 }
 0x468   : > { %v4931_v42 = vmul.f32 0.01, %v4675_v31  ;;  %v4682_v61 = vadd.f32 %v7930_v21, %v4512_v37  ;;  %v4513_v14 = vmul.f32 %v7934_v36, %v3894_v15  ;;  %v4394_v24 = vmul.f32 %v8017_v55, %v4044_v63  ;;  %v4047_v53 = vpop.f32.mrf.mxu1 }
 0x469   : > { %v5058_v52 = vsel %vm4802_vm15, %v4674_v3, %v4930_v50  ;;  %v4046_v9 = vadd.f32 %v4045_v39, %v3932_v5  ;;  %v3934_v16 = vpop.f32.mrf.mxu0 }
 0x46a   : > { %v5127_v11 = vmax.f32 %v5126_v35, %v5058_v52  ;;  %v5059_v54 = vsel %vm4803_vm0, %v4675_v31, %v4931_v42  ;;  %vm4810_vm1 = vcmp.gt.f32.partialorder %v4682_v61, 0.0  ;;  %v4938_v48 = vmul.f32 0.01, %v4682_v61  ;;  %v4049_v10 = vpop.f32.mrf.mxu1 }
 0x46b   : > { %v5148_v45 = vmax.f32 %v5147_v4, %v5059_v54  ;;  %v4683_v21 = vadd.f32 %v7940_v62, %v4513_v14  ;;  %v4564_v36 = vadd.f32 %v8025_v1, %v4394_v24  ;;  %v4395_v60 = vmul.f32 %v8032_v17, %v4046_v9  ;;  %v3936_v7 = vpop.f32.mrf.mxu0 }
 0x46c   : > { %v5066_v6 = vsel %vm4810_vm1, %v4682_v61, %v4938_v48  ;;  %v4048_v28 = vadd.f32 %v4047_v53, %v3934_v16  ;;  %v4050_v12 = vadd.f32 %v4049_v10, %v3936_v7  ;;  %v4053_v34 = vpop.f32.mrf.mxu1 }
 0x46d   : > { %v5128_v0 = vmax.f32 %v5127_v11, %v5066_v6  ;;  %vm4811_vm2 = vcmp.gt.f32.partialorder %v4683_v21, 0.0  ;;  %v4939_v8 = vmul.f32 0.01, %v4683_v21  ;;  %vm4692_vm3 = vcmp.gt.f32.partialorder %v4564_v36, 0.0  ;;  %v3940_v25 = vpop.f32.mrf.mxu0 }
 0x46e   : > { %v4820_v59 = vmul.f32 0.01, %v4564_v36  ;;  %v4565_v51 = vadd.f32 %v8038_v32, %v4395_v60  ;;  %v4402_v62 = vmul.f32 %v8017_v55, %v4048_v28  ;;  %v4403_v27 = vmul.f32 %v8032_v17, %v4050_v12  ;;  %v4055_v19 = vpop.f32.mrf.mxu1 }
 0x46f   : > { %v5129_v26 = vrot.slane %v5128_v0, 4  ;;  %v5067_v29 = vsel %vm4811_vm2, %v4683_v21, %v4939_v8  ;;  %v4054_v23 = vadd.f32 %v4053_v34, %v3940_v25  ;;  %v3942_v49 = vpop.f32.mrf.mxu0 }
 0x470   : > { %v5149_v38 = vmax.f32 %v5148_v45, %v5067_v29  ;;  %v4948_v2 = vsel %vm4692_vm3, %v4564_v36, %v4820_v59  ;;  %vm4693_vm4 = vcmp.gt.f32.partialorder %v4565_v51, 0.0  ;;  %v4821_v30 = vmul.f32 0.01, %v4565_v51  ;;  %v4057_v31 = vpop.f32.mrf.mxu1 }
 0x471   : > { %v5130_v47 = vmax.f32 %v5128_v0, %v5129_v26  ;;  %v4572_v44 = vadd.f32 %v8025_v1, %v4402_v62  ;;  %v4573_v33 = vadd.f32 %v8038_v32, %v4403_v27  ;;  %v4410_v35 = vmul.f32 %v8017_v55, %v4054_v23  ;;  %v3944_v3 = vpop.f32.mrf.mxu0 }
 0x472   : > { %v5150_v37 = vrot.slane %v5149_v38, 4  ;;  %v4949_v18 = vsel %vm4693_vm4, %v4565_v51, %v4821_v30  ;;  %v4056_v57 = vadd.f32 %v4055_v19, %v3942_v49  ;;  %v4058_v41 = vadd.f32 %v4057_v31, %v3944_v3  ;;  %v4059_v15 = vpop.f32.mrf.mxu1 }
 0x473   : > { %v5131_v22 = vrot.slane %v5130_v47, 2  ;;  %vm4700_vm5 = vcmp.gt.f32.partialorder %v4572_v44, 0.0  ;;  %v4828_v56 = vmul.f32 0.01, %v4572_v44  ;;  %vm4701_vm6 = vcmp.gt.f32.partialorder %v4573_v33, 0.0  ;;  %v3946_v46 = vpop.f32.mrf.mxu0 }
 0x474   : > { %v5151_v63 = vmax.f32 %v5149_v38, %v5150_v37  ;;  %v4829_v4 = vmul.f32 0.01, %v4573_v33  ;;  %v4580_v50 = vadd.f32 %v8025_v1, %v4410_v35  ;;  %v4411_v5 = vmul.f32 %v8032_v17, %v4056_v57  ;;  %v4063_v52 = vpop.f32.mrf.mxu1 }
 0x475   : > { %v5132_v39 = vmax.f32 %v5130_v47, %v5131_v22  ;;  %v4956_v42 = vsel %vm4700_vm5, %v4572_v44, %v4828_v56  ;;  %v4418_v61 = vmul.f32 %v8017_v55, %v4058_v41  ;;  %v4060_v14 = vadd.f32 %v4059_v15, %v3946_v46  ;;  %v3950_v24 = vpop.f32.mrf.mxu0 }
 0x476   : > { %v5152_v9 = vrot.slane %v5151_v63, 2  ;;  %v5156_v16 = vmax.f32 %v4948_v2, %v4956_v42  ;;  %v4957_v53 = vsel %vm4701_vm6, %v4573_v33, %v4829_v4  ;;  %vm4708_vm7 = vcmp.gt.f32.partialorder %v4580_v50, 0.0  ;;  %v4065_v36 = vpop.f32.mrf.mxu1 }
 0x477   : > { %v5133_v11 = vrot.slane %v5132_v39, 1  ;;  %v5177_v54 = vmax.f32 %v4949_v18, %v4957_v53  ;;  %v4836_v48 = vmul.f32 0.01, %v4580_v50  ;;  %v4581_v45 = vadd.f32 %v8038_v32, %v4411_v5  ;;  %v3952_v21 = vpop.f32.mrf.mxu0 }
 0x478   : > { %v5153_v60 = vmax.f32 %v5151_v63, %v5152_v9  ;;  %v4588_v7 = vadd.f32 %v8025_v1, %v4418_v61  ;;  %v4419_v10 = vmul.f32 %v8032_v17, %v4060_v14  ;;  %v4064_v6 = vadd.f32 %v4063_v52, %v3950_v24  ;;  %v4067_v25 = vpop.f32.mrf.mxu1 }
 0x479   : > { %v5134_v28 = vmax.f32 %v5132_v39, %v5133_v11  ;;  %v4964_v12 = vsel %vm4708_vm7, %v4580_v50, %v4836_v48  ;;  %vm4709_vm8 = vcmp.gt.f32.partialorder %v4581_v45, 0.0  ;;  %v4837_v0 = vmul.f32 0.01, %v4581_v45  ;;  %v3954_v8 = vpop.f32.mrf.mxu0 }
 0x47a   : > { %v5154_v34 = vrot.slane %v5153_v60, 1  ;;  %v5157_v59 = vmax.f32 %v5156_v16, %v4964_v12  ;;  %vm4716_vm9 = vcmp.gt.f32.partialorder %v4588_v7, 0.0  ;;  %v4844_v51 = vmul.f32 0.01, %v4588_v7  ;;  %v4069_v49 = vpop.f32.mrf.mxu1 }
 0x47b   : > { %v4965_v62 = vsel %vm4709_vm8, %v4581_v45, %v4837_v0  ;;  %v4589_v27 = vadd.f32 %v8038_v32, %v4419_v10  ;;  %v4426_v26 = vmul.f32 %v8017_v55, %v4064_v6  ;;  %v4066_v29 = vadd.f32 %v4065_v36, %v3952_v21  ;;  %v3956_v23 = vpop.f32.mrf.mxu0 }
 0x47c   : > { %v5155_v19 = vmax.f32 %v5153_v60, %v5154_v34  ;;  %v5178_v38 = vmax.f32 %v5177_v54, %v4965_v62  ;;  %v4972_v2 = vsel %vm4716_vm9, %v4588_v7, %v4844_v51  ;;  %v4068_v30 = vadd.f32 %v4067_v25, %v3954_v8  ;;  %v4073_v3 = vpop.f32.mrf.mxu1 }
 0x47d   : > { %v5158_v47 = vmax.f32 %v5157_v59, %v4972_v2  ;;  %vm4717_vm10 = vcmp.gt.f32.partialorder %v4589_v27, 0.0  ;;  %v4845_v44 = vmul.f32 0.01, %v4589_v27  ;;  %v4596_v33 = vadd.f32 %v8025_v1, %v4426_v26  ;;  %v3960_v35 = vpop.f32.mrf.mxu0 }
 0x47e   : > { %v4427_v31 = vmul.f32 %v8032_v17, %v4066_v29  ;;  %v4434_v37 = vmul.f32 %v8017_v55, %v4068_v30  ;;  %v4070_v18 = vadd.f32 %v4069_v49, %v3956_v23  ;;  %v4074_v57 = vadd.f32 %v4073_v3, %v3960_v35  ;;  %v4075_v46 = vpop.f32.mrf.mxu1 }
 0x47f   : > { %v4973_v41 = vsel %vm4717_vm10, %v4589_v27, %v4845_v44  ;;  %vm4724_vm11 = vcmp.gt.f32.partialorder %v4596_v33, 0.0  ;;  %v4852_v22 = vmul.f32 0.01, %v4596_v33  ;;  %v3962_v56 = vpop.f32.mrf.mxu0  ;;  %v5250_v15 = vcombine.low %v5134_v28, %v5155_v19 }
 0x480   : > { %v5179_v63 = vmax.f32 %v5178_v38, %v4973_v41  ;;  %v4597_v4 = vadd.f32 %v8038_v32, %v4427_v31  ;;  %v4604_v50 = vadd.f32 %v8025_v1, %v4434_v37  ;;  %v4435_v5 = vmul.f32 %v8032_v17, %v4070_v18  ;;  %v4077_v24 = vpop.f32.mrf.mxu1 }
 0x481   : > { %v4980_v39 = vsel %vm4724_vm11, %v4596_v33, %v4852_v22  ;;  %v4442_v42 = vmul.f32 %v8017_v55, %v4074_v57  ;;  %v4076_v61 = vadd.f32 %v4075_v46, %v3962_v56  ;;  %v3964_v14 = vpop.f32.mrf.mxu0  ;;  %v8074_v52 = vrot.slane %v5250_v15, %v8041_v58 }
 0x482   : > { %v5159_v9 = vmax.f32 %v5158_v47, %v4980_v39  ;;  %vm4725_vm12 = vcmp.gt.f32.partialorder %v4597_v4, 0.0  ;;  %v4853_v16 = vmul.f32 0.01, %v4597_v4  ;;  %vm4732_vm13 = vcmp.gt.f32.partialorder %v4604_v50, 0.0  ;;  %v4079_v21 = vpop.f32.mrf.mxu1 }
 0x483   : > { %v4860_v53 = vmul.f32 0.01, %v4604_v50  ;;  %v4605_v11 = vadd.f32 %v8038_v32, %v4435_v5  ;;  %v4612_v54 = vadd.f32 %v8025_v1, %v4442_v42  ;;  %v4443_v48 = vmul.f32 %v8032_v17, %v4076_v61  ;;  %v3966_v45 = vpop.f32.mrf.mxu0 }
 0x484   : > { %v4981_v36 = vsel %vm4725_vm12, %v4597_v4, %v4853_v16  ;;  %v4078_v60 = vadd.f32 %v4077_v24, %v3964_v14  ;;  %v4080_v7 = vadd.f32 %v4079_v21, %v3966_v45  ;;  %v5281_v10 = vcombine.low %v8053_v43, %v8074_v52  ;;  %v4083_v8 = vpop.f32.mrf.mxu1 }
 0x485   : > { %v5180_v6 = vmax.f32 %v5179_v63, %v4981_v36  ;;  %v4988_v28 = vsel %vm4732_vm13, %v4604_v50, %v4860_v53  ;;  %vm4733_vm14 = vcmp.gt.f32.partialorder %v4605_v11, 0.0  ;;  %v4861_v12 = vmul.f32 0.01, %v4605_v11  ;;  %v3970_v0 = vpop.f32.mrf.mxu0 }
 0x486   : > { %v5160_v25 = vmax.f32 %v5159_v9, %v4988_v28  ;;  %vm4740_vm15 = vcmp.gt.f32.partialorder %v4612_v54, 0.0  ;;  %v4868_v34 = vmul.f32 0.01, %v4612_v54  ;;  %v4613_v59 = vadd.f32 %v8038_v32, %v4443_v48  ;;  %v4085_v23 = vpop.f32.mrf.mxu1 }
 0x487   : > { %v4989_v51 = vsel %vm4733_vm14, %v4605_v11, %v4861_v12  ;;  %v4450_v62 = vmul.f32 %v8017_v55, %v4078_v60  ;;  %v4451_v27 = vmul.f32 %v8032_v17, %v4080_v7  ;;  %v4084_v26 = vadd.f32 %v4083_v8, %v3970_v0  ;;  %v3972_v29 = vpop.f32.mrf.mxu0 }
 0x488   : > { %v5181_v49 = vmax.f32 %v5180_v6, %v4989_v51  ;;  %v4996_v19 = vsel %vm4740_vm15, %v4612_v54, %v4868_v34  ;;  %vm4741_vm0 = vcmp.gt.f32.partialorder %v4613_v59, 0.0  ;;  %v4869_v38 = vmul.f32 0.01, %v4613_v59  ;;  %v4087_v35 = vpop.f32.mrf.mxu1 }
 0x489   : > { %v5161_v2 = vmax.f32 %v5160_v25, %v4996_v19  ;;  %v4620_v30 = vadd.f32 %v8025_v1, %v4450_v62  ;;  %v4621_v47 = vadd.f32 %v8038_v32, %v4451_v27  ;;  %v4458_v44 = vmul.f32 %v8017_v55, %v4084_v26  ;;  %v3974_v33 = vpop.f32.mrf.mxu0 }
 0x48a   : > { %v4997_v3 = vsel %vm4741_vm0, %v4613_v59, %v4869_v38  ;;  %v4086_v31 = vadd.f32 %v4085_v23, %v3972_v29  ;;  %v4088_v37 = vadd.f32 %v4087_v35, %v3974_v33  ;;  %v4089_v22 = vpop.f32.mrf.mxu1 }
 0x48b   : > { %v5182_v18 = vmax.f32 %v5181_v49, %v4997_v3  ;;  %vm4748_vm1 = vcmp.gt.f32.partialorder %v4620_v30, 0.0  ;;  %v4876_v57 = vmul.f32 0.01, %v4620_v30  ;;  %vm4749_vm2 = vcmp.gt.f32.partialorder %v4621_v47, 0.0  ;;  %v3976_v41 = vpop.f32.mrf.mxu0 }
 0x48c   : > { %v4877_v56 = vmul.f32 0.01, %v4621_v47  ;;  %v4628_v46 = vadd.f32 %v8025_v1, %v4458_v44  ;;  %v4459_v15 = vmul.f32 %v8032_v17, %v4086_v31  ;;  %v4466_v63 = vmul.f32 %v8017_v55, %v4088_v37  ;;  %v4093_v39 = vpop.f32.mrf.mxu1 }
 0x48d   : > { %v5004_v4 = vsel %vm4748_vm1, %v4620_v30, %v4876_v57  ;;  %v4090_v50 = vadd.f32 %v4089_v22, %v3976_v41  ;;  %v3980_v5 = vpop.f32.mrf.mxu0 }
 0x48e   : > { %v5162_v42 = vmax.f32 %v5161_v2, %v5004_v4  ;;  %v5005_v61 = vsel %vm4749_vm2, %v4621_v47, %v4877_v56  ;;  %vm4756_vm3 = vcmp.gt.f32.partialorder %v4628_v46, 0.0  ;;  %v4884_v14 = vmul.f32 0.01, %v4628_v46  ;;  %v4095_v54 = vpop.f32.mrf.mxu1 }
 0x48f   : > { %v5183_v24 = vmax.f32 %v5182_v18, %v5005_v61  ;;  %v4629_v9 = vadd.f32 %v8038_v32, %v4459_v15  ;;  %v4636_v16 = vadd.f32 %v8025_v1, %v4466_v63  ;;  %v4467_v53 = vmul.f32 %v8032_v17, %v4090_v50  ;;  %v3982_v11 = vpop.f32.mrf.mxu0 }
 0x490   : > { %v5012_v48 = vsel %vm4756_vm3, %v4628_v46, %v4884_v14  ;;  %v4094_v45 = vadd.f32 %v4093_v39, %v3980_v5  ;;  %v4096_v21 = vadd.f32 %v4095_v54, %v3982_v11  ;;  %v4097_v6 = vpop.f32.mrf.mxu1 }
 0x491   : > { %v5163_v36 = vmax.f32 %v5162_v42, %v5012_v48  ;;  %vm4757_vm4 = vcmp.gt.f32.partialorder %v4629_v9, 0.0  ;;  %v4885_v60 = vmul.f32 0.01, %v4629_v9  ;;  %vm4764_vm5 = vcmp.gt.f32.partialorder %v4636_v16, 0.0  ;;  %v3984_v7 = vpop.f32.mrf.mxu0 }
 0x492   : > { %v4892_v28 = vmul.f32 0.01, %v4636_v16  ;;  %v4637_v12 = vadd.f32 %v8038_v32, %v4467_v53  ;;  %v4474_v0 = vmul.f32 %v8017_v55, %v4094_v45  ;;  %v4475_v8 = vmul.f32 %v8032_v17, %v4096_v21  ;;  %v4099_v51 = vpop.f32.mrf.mxu1 }
 0x493   : > { %v5013_v25 = vsel %vm4757_vm4, %v4629_v9, %v4885_v60  ;;  %v4098_v34 = vadd.f32 %v4097_v6, %v3984_v7  ;;  %v3986_v59 = vpop.f32.mrf.mxu0 }
 0x494   : > { %v5184_v62 = vmax.f32 %v5183_v24, %v5013_v25  ;;  %v5020_v27 = vsel %vm4764_vm5, %v4636_v16, %v4892_v28  ;;  %vm4765_vm6 = vcmp.gt.f32.partialorder %v4637_v12, 0.0  ;;  %v4893_v26 = vmul.f32 0.01, %v4637_v12  ;;  %v4103_v2 = vpop.f32.mrf.mxu1 }
 0x495   : > { %v5164_v29 = vmax.f32 %v5163_v36, %v5020_v27  ;;  %v4644_v23 = vadd.f32 %v8025_v1, %v4474_v0  ;;  %v4645_v49 = vadd.f32 %v8038_v32, %v4475_v8  ;;  %v4482_v19 = vmul.f32 %v8017_v55, %v4098_v34  ;;  %v3990_v38 = vpop.f32.mrf.mxu0 }
 0x496   : > { %v5021_v30 = vsel %vm4765_vm6, %v4637_v12, %v4893_v26  ;;  %v4100_v47 = vadd.f32 %v4099_v51, %v3986_v59  ;;  %v4104_v44 = vadd.f32 %v4103_v2, %v3990_v38  ;;  %v4105_v31 = vpop.f32.mrf.mxu1  ;;  %v4376_v38 = vsub.s32 6, %v8613_v13 }
 0x497   : > { %v5185_v33 = vmax.f32 %v5184_v62, %v5021_v30  ;;  %vm4772_vm7 = vcmp.gt.f32.partialorder %v4644_v23, 0.0  ;;  %v4900_v35 = vmul.f32 0.01, %v4644_v23  ;;  %vm4773_vm8 = vcmp.gt.f32.partialorder %v4645_v49, 0.0  ;;  %v3992_v3 = vpop.f32.mrf.mxu0 }
 0x498   : > { %v4901_v37 = vmul.f32 0.01, %v4645_v49  ;;  %v4652_v18 = vadd.f32 %v8025_v1, %v4482_v19  ;;  %v4483_v57 = vmul.f32 %v8032_v17, %v4100_v47  ;;  %v4490_v41 = vmul.f32 %v8017_v55, %v4104_v44  ;;  %v4107_v15 = vpop.f32.mrf.mxu1 }
 0x499   : > { %v5028_v22 = vsel %vm4772_vm7, %v4644_v23, %v4900_v35  ;;  %v4106_v56 = vadd.f32 %v4105_v31, %v3992_v3  ;;  %v3994_v46 = vpop.f32.mrf.mxu0 }
 0x49a   : > { %v5165_v63 = vmax.f32 %v5164_v29, %v5028_v22  ;;  %v5029_v4 = vsel %vm4773_vm8, %v4645_v49, %v4901_v37  ;;  %vm4780_vm9 = vcmp.gt.f32.partialorder %v4652_v18, 0.0  ;;  %v4908_v50 = vmul.f32 0.01, %v4652_v18  ;;  %v4109_v24 = vpop.f32.mrf.mxu1 }
 0x49b   : > { %v5186_v5 = vmax.f32 %v5185_v33, %v5029_v4  ;;  %v4653_v39 = vadd.f32 %v8038_v32, %v4483_v57  ;;  %v4660_v42 = vadd.f32 %v8025_v1, %v4490_v41  ;;  %v4491_v61 = vmul.f32 %v8032_v17, %v4106_v56  ;;  %v3996_v14 = vpop.f32.mrf.mxu0 }
 0x49c   : > { %v5036_v9 = vsel %vm4780_vm9, %v4652_v18, %v4908_v50  ;;  %v4108_v16 = vadd.f32 %v4107_v15, %v3994_v46  ;;  %v4110_v53 = vadd.f32 %v4109_v24, %v3996_v14  ;;  %v4113_v45 = vpop.f32.mrf.mxu1  ;;  %v4380_v22 = vsub.s32 7, %v8613_v13 }
 0x49d   : > { %v5166_v11 = vmax.f32 %v5165_v63, %v5036_v9  ;;  %vm4781_vm10 = vcmp.gt.f32.partialorder %v4653_v39, 0.0  ;;  %v4909_v54 = vmul.f32 0.01, %v4653_v39  ;;  %vm4788_vm11 = vcmp.gt.f32.partialorder %v4660_v42, 0.0  ;;  %v4000_v48 = vpop.f32.mrf.mxu0 }
 0x49e   : > { %v4916_v21 = vmul.f32 0.01, %v4660_v42  ;;  %v4661_v36 = vadd.f32 %v8038_v32, %v4491_v61  ;;  %v4498_v60 = vmul.f32 %v8017_v55, %v4108_v16  ;;  %v4499_v7 = vmul.f32 %v8032_v17, %v4110_v53  ;;  %v4115_v0 = vpop.f32.mrf.mxu1 }
 0x49f   : > { %v5037_v6 = vsel %vm4781_vm10, %v4653_v39, %v4909_v54  ;;  %v4114_v28 = vadd.f32 %v4113_v45, %v4000_v48  ;;  %v4002_v12 = vpop.f32.mrf.mxu0  ;;  %v8120_v14 = vrot.slane %v8014_v20, %v4376_v38  ;;  %v8127_v48 = vrot.slane %v8022_v40, %v4376_v38 }
 0x4a0   : > { %v5187_v8 = vmax.f32 %v5186_v5, %v5037_v6  ;;  %v5044_v25 = vsel %vm4788_vm11, %v4660_v42, %v4916_v21  ;;  %vm4789_vm12 = vcmp.gt.f32.partialorder %v4661_v36, 0.0  ;;  %v4917_v34 = vmul.f32 0.01, %v4661_v36  ;;  %v4117_v29 = vpop.f32.mrf.mxu1 }
 0x4a1   : > { %v5167_v59 = vmax.f32 %v5166_v11, %v5044_v25  ;;  %v4668_v51 = vadd.f32 %v8025_v1, %v4498_v60  ;;  %v4669_v62 = vadd.f32 %v8038_v32, %v4499_v7  ;;  %v4506_v27 = vmul.f32 %v8017_v55, %v4114_v28  ;;  %v4004_v26 = vpop.f32.mrf.mxu0 }
 0x4a2   : > { %v5045_v23 = vsel %vm4789_vm12, %v4661_v36, %v4917_v34  ;;  %v4116_v49 = vadd.f32 %v4115_v0, %v4002_v12  ;;  %v4118_v19 = vadd.f32 %v4117_v29, %v4004_v26  ;;  %v4119_v44 = vpop.f32.mrf.mxu1 }
 0x4a3   : > { %v5188_v2 = vmax.f32 %v5187_v8, %v5045_v23  ;;  %vm4796_vm13 = vcmp.gt.f32.partialorder %v4668_v51, 0.0  ;;  %v4924_v30 = vmul.f32 0.01, %v4668_v51  ;;  %vm4797_vm14 = vcmp.gt.f32.partialorder %v4669_v62, 0.0  ;;  %v4006_v47 = vpop.f32.mrf.mxu0 }
 0x4a4   : > { %v4925_v33 = vmul.f32 0.01, %v4669_v62  ;;  %v4676_v35 = vadd.f32 %v8025_v1, %v4506_v27  ;;  %v4507_v3 = vmul.f32 %v8032_v17, %v4116_v49  ;;  %v4514_v31 = vmul.f32 %v8017_v55, %v4118_v19  ;;  %v4269_v41 = vpop.f32.mrf.mxu1 }
 0x4a5   : > { %v5052_v37 = vsel %vm4796_vm13, %v4668_v51, %v4924_v30  ;;  %v4120_v18 = vadd.f32 %v4119_v44, %v4006_v47  ;;  %v4156_v57 = vpop.f32.mrf.mxu0 }
 0x4a6   : > { %v5168_v56 = vmax.f32 %v5167_v59, %v5052_v37  ;;  %v5053_v46 = vsel %vm4797_vm14, %v4669_v62, %v4925_v33  ;;  %vm4804_vm15 = vcmp.gt.f32.partialorder %v4676_v35, 0.0  ;;  %v4932_v15 = vmul.f32 0.01, %v4676_v35  ;;  %v4271_v42 = vpop.f32.mrf.mxu1 }
 0x4a7   : > { %v5189_v63 = vmax.f32 %v5188_v2, %v5053_v46  ;;  %v4677_v4 = vadd.f32 %v8038_v32, %v4507_v3  ;;  %v4684_v50 = vadd.f32 %v8025_v1, %v4514_v31  ;;  %v4515_v5 = vmul.f32 %v8032_v17, %v4120_v18  ;;  %v4158_v39 = vpop.f32.mrf.mxu0 }
 0x4a8   : > { %v5060_v55 = vsel %vm4804_vm15, %v4676_v35, %v4932_v15  ;;  %v4270_v61 = vadd.f32 %v4269_v41, %v4156_v57  ;;  %v4273_v16 = vpop.f32.mrf.mxu1  ;;  %v4272_v54 = vadd.f32 %v4271_v42, %v4158_v39  ;;  %v8124_v1 = vrot.slane %v8014_v20, %v4380_v22 }
 0x4a9   : > { %v5169_v24 = vmax.f32 %v5168_v56, %v5060_v55  ;;  %vm4805_vm0 = vcmp.gt.f32.partialorder %v4677_v4, 0.0  ;;  %v4933_v13 = vmul.f32 0.01, %v4677_v4  ;;  %vm4812_vm1 = vcmp.gt.f32.partialorder %v4684_v50, 0.0  ;;  %v4160_v9 = vpop.f32.mrf.mxu0 }
 0x4aa   : > { %v4940_v53 = vmul.f32 0.01, %v4684_v50  ;;  %v4685_v11 = vadd.f32 %v8038_v32, %v4515_v5  ;;  %v4274_v45 = vadd.f32 %v4273_v16, %v4160_v9  ;;  %v4275_v36 = vpop.f32.mrf.mxu1  ;;  %v4396_v12 = vmul.f32 %v8120_v14, %v4270_v61 }
 0x4ab   : > { %v5061_v17 = vsel %vm4805_vm0, %v4677_v4, %v4933_v13  ;;  %v4162_v21 = vpop.f32.mrf.mxu0  ;;  %v8131_v32 = vrot.slane %v8022_v40, %v4380_v22  ;;  %v4397_v34 = vmul.f32 %v8124_v1, %v4272_v54 }
 0x4ac   : > { %v5190_v60 = vmax.f32 %v5189_v63, %v5061_v17  ;;  %v5068_v7 = vsel %vm4812_vm1, %v4684_v50, %v4940_v53  ;;  %vm4813_vm2 = vcmp.gt.f32.partialorder %v4685_v11, 0.0  ;;  %v4941_v6 = vmul.f32 0.01, %v4685_v11  ;;  %v4279_v8 = vpop.f32.mrf.mxu1 }
 0x4ad   : > { %v5170_v28 = vmax.f32 %v5169_v24, %v5068_v7  ;;  %v4404_v20 = vmul.f32 %v8120_v14, %v4274_v45  ;;  %v4166_v0 = vpop.f32.mrf.mxu0  ;;  %v4276_v59 = vadd.f32 %v4275_v36, %v4162_v21  ;;  %v4566_v38 = vadd.f32 %v8127_v48, %v4396_v12 }
 0x4ae   : > { %v5069_v25 = vsel %vm4813_vm2, %v4685_v11, %v4941_v6  ;;  %v4280_v51 = vadd.f32 %v4279_v8, %v4166_v0  ;;  %v4281_v29 = vpop.f32.mrf.mxu1  ;;  %v4567_v44 = vadd.f32 %v8131_v32, %v4397_v34 }
 0x4af   : > { %v5171_v62 = vrot.slane %v5170_v28, 4  ;;  %v5191_v27 = vmax.f32 %v5190_v60, %v5069_v25  ;;  %v4168_v26 = vpop.f32.mrf.mxu0  ;;  %v4574_v23 = vadd.f32 %v8127_v48, %v4404_v20  ;;  %v4405_v49 = vmul.f32 %v8124_v1, %v4276_v59 }
 0x4b0   : > { %v4412_v2 = vmul.f32 %v8120_v14, %v4280_v51  ;;  %v4283_v47 = vpop.f32.mrf.mxu1  ;;  %v4282_v37 = vadd.f32 %v4281_v29, %v4168_v26  ;;  %vm4694_vm4 = vcmp.gt.f32.partialorder %v4566_v38, 0.0  ;;  %v4822_v15 = vmul.f32 0.01, %v4566_v38 }
 0x4b1   : > { %v5172_v19 = vmax.f32 %v5170_v28, %v5171_v62  ;;  %v5192_v40 = vrot.slane %v5191_v27, 4  ;;  %v4170_v30 = vpop.f32.mrf.mxu0  ;;  %v4830_v33 = vmul.f32 0.01, %v4574_v23  ;;  %v4575_v31 = vadd.f32 %v8131_v32, %v4405_v49 }
 0x4b2   : > { %v4285_v57 = vpop.f32.mrf.mxu1  ;;  %vm4702_vm3 = vcmp.gt.f32.partialorder %v4574_v23, 0.0  ;;  %v4582_v41 = vadd.f32 %v8127_v48, %v4412_v2  ;;  %v4284_v22 = vadd.f32 %v4283_v47, %v4170_v30  ;;  %vm4695_vm5 = vcmp.gt.f32.partialorder %v4567_v44, 0.0 }
 0x4b3   : > { %v5173_v35 = vrot.slane %v5172_v19, 2  ;;  %v5193_v3 = vmax.f32 %v5191_v27, %v5192_v40  ;;  %v4172_v18 = vpop.f32.mrf.mxu0  ;;  %v4823_v50 = vmul.f32 0.01, %v4567_v44  ;;  %v4413_v5 = vmul.f32 %v8124_v1, %v4282_v37 }
 0x4b4   : > { %v4289_v4 = vpop.f32.mrf.mxu1  ;;  %v4420_v39 = vmul.f32 %v8120_v14, %v4284_v22  ;;  %v4958_v55 = vsel %vm4702_vm3, %v4574_v23, %v4830_v33  ;;  %vm4703_vm6 = vcmp.gt.f32.partialorder %v4575_v31, 0.0  ;;  %v4286_v61 = vadd.f32 %v4285_v57, %v4172_v18 }
 0x4b5   : > { %v5174_v56 = vmax.f32 %v5172_v19, %v5173_v35  ;;  %v5194_v46 = vrot.slane %v5193_v3, 2  ;;  %v4176_v63 = vpop.f32.mrf.mxu0  ;;  %v4831_v9 = vmul.f32 0.01, %v4575_v31  ;;  %vm4710_vm7 = vcmp.gt.f32.partialorder %v4582_v41, 0.0 }
 0x4b6   : > { %v4291_v13 = vpop.f32.mrf.mxu1  ;;  %v4838_v16 = vmul.f32 0.01, %v4582_v41  ;;  %v4290_v53 = vadd.f32 %v4289_v4, %v4176_v63  ;;  %v4583_v17 = vadd.f32 %v8131_v32, %v4413_v5  ;;  %v4590_v45 = vadd.f32 %v8127_v48, %v4420_v39 }
 0x4b7   : > { %v5195_v42 = vmax.f32 %v5193_v3, %v5194_v46  ;;  %v4178_v24 = vpop.f32.mrf.mxu0  ;;  %v5175_v11 = vrot.slane %v5174_v56, 1  ;;  %v4950_v60 = vsel %vm4694_vm4, %v4566_v38, %v4822_v15  ;;  %v4951_v7 = vsel %vm4695_vm5, %v4567_v44, %v4823_v50 }
 0x4b8   : > { %v4293_v36 = vpop.f32.mrf.mxu1  ;;  %v4421_v6 = vmul.f32 %v8124_v1, %v4286_v61  ;;  %v5198_v12 = vmax.f32 %v4950_v60, %v4958_v55  ;;  %v4428_v20 = vmul.f32 %v8120_v14, %v4290_v53  ;;  %v4292_v0 = vadd.f32 %v4291_v13, %v4178_v24 }
 0x4b9   : > { %v5196_v54 = vrot.slane %v5195_v42, 1  ;;  %v4180_v21 = vpop.f32.mrf.mxu0  ;;  %v4959_v34 = vsel %vm4703_vm6, %v4575_v31, %v4831_v9  ;;  %v4966_v59 = vsel %vm4710_vm7, %v4582_v41, %v4838_v16  ;;  %v8154_v27 = vmax.f32 %v5174_v56, %v5175_v11 }
 0x4ba   : > { %v4295_v25 = vpop.f32.mrf.mxu1  ;;  %v4294_v51 = vadd.f32 %v4293_v36, %v4180_v21  ;;  %vm4711_vm8 = vcmp.gt.f32.partialorder %v4583_v17, 0.0  ;;  %v4839_v26 = vmul.f32 0.01, %v4583_v17  ;;  %v4846_v29 = vmul.f32 0.01, %v4590_v45 }
 0x4bb   : > { %v8149_v28 = vmax.f32 %v5195_v42, %v5196_v54  ;;  %v4182_v8 = vpop.f32.mrf.mxu0  ;;  %vm4718_vm9 = vcmp.gt.f32.partialorder %v4590_v45, 0.0  ;;  %v4591_v19 = vadd.f32 %v8131_v32, %v4421_v6  ;;  %v4598_v40 = vadd.f32 %v8127_v48, %v4428_v20 }
 0x4bc   : > { %v4296_v62 = vadd.f32 %v4295_v25, %v4182_v8  ;;  %v4299_v49 = vpop.f32.mrf.mxu1  ;;  %v4429_v38 = vmul.f32 %v8124_v1, %v4292_v0  ;;  %v4436_v2 = vmul.f32 %v8120_v14, %v4294_v51  ;;  %v5219_v3 = vmax.f32 %v4951_v7, %v4959_v34 }
 0x4bd   : > { %v4186_v23 = vpop.f32.mrf.mxu0  ;;  %v5251_v35 = vcombine.low %v8154_v27, %v8149_v28  ;;  %v5199_v31 = vmax.f32 %v5198_v12, %v4966_v59  ;;  %v4967_v37 = vsel %vm4711_vm8, %v4583_v17, %v4839_v26  ;;  %v4974_v18 = vsel %vm4718_vm9, %v4590_v45, %v4846_v29 }
 0x4be   : > { %v4437_v30 = vmul.f32 %v8124_v1, %v4296_v62  ;;  %v4300_v47 = vadd.f32 %v4299_v49, %v4186_v23  ;;  %v4301_v33 = vpop.f32.mrf.mxu1  ;;  %vm4719_vm10 = vcmp.gt.f32.partialorder %v4591_v19, 0.0  ;;  %v4847_v56 = vmul.f32 0.01, %v4591_v19 }
 0x4bf   : > { %v4188_v44 = vpop.f32.mrf.mxu0  ;;  %v4854_v46 = vmul.f32 0.01, %v4598_v40  ;;  %v4599_v15 = vadd.f32 %v8131_v32, %v4429_v38  ;;  %vm4726_vm11 = vcmp.gt.f32.partialorder %v4598_v40, 0.0  ;;  %v4606_v63 = vadd.f32 %v8127_v48, %v4436_v2 }
 0x4c0   : > { %v4302_v57 = vadd.f32 %v4301_v33, %v4188_v44  ;;  %v4303_v22 = vpop.f32.mrf.mxu1  ;;  %v4607_v4 = vadd.f32 %v8131_v32, %v4437_v30  ;;  %v4444_v50 = vmul.f32 %v8120_v14, %v4300_v47  ;;  %v5220_v61 = vmax.f32 %v5219_v3, %v4967_v37 }
 0x4c1   : > { %v4190_v41 = vpop.f32.mrf.mxu0  ;;  %v5200_v24 = vmax.f32 %v5199_v31, %v4974_v18  ;;  %v4975_v53 = vsel %vm4719_vm10, %v4591_v19, %v4847_v56  ;;  %v4982_v11 = vsel %vm4726_vm11, %v4598_v40, %v4854_v46  ;;  %vm4727_vm12 = vcmp.gt.f32.partialorder %v4599_v15, 0.0 }
 0x4c2   : > { %v4305_v39 = vpop.f32.mrf.mxu1  ;;  %v4445_v42 = vmul.f32 %v8124_v1, %v4302_v57  ;;  %v4304_v55 = vadd.f32 %v4303_v22, %v4190_v41  ;;  %v4855_v54 = vmul.f32 0.01, %v4599_v15  ;;  %vm4734_vm13 = vcmp.gt.f32.partialorder %v4606_v63, 0.0 }
 0x4c3   : > { %v4192_v5 = vpop.f32.mrf.mxu0  ;;  %v4862_v17 = vmul.f32 0.01, %v4606_v63  ;;  %v4863_v45 = vmul.f32 0.01, %v4607_v4  ;;  %v4614_v21 = vadd.f32 %v8127_v48, %v4444_v50  ;;  %vm4735_vm14 = vcmp.gt.f32.partialorder %v4607_v4, 0.0 }
 0x4c4   : > { %v4306_v13 = vadd.f32 %v4305_v39, %v4192_v5  ;;  %v4309_v16 = vpop.f32.mrf.mxu1  ;;  %v4615_v7 = vadd.f32 %v8131_v32, %v4445_v42  ;;  %v4452_v6 = vmul.f32 %v8120_v14, %v4304_v55  ;;  %v5221_v34 = vmax.f32 %v5220_v61, %v4975_v53 }
 0x4c5   : > { %v4196_v9 = vpop.f32.mrf.mxu0  ;;  %v5201_v59 = vmax.f32 %v5200_v24, %v4982_v11  ;;  %v4983_v51 = vsel %vm4727_vm12, %v4599_v15, %v4855_v54  ;;  %v4990_v62 = vsel %vm4734_vm13, %v4606_v63, %v4862_v17  ;;  %v4991_v26 = vsel %vm4735_vm14, %v4607_v4, %v4863_v45 }
 0x4c6   : > { %v4311_v60 = vpop.f32.mrf.mxu1  ;;  %v4310_v12 = vadd.f32 %v4309_v16, %v4196_v9  ;;  %v4453_v20 = vmul.f32 %v8124_v1, %v4306_v13  ;;  %v4870_v29 = vmul.f32 0.01, %v4614_v21  ;;  %vm4742_vm15 = vcmp.gt.f32.partialorder %v4614_v21, 0.0 }
 0x4c7   : > { %v4198_v36 = vpop.f32.mrf.mxu0  ;;  %v4871_v40 = vmul.f32 0.01, %v4615_v7  ;;  %v4622_v38 = vadd.f32 %v8127_v48, %v4452_v6  ;;  %v5222_v30 = vmax.f32 %v5221_v34, %v4983_v51  ;;  %vm4743_vm0 = vcmp.gt.f32.partialorder %v4615_v7, 0.0 }
 0x4c8   : > { %v4312_v0 = vadd.f32 %v4311_v60, %v4198_v36  ;;  %v4313_v25 = vpop.f32.mrf.mxu1  ;;  %v4460_v2 = vmul.f32 %v8120_v14, %v4310_v12  ;;  %v4623_v47 = vadd.f32 %v8131_v32, %v4453_v20  ;;  %v5202_v57 = vmax.f32 %v5201_v59, %v4990_v62 }
 0x4c9   : > { %v4200_v8 = vpop.f32.mrf.mxu0  ;;  %v5223_v41 = vmax.f32 %v5222_v30, %v4991_v26  ;;  %v4998_v22 = vsel %vm4742_vm15, %v4614_v21, %v4870_v29  ;;  %v4999_v15 = vsel %vm4743_vm0, %v4615_v7, %v4871_v40  ;;  %v4878_v63 = vmul.f32 0.01, %v4622_v38 }
 0x4ca   : > { %v4314_v23 = vadd.f32 %v4313_v25, %v4200_v8  ;;  %v4315_v19 = vpop.f32.mrf.mxu1  ;;  %v4461_v44 = vmul.f32 %v8124_v1, %v4312_v0  ;;  %v4630_v4 = vadd.f32 %v8127_v48, %v4460_v2  ;;  %vm4750_vm1 = vcmp.gt.f32.partialorder %v4622_v38, 0.0 }
 0x4cb   : > { %v4202_v49 = vpop.f32.mrf.mxu0  ;;  %v4879_v5 = vmul.f32 0.01, %v4623_v47  ;;  %vm4751_vm2 = vcmp.gt.f32.partialorder %v4623_v47, 0.0  ;;  %v5203_v9 = vmax.f32 %v5202_v57, %v4998_v22  ;;  %v5224_v16 = vmax.f32 %v5223_v41, %v4999_v15 }
 0x4cc   : > { %v4319_v3 = vpop.f32.mrf.mxu1  ;;  %v4468_v31 = vmul.f32 %v8120_v14, %v4314_v23  ;;  %v4316_v37 = vadd.f32 %v4315_v19, %v4202_v49  ;;  %v4631_v39 = vadd.f32 %v8131_v32, %v4461_v44  ;;  %v5006_v17 = vsel %vm4750_vm1, %v4622_v38, %v4878_v63 }
 0x4cd   : > { %v4206_v33 = vpop.f32.mrf.mxu0  ;;  %v4886_v45 = vmul.f32 0.01, %v4630_v4  ;;  %v5007_v60 = vsel %vm4751_vm2, %v4623_v47, %v4879_v5  ;;  %vm4758_vm3 = vcmp.gt.f32.partialorder %v4630_v4, 0.0  ;;  %v5204_v29 = vmax.f32 %v5203_v9, %v5006_v17 }
 0x4ce   : > { %v4320_v18 = vadd.f32 %v4319_v3, %v4206_v33  ;;  %v4321_v46 = vpop.f32.mrf.mxu1  ;;  %v4469_v50 = vmul.f32 %v8124_v1, %v4316_v37  ;;  %v4638_v24 = vadd.f32 %v8127_v48, %v4468_v31  ;;  %v4887_v7 = vmul.f32 0.01, %v4631_v39 }
 0x4cf   : > { %v4208_v56 = vpop.f32.mrf.mxu0  ;;  %vm4759_vm4 = vcmp.gt.f32.partialorder %v4631_v39, 0.0  ;;  %v5225_v23 = vmax.f32 %v5224_v16, %v5007_v60  ;;  %v5014_v49 = vsel %vm4758_vm3, %v4630_v4, %v4886_v45 }
 0x4d0   : > { %v4322_v42 = vadd.f32 %v4321_v46, %v4208_v56  ;;  %v4323_v61 = vpop.f32.mrf.mxu1  ;;  %v4476_v13 = vmul.f32 %v8120_v14, %v4320_v18  ;;  %v4639_v53 = vadd.f32 %v8131_v32, %v4469_v50  ;;  %v4894_v0 = vmul.f32 0.01, %v4638_v24 }
 0x4d1   : > { %v4210_v55 = vpop.f32.mrf.mxu0  ;;  %vm4766_vm5 = vcmp.gt.f32.partialorder %v4638_v24, 0.0  ;;  %v5015_v19 = vsel %vm4759_vm4, %v4631_v39, %v4887_v7  ;;  %v5205_v37 = vmax.f32 %v5204_v29, %v5014_v49 }
 0x4d2   : > { %v4325_v54 = vpop.f32.mrf.mxu1  ;;  %v4324_v21 = vadd.f32 %v4323_v61, %v4210_v55  ;;  %v4477_v6 = vmul.f32 %v8124_v1, %v4322_v42  ;;  %v4646_v8 = vadd.f32 %v8127_v48, %v4476_v13  ;;  %v4895_v34 = vmul.f32 0.01, %v4639_v53 }
 0x4d3   : > { %v4212_v11 = vpop.f32.mrf.mxu0  ;;  %vm4767_vm6 = vcmp.gt.f32.partialorder %v4639_v53, 0.0  ;;  %v5022_v44 = vsel %vm4766_vm5, %v4638_v24, %v4894_v0  ;;  %v5226_v56 = vmax.f32 %v5225_v23, %v5015_v19 }
 0x4d4   : > { %v4326_v36 = vadd.f32 %v4325_v54, %v4212_v11  ;;  %v4329_v20 = vpop.f32.mrf.mxu1  ;;  %v4484_v25 = vmul.f32 %v8120_v14, %v4324_v21  ;;  %v4647_v40 = vadd.f32 %v8131_v32, %v4477_v6  ;;  %v4902_v33 = vmul.f32 0.01, %v4646_v8 }
 0x4d5   : > { %v4216_v12 = vpop.f32.mrf.mxu0  ;;  %v5023_v18 = vsel %vm4767_vm6, %v4639_v53, %v4895_v34  ;;  %vm4774_vm7 = vcmp.gt.f32.partialorder %v4646_v8, 0.0  ;;  %v5206_v4 = vmax.f32 %v5205_v37, %v5022_v44 }
 0x4d6   : > { %v4485_v59 = vmul.f32 %v8124_v1, %v4326_v36  ;;  %v4330_v51 = vadd.f32 %v4329_v20, %v4216_v12  ;;  %v4331_v26 = vpop.f32.mrf.mxu1  ;;  %v4654_v38 = vadd.f32 %v8127_v48, %v4484_v25  ;;  %v4903_v50 = vmul.f32 0.01, %v4647_v40 }
 0x4d7   : > { %v4218_v62 = vpop.f32.mrf.mxu0  ;;  %v5227_v61 = vmax.f32 %v5226_v56, %v5023_v18  ;;  %v5030_v24 = vsel %vm4774_vm7, %v4646_v8, %v4902_v33  ;;  %vm4775_vm8 = vcmp.gt.f32.partialorder %v4647_v40, 0.0 }
 0x4d8   : > { %v4492_v2 = vmul.f32 %v8120_v14, %v4330_v51  ;;  %v4333_v47 = vpop.f32.mrf.mxu1  ;;  %v4332_v3 = vadd.f32 %v4331_v26, %v4218_v62  ;;  %v4655_v57 = vadd.f32 %v8131_v32, %v4485_v59  ;;  %v4910_v5 = vmul.f32 0.01, %v4654_v38 }
 0x4d9   : > { %v4220_v30 = vpop.f32.mrf.mxu0  ;;  %vm4782_vm9 = vcmp.gt.f32.partialorder %v4654_v38, 0.0  ;;  %v5207_v36 = vmax.f32 %v5206_v4, %v5030_v24  ;;  %v5031_v60 = vsel %vm4775_vm8, %v4647_v40, %v4903_v50 }
 0x4da   : > { %v4334_v31 = vadd.f32 %v4333_v47, %v4220_v30  ;;  %v4335_v22 = vpop.f32.mrf.mxu1  ;;  %v4662_v46 = vadd.f32 %v8127_v48, %v4492_v2  ;;  %v4493_v15 = vmul.f32 %v8124_v1, %v4332_v3  ;;  %v4911_v13 = vmul.f32 0.01, %v4655_v57 }
 0x4db   : > { %v4222_v41 = vpop.f32.mrf.mxu0  ;;  %vm4783_vm10 = vcmp.gt.f32.partialorder %v4655_v57, 0.0  ;;  %v5038_v7 = vsel %vm4782_vm9, %v4654_v38, %v4910_v5  ;;  %v5228_v29 = vmax.f32 %v5227_v61, %v5031_v60  ;;  %v5273_v60 = vrot.slane %v5251_v35, %v8041_v58 }
 0x4dc   : > { %v4500_v63 = vmul.f32 %v8120_v14, %v4334_v31  ;;  %v4336_v39 = vadd.f32 %v4335_v22, %v4222_v41  ;;  %v4339_v55 = vpop.f32.mrf.mxu1  ;;  %v4663_v9 = vadd.f32 %v8131_v32, %v4493_v15  ;;  %v4918_v17 = vmul.f32 0.01, %v4662_v46 }
 0x4dd   : > { %v4226_v42 = vpop.f32.mrf.mxu0  ;;  %vm4790_vm11 = vcmp.gt.f32.partialorder %v4662_v46, 0.0  ;;  %v5039_v34 = vsel %vm4783_vm10, %v4655_v57, %v4911_v13  ;;  %v5208_v23 = vmax.f32 %v5207_v36, %v5038_v7 }
 0x4de   : > { %v4670_v16 = vadd.f32 %v8127_v48, %v4500_v63  ;;  %v4501_v53 = vmul.f32 %v8124_v1, %v4336_v39  ;;  %v4341_v54 = vpop.f32.mrf.mxu1  ;;  %v4340_v45 = vadd.f32 %v4339_v55, %v4226_v42  ;;  %v4919_v59 = vmul.f32 0.01, %v4663_v9 }
 0x4df   : > { %v4228_v11 = vpop.f32.mrf.mxu0  ;;  %v5046_v49 = vsel %vm4790_vm11, %v4662_v46, %v4918_v17  ;;  %vm4791_vm13 = vcmp.gt.f32.partialorder %v4663_v9, 0.0  ;;  %v5229_v30 = vmax.f32 %v5228_v29, %v5039_v34 }
 0x4e0   : > { %v4342_v21 = vadd.f32 %v4341_v54, %v4228_v11  ;;  %v4343_v12 = vpop.f32.mrf.mxu1  ;;  %v4926_v20 = vmul.f32 0.01, %v4670_v16  ;;  %v4671_v0 = vadd.f32 %v8131_v32, %v4501_v53  ;;  %v4508_v8 = vmul.f32 %v8120_v14, %v4340_v45 }
 0x4e1   : > { %v4230_v6 = vpop.f32.mrf.mxu0  ;;  %vm4798_vm12 = vcmp.gt.f32.partialorder %v4670_v16, 0.0  ;;  %v5209_v33 = vmax.f32 %v5208_v23, %v5046_v49  ;;  %v5047_v3 = vsel %vm4791_vm13, %v4663_v9, %v4919_v59 }
 0x4e2   : > { %v4509_v25 = vmul.f32 %v8124_v1, %v4342_v21  ;;  %v4344_v51 = vadd.f32 %v4343_v12, %v4230_v6  ;;  %v4345_v26 = vpop.f32.mrf.mxu1  ;;  %v4927_v19 = vmul.f32 0.01, %v4671_v0  ;;  %v4678_v40 = vadd.f32 %v8127_v48, %v4508_v8 }
 0x4e3   : > { %v4232_v62 = vpop.f32.mrf.mxu0  ;;  %v5054_v47 = vsel %vm4798_vm12, %v4670_v16, %v4926_v20  ;;  %vm4799_vm14 = vcmp.gt.f32.partialorder %v4671_v0, 0.0  ;;  %v5230_v46 = vmax.f32 %v5229_v30, %v5047_v3  ;;  %v5289_v12 = vrot.slane %v5281_v10, %v8041_v58 }
 0x4e4   : > { %v4679_v38 = vadd.f32 %v8131_v32, %v4509_v25  ;;  %v4516_v2 = vmul.f32 %v8120_v14, %v4344_v51  ;;  %v4346_v44 = vadd.f32 %v4345_v26, %v4232_v62  ;;  %vm4806_vm15 = vcmp.gt.f32.partialorder %v4678_v40, 0.0 }
 0x4e5   : > { %v4934_v31 = vmul.f32 0.01, %v4678_v40  ;;  %v5210_v41 = vmax.f32 %v5209_v33, %v5054_v47  ;;  %v5055_v22 = vsel %vm4799_vm14, %v4671_v0, %v4927_v19  ;;  %v5240_v0 = vld [vmem:[%s6575_s15] sm:$0xff] }
 0x4e6   : > { %vm4807_vm0 = vcmp.gt.f32.partialorder %v4679_v38, 0.0  ;;  %v4935_v37 = vmul.f32 0.01, %v4679_v38  ;;  %v4686_v18 = vadd.f32 %v8127_v48, %v4516_v2  ;;  %v4517_v57 = vmul.f32 %v8124_v1, %v4346_v44 }
 0x4e7   : > { %v5062_v56 = vsel %vm4806_vm15, %v4678_v40, %v4934_v31  ;;  %v5231_v50 = vmax.f32 %v5230_v46, %v5055_v22 }
 0x4e8   : > { %vm4814_vm1 = vcmp.gt.f32.partialorder %v4686_v18, 0.0  ;;  %v4942_v14 = vmul.f32 0.01, %v4686_v18  ;;  %v5211_v15 = vmax.f32 %v5210_v41, %v5062_v56  ;;  %v5063_v63 = vsel %vm4807_vm0, %v4679_v38, %v4935_v37 }
 0x4e9   : > { %v4687_v4 = vadd.f32 %v8131_v32, %v4517_v57  ;;  %v5232_v55 = vmax.f32 %v5231_v50, %v5063_v63 }
 0x4ea   : > { %v5070_v5 = vsel %vm4814_vm1, %v4686_v18, %v4942_v14 }
 0x4eb   : > { %v5212_v39 = vmax.f32 %v5211_v15, %v5070_v5  ;;  %vm4815_vm2 = vcmp.gt.f32.partialorder %v4687_v4, 0.0  ;;  %v4943_v42 = vmul.f32 0.01, %v4687_v4 }
 0x4ed   : > { %v5213_v61 = vrot.slane %v5212_v39, 4  ;;  %v5071_v48 = vsel %vm4815_vm2, %v4687_v4, %v4943_v42 }
 0x4ee   : > { %v5233_v24 = vmax.f32 %v5232_v55, %v5071_v48 }
 0x4ef   : > { %v5214_v1 = vmax.f32 %v5212_v39, %v5213_v61 }
 0x4f0   : > { %v5234_v13 = vrot.slane %v5233_v24, 4 }
 0x4f1   : > { %v5215_v9 = vrot.slane %v5214_v1, 2 }
 0x4f2   : > { %v5235_v16 = vmax.f32 %v5233_v24, %v5234_v13 }
 0x4f3   : > { %v5216_v53 = vmax.f32 %v5214_v1, %v5215_v9 }
 0x4f4   : > { %v5236_v11 = vrot.slane %v5235_v16, 2 }
 0x4f5   : > { %v5217_v54 = vrot.slane %v5216_v53, 1 }
 0x4f6   : > { %v5237_v32 = vmax.f32 %v5235_v16, %v5236_v11 }
 0x4f7   : > { %v5218_v45 = vmax.f32 %v5216_v53, %v5217_v54 }
 0x4f8   : > { %v5238_v17 = vrot.slane %v5237_v32, 1 }
 0x4fa   : > { %v5239_v21 = vmax.f32 %v5237_v32, %v5238_v17 }
 0x4fc   : > { %v5252_v36 = vcombine.low %v5218_v45, %v5239_v21 }
 0x4fe   : > { %v5280_v7 = vrot.slane %v5252_v36, %v8041_v58 }
 0x500   : > { %v5282_v6 = vcombine.low %v5273_v60, %v5280_v7 }
 0x502   : > { %v5296_v20 = vrot.slane %v5282_v6, %v8041_v58 }
 0x504   : > { %v5297_v8 = vcombine.low %v5289_v12, %v5296_v20 }
 0x506   : > { %v5299_v25 = vmax.f32 %v5240_v0, %v5297_v8 }
 0x508   : > { %5300 = vst [vmem:[%s6575_s15] sm:$0xff] %v5299_v25 }
 0x509   : > { %6234 = shalt.err (!%p6231_p7)
}
 0x50a   : > { %s6235_s22 = scalar_lea.hbm %s5314_s3, 128  ;;  %s6239_s19 = scalar_lea.hbm %s8284_s13, 256 }
 0x50b   : > { %p6236_p3 = scmp.ne.s32.totalorder %s5314_s3, %s6235_s22  ;;  %p6240_p0 = scmp.lt.s32.totalorder %s5314_s3, %s8284_s13 }
 0x50c   : > { %p6241_p1 = scmp.lt.s32.totalorder %s6239_s19, %s6235_s22 }
 0x50d   : > { %p6237_p13 = pnand %p6236_p3, %p8614_p12 }
 0x50e   : > { %p6242_p8 = por %p6241_p1, %p6240_p0 }
 0x50f   : > { %p6238_p10 = pneg %p6237_p13 }
 0x511   : > { %p6243_p11 = pnand %p6242_p8, %p6238_p10 }
 0x513   : > { %6246 = shalt.err (!%p6243_p11)
}
 0x514   : > { %5888 = dma.vmem_to_hbm [thread:$0]  (%p8614_p12), %s5317_s24, 128, %s5314_s3, %s5302_s17  }
 0x515 PF: > { %s8615_s27 = sld [smem:[#allocation23_spill]] }
 0x516   : > { %s8616_s18 = sld [smem:[#allocation19_spill]] }
 0x517   : > { %s8617_s14 = sld [smem:[#allocation26_spill]] }
 0x51b   : > { %p5925_p2 = scmp.ge.s32.totalorder %s8615_s27, 2 }
 0x51c   : > { %s5328_s25 = sand.u32 1, %s8616_s18  }
 0x51d   : > { %p8618_p4 = scmp.ne.s32.totalorder %s8617_s14, 0  ;;  %s5329_s2 = scalar_lea.sflag [#allocation4], %s5328_s25 }
 0x51f   : > { %p5910_p6 = pnand %p5925_p2, %p8618_p4 }
 0x521   : > { %p5911_p9 = pneg %p5910_p6 }
 0x523   : > { %6296 = dma.done.wait (%p5911_p9), %s5329_s2, 128  }
 0x524   : > { %6298 = vsyncadd (%p5911_p9), %s5329_s2, 4294967168  ;;  %s30_s15 = sadd.s32 1, %s8615_s27   ;;  %s8619_s20 = sld [smem:[#allocation20_spill]] }
 0x525   : > { %p27_p5 = scmp.ge.s32.totalorder %s30_s15, 6   ;;  %s8620_s27 = sld [smem:[#allocation27_spill]] }
 0x526   : > { %s8621_s28 = sld [smem:[#allocation21_spill]]  ;;  %s8625_s25 = smov %s6305_s26 }
 0x527   : > { %s8622_s29 = sld [smem:[#allocation22_spill]]  ;;  %29 = sbr.rel (!%p27_p5) target bundleno = 12 (0xc), region = 136 }
 0x528   : > { %s8623_s30 = sld [smem:[#allocation24_spill]] }
 0x529   : > { %s8624_s14 = sld [smem:[#allocation25_spill]] }
 0x52a   : > { %s8626_s26 = smov %s8619_s20 }
 0x52c   :  { %5334 = vsyncpa [#allocation3], 1 }
 0x52d   :  { %5336 = vsyncpa [#allocation3 + $0x1], 1 }
 0x52e   :  { %5337 = vsyncpa [#allocation6], 1 }
 0x52f   :  { %5338 = vsyncpa [#allocation9], 1 }
 0x530   :  { %5339 = vsyncpa [#allocation12], 1 }
 0x531   :  { %5340 = vsyncpa [#allocation4], 1 }
 0x532   :  { %5342 = vsyncpa [#allocation4 + $0x1], 1 }

</bundles_post_ra>
